<compile_context>
chip_gen: v6e
topology: v6e:2x2x1
jax: 0.10.0
libtpu: 0.0.40
codegen_flags: <defaults>
</compile_context>

<pallas_src>
import functools
import math

import numpy as np
import jax
import jax.numpy as jnp
from jax.experimental import pallas as pl
from jax.experimental.pallas import tpu as pltpu


_GELU_C = 0.7978845608028654          # sqrt(2/pi)
# 48 MiB: large enough for the big-tile dense kernels on v5e/v6e (128 MiB VMEM),
# still safely inside v7x's 64 MiB physical VMEM.
_VMEM_LIMIT = 48 * 1024 * 1024


def _tile_lane(dim, target):
    """Largest divisor of `dim` <= target, preferring 256-aligned (v6e/v7x MXU) then
    128-aligned divisors. Falls back to the full dim (always legal)."""
    if dim <= target:
        return dim
    for align in (256, 128):
        t = (target // align) * align
        while t >= align:
            if dim % t == 0:
                return t
            t -= align
    return dim


def _tile_sublane(dim, target, align=16):
    """Largest `align`-aligned divisor of `dim` <= target (16 = bf16 sublane pack)."""
    if dim <= target:
        return dim
    t = (target // align) * align
    while t >= align:
        if dim % t == 0:
            return t
        t -= align
    return dim


def _apply_act(y, act):
    if act == "gelu":
        # TODO(synk): HF RoBERTa uses the exact erf GELU; tanh approximation used here.
        return 0.5 * y * (1.0 + jnp.tanh(_GELU_C * (y + 0.044715 * y * y * y)))
    if act == "tanh":
        return jnp.tanh(y)
    return y


# ----------------------------------------------------------------------------
# Tiled dense (bf16 MXU, f32 accumulation)
# ----------------------------------------------------------------------------
def _dense_kernel(x_ref, w_ref, b_ref, o_ref, acc_ref, *, act):
    @pl.when(pl.program_id(2) == 0)
    def _():
        acc_ref[...] = jnp.zeros_like(acc_ref)

    acc_ref[...] += jnp.dot(x_ref[...], w_ref[...],
                            preferred_element_type=jnp.float32)

    @pl.when(pl.program_id(2) == pl.num_programs(2) - 1)
    def _():
        y = acc_ref[...] + b_ref[...]
        o_ref[...] = _apply_act(y, act).astype(o_ref.dtype)


def dense(x, w, b, act=None, out_dtype=jnp.bfloat16,
          tm_target=1024, tn_target=768, tk_target=1024):
    """y = act(x @ w + b); tiled, double-buffered, bf16 inputs / f32 accumulate."""
    orig_shape = x.shape
    K = orig_shape[-1]
    N = w.shape[1]
    x2 = x.reshape(-1, K).astype(jnp.bfloat16)
    w2 = w.astype(jnp.bfloat16)                # no-op: weights pre-cast at init
    b2 = b.reshape(1, N).astype(jnp.float32)
    M = x2.shape[0]
    tm = _tile_sublane(M, tm_target)
    tn = _tile_lane(N, tn_target)
    tk = _tile_lane(K, tk_target)
    out = pl.pallas_call(
        functools.partial(_dense_kernel, act=act),
        grid=(M // tm, N // tn, K // tk),
        in_specs=[
            pl.BlockSpec((tm, tk), lambda i, j, k: (i, k)),
            pl.BlockSpec((tk, tn), lambda i, j, k: (k, j)),
            pl.BlockSpec((1, tn), lambda i, j, k: (0, j)),
        ],
        out_specs=pl.BlockSpec((tm, tn), lambda i, j, k: (i, j)),
        out_shape=jax.ShapeDtypeStruct((M, N), out_dtype),
        scratch_shapes=[pltpu.VMEM((tm, tn), jnp.float32)],
        compiler_params=pltpu.CompilerParams(
            dimension_semantics=("parallel", "parallel", "arbitrary"),
            vmem_limit_bytes=_VMEM_LIMIT),
    )(x2, w2, b2)
    return out.reshape(orig_shape[:-1] + (N,))


# ----------------------------------------------------------------------------
# Dense with fused (residual add + LayerNorm) epilogue
# ----------------------------------------------------------------------------
def _dense_ln_kernel(x_ref, w_ref, b_ref, r_ref, g_ref, bb_ref, o_ref, acc_ref, *, eps):
    @pl.when(pl.program_id(1) == 0)
    def _():
        acc_ref[...] = jnp.zeros_like(acc_ref)

    acc_ref[...] += jnp.dot(x_ref[...], w_ref[...],
                            preferred_element_type=jnp.float32)

    @pl.when(pl.program_id(1) == pl.num_programs(1) - 1)
    def _():
        y = acc_ref[...] + b_ref[...] + r_ref[...].astype(jnp.float32)
        mean = jnp.mean(y, axis=-1, keepdims=True)
        var = jnp.mean((y - mean) ** 2, axis=-1, keepdims=True)
        inv = jax.lax.rsqrt(var + eps)
        o_ref[...] = ((y - mean) * inv * g_ref[...] + bb_ref[...]).astype(o_ref.dtype)


def dense_residual_ln(x, w, b, residual, gamma, beta, eps=1e-5,
                      out_dtype=jnp.bfloat16, tm_target=1024, tk_target=1024):
    """LayerNorm(x @ w + b + residual); N (= hidden) is kept whole for the LN."""
    orig_shape = residual.shape
    K = x.shape[-1]
    N = w.shape[1]
    x2 = x.reshape(-1, K).astype(jnp.bfloat16)
    r2 = residual.reshape(-1, N).astype(jnp.bfloat16)
    w2 = w.astype(jnp.bfloat16)
    b2 = b.reshape(1, N).astype(jnp.float32)
    g2 = gamma.reshape(1, N).astype(jnp.float32)
    be2 = beta.reshape(1, N).astype(jnp.float32)
    M = x2.shape[0]
    tm = _tile_sublane(M, tm_target)
    tk = _tile_lane(K, tk_target)
    out = pl.pallas_call(
        functools.partial(_dense_ln_kernel, eps=eps),
        grid=(M // tm, K // tk),
        in_specs=[
            pl.BlockSpec((tm, tk), lambda i, k: (i, k)),
            pl.BlockSpec((tk, N), lambda i, k: (k, 0)),
            pl.BlockSpec((1, N), lambda i, k: (0, 0)),
            pl.BlockSpec((tm, N), lambda i, k: (i, 0)),   # constant over k -> no refetch
            pl.BlockSpec((1, N), lambda i, k: (0, 0)),
            pl.BlockSpec((1, N), lambda i, k: (0, 0)),
        ],
        out_specs=pl.BlockSpec((tm, N), lambda i, k: (i, 0)),
        out_shape=jax.ShapeDtypeStruct((M, N), out_dtype),
        scratch_shapes=[pltpu.VMEM((tm, N), jnp.float32)],
        compiler_params=pltpu.CompilerParams(
            dimension_semantics=("parallel", "arbitrary"),
            vmem_limit_bytes=_VMEM_LIMIT),
    )(x2, w2, b2, r2, g2, be2)
    return out.reshape(orig_shape[:-1] + (N,))


# ----------------------------------------------------------------------------
# Standalone LayerNorm (embeddings only), tiled over rows
# ----------------------------------------------------------------------------
def _layernorm_kernel(x_ref, g_ref, b_ref, o_ref, *, eps):
    x = x_ref[...].astype(jnp.float32)
    mean = jnp.mean(x, axis=-1, keepdims=True)
    var = jnp.mean((x - mean) ** 2, axis=-1, keepdims=True)
    inv = jax.lax.rsqrt(var + eps)
    o_ref[...] = ((x - mean) * inv * g_ref[...] + b_ref[...]).astype(o_ref.dtype)


def layer_norm(x, gamma, beta, eps=1e-5, out_dtype=jnp.bfloat16, tm_target=1024):
    shape = x.shape
    H = shape[-1]
    x2 = x.reshape(-1, H)
    M = x2.shape[0]
    tm = _tile_sublane(M, tm_target)
    out = pl.pallas_call(
        functools.partial(_layernorm_kernel, eps=eps),
        grid=(M // tm,),
        in_specs=[
            pl.BlockSpec((tm, H), lambda i: (i, 0)),
            pl.BlockSpec((1, H), lambda i: (0, 0)),
            pl.BlockSpec((1, H), lambda i: (0, 0)),
        ],
        out_specs=pl.BlockSpec((tm, H), lambda i: (i, 0)),
        out_shape=jax.ShapeDtypeStruct((M, H), out_dtype),
        compiler_params=pltpu.CompilerParams(
            dimension_semantics=("parallel",),
            vmem_limit_bytes=_VMEM_LIMIT),
    )(x2, gamma.reshape(1, H).astype(jnp.float32),
      beta.reshape(1, H).astype(jnp.float32))
    return out.reshape(shape)


# ----------------------------------------------------------------------------
# Multi-head attention: fused QKV in, lane-dense 128-wide head-group blocks out
# ----------------------------------------------------------------------------
def _head_group(nh, dh):
    """Heads per grid step so that the per-group lane width is a multiple of 128."""
    for hg in range(1, nh + 1):
        if nh % hg == 0 and (hg * dh) % 128 == 0:
            return hg
    return nh


def _attn_kernel(q_ref, k_ref, v_ref, m_ref, o_ref, *, hg, dh, scale):
    # q_ref: (1, tq, hg*dh); k_ref/v_ref: (1, S, hg*dh); m_ref: (1, 1, S)
    mask = m_ref[0]                                           # (1, S) f32 additive
    outs = []
    for g in range(hg):                                       # small static unroll (hg<=2 typ.)
        q = q_ref[0, :, g * dh:(g + 1) * dh]                  # ref-level slice -> (tq, dh)
        k = k_ref[0, :, g * dh:(g + 1) * dh]                  # (S, dh)
        v = v_ref[0, :, g * dh:(g + 1) * dh]                  # (S, dh)
        s = jax.lax.dot_general(q, k, (((1,), (1,)), ((), ())),
                                preferred_element_type=jnp.float32)   # (tq, S)
        s = s * scale + mask
        s = s - jnp.max(s, axis=-1, keepdims=True)
        p = jnp.exp(s)
        p = p / jnp.sum(p, axis=-1, keepdims=True)            # exact divide (parity)
        outs.append(jnp.dot(p.astype(v.dtype), v,
                            preferred_element_type=jnp.float32))      # (tq, dh)
    ctx = jnp.concatenate(outs, axis=-1) if hg > 1 else outs[0]       # (tq, hg*dh)
    o_ref[0] = ctx.astype(o_ref.dtype)                        # single lane-dense store


def mha(qkv, mask_add, nh, scale, tq_target=256):
    """qkv: (B, S, 3H) bf16; mask_add: (B, 1, S) f32 -> ctx (B, S, H) bf16."""
    # TODO(synk): for very long S (>= ~2k) switch to a flash-style kv-tiled kernel.
    B, S, threeH = qkv.shape
    H = threeH // 3
    dh = H // nh
    hg = _head_group(nh, dh)          # heads per grid step (128-lane groups)
    gpb = nh // hg                    # number of head groups (grid axis)
    cols = hg * dh
    tq = _tile_sublane(S, tq_target)
    # The same fused qkv tensor is passed three times with different column index
    # maps, so each grid step DMAs only the 128-wide q/k/v slabs of its head group.
    return pl.pallas_call(
        functools.partial(_attn_kernel, hg=hg, dh=dh, scale=scale),
        grid=(B, gpb, S // tq),
        in_specs=[
            pl.BlockSpec((1, tq, cols), lambda b, g, qi: (b, qi, g)),
            pl.BlockSpec((1, S, cols), lambda b, g, qi: (b, 0, gpb + g)),
            pl.BlockSpec((1, S, cols), lambda b, g, qi: (b, 0, 2 * gpb + g)),
            pl.BlockSpec((1, 1, S), lambda b, g, qi: (b, 0, 0)),
        ],
        out_specs=pl.BlockSpec((1, tq, cols), lambda b, g, qi: (b, qi, g)),
        out_shape=jax.ShapeDtypeStruct((B, S, H), jnp.bfloat16),
        compiler_params=pltpu.CompilerParams(
            dimension_semantics=("parallel", "parallel", "parallel"),
            vmem_limit_bytes=_VMEM_LIMIT),
    )(qkv, qkv, qkv, mask_add)


# ----------------------------------------------------------------------------
# Mean word-pooling (bf16 inputs, f32 accumulate)
# ----------------------------------------------------------------------------
def _mean_pool_kernel(seq_ref, b_ref, d_ref, o_ref):
    # einsum 'jk,jm->mk' per batch: contract the token axis -> (W, H)
    num = jax.lax.dot_general(b_ref[0], seq_ref[0], (((0,), (0,)), ((), ())),
                              preferred_element_type=jnp.float32)
    o_ref[0] = (num / d_ref[0]).astype(o_ref.dtype)


def mean_pool(sequence_output, input_bounds, den):
    # TODO(synk): for v7x dual-TC, a second (word/hidden tile) parallel axis could be added.
    B, S, H = sequence_output.shape
    W = input_bounds.shape[2]
    return pl.pallas_call(
        _mean_pool_kernel,
        grid=(B,),
        in_specs=[
            pl.BlockSpec((1, S, H), lambda i: (i, 0, 0)),
            pl.BlockSpec((1, S, W), lambda i: (i, 0, 0)),
            pl.BlockSpec((1, W, 1), lambda i: (i, 0, 0)),
        ],
        out_specs=pl.BlockSpec((1, W, H), lambda i: (i, 0, 0)),
        out_shape=jax.ShapeDtypeStruct((B, W, H), jnp.float32),
        compiler_params=pltpu.CompilerParams(
            dimension_semantics=("parallel",),
            vmem_limit_bytes=_VMEM_LIMIT),
    )(sequence_output.astype(jnp.bfloat16),
      input_bounds.astype(jnp.bfloat16),
      den.astype(jnp.float32))


# ----------------------------------------------------------------------------
# Small synthetic RoBERTa model (glue in plain JAX; compute in Pallas)
# Weights are pre-fused (QKV) and pre-cast to bf16 ONCE at init time.
# ----------------------------------------------------------------------------
def init_params(key, cfg):
    H, I, V = cfg["hidden"], cfg["intermediate"], cfg["vocab"]

    def nrm(k, shape, scale=0.02):
        return scale * jax.random.normal(k, shape, dtype=jnp.float32)

    keys = iter(jax.random.split(key, 128))
    params = {
        "word_emb": nrm(next(keys), (V, H)),
        "pos_emb": nrm(next(keys), (cfg["max_pos"], H)),
        "type_emb": nrm(next(keys), (1, H)),
        "emb_ln_g": jnp.ones((H,), jnp.float32),
        "emb_ln_b": jnp.zeros((H,), jnp.float32),
        "pool_w": nrm(next(keys), (H, H)).astype(jnp.bfloat16),
        "pool_b": jnp.zeros((H,), jnp.float32),
        "layers": [],
    }
    for _ in range(cfg["layers"]):
        qw, kw, vw = nrm(next(keys), (H, H)), nrm(next(keys), (H, H)), nrm(next(keys), (H, H))
        params["layers"].append({
            # Fused + pre-cast once (no per-forward concat / cast -> no extra HBM traffic).
            "qkv_w": jnp.concatenate([qw, kw, vw], axis=1).astype(jnp.bfloat16),
            "qkv_b": jnp.zeros((3 * H,), jnp.float32),
            "o_w": nrm(next(keys), (H, H)).astype(jnp.bfloat16),
            "o_b": jnp.zeros((H,), jnp.float32),
            "attn_ln_g": jnp.ones((H,), jnp.float32),
            "attn_ln_b": jnp.zeros((H,), jnp.float32),
            "i_w": nrm(next(keys), (H, I)).astype(jnp.bfloat16),
            "i_b": jnp.zeros((I,), jnp.float32),
            "f_w": nrm(next(keys), (I, H)).astype(jnp.bfloat16),
            "f_b": jnp.zeros((H,), jnp.float32),
            "out_ln_g": jnp.ones((H,), jnp.float32),
            "out_ln_b": jnp.zeros((H,), jnp.float32),
        })
    return params


def roberta_forward(params, input_ids, attention_mask, input_bounds, cfg):
    B, S = input_ids.shape
    H, nh = cfg["hidden"], cfg["heads"]
    dh = H // nh
    pad_id = 1

    # RoBERTa position ids: cumsum of non-pad mask, offset by padding_idx.
    ne = (input_ids != pad_id).astype(jnp.int32)
    position_ids = jnp.cumsum(ne, axis=1) * ne + pad_id

    # TODO(synk): embedding gathers stay in XLA (no clean Pallas gather at this size).
    emb = (params["word_emb"][input_ids]
           + params["pos_emb"][position_ids]
           + params["type_emb"][jnp.zeros_like(input_ids)])
    x = layer_norm(emb, params["emb_ln_g"], params["emb_ln_b"])          # bf16 (B,S,H)

    # Additive mask kept as (B, 1, S) — no per-head duplication.
    mask_add = ((1.0 - attention_mask.astype(jnp.float32)) * -1e9)[:, None, :]
    scale = 1.0 / math.sqrt(dh)

    for p in params["layers"]:
        qkv = dense(x, p["qkv_w"], p["qkv_b"])                            # (B,S,3H) bf16
        ctx = mha(qkv, mask_add, nh, scale)                               # (B,S,H)  bf16
        # Attention output projection + residual + LayerNorm fused.
        x = dense_residual_ln(ctx, p["o_w"], p["o_b"], x,
                              p["attn_ln_g"], p["attn_ln_b"])
        inter = dense(x, p["i_w"], p["i_b"], act="gelu")                  # (B,S,I)
        # FFN down projection + residual + LayerNorm fused.
        x = dense_residual_ln(inter, p["f_w"], p["f_b"], x,
                              p["out_ln_g"], p["out_ln_b"])

    sequence_output = x.astype(jnp.float32)                               # (B, S, H)
    pooled_output = dense(x[:, 0], params["pool_w"], params["pool_b"],
                          act="tanh", out_dtype=jnp.float32)              # (B, H)
    den = jnp.maximum(jnp.sum(input_bounds, axis=1), 1.0)[..., None]      # (B, W, 1) f32
    wordlevel_out = mean_pool(x, input_bounds, den)                       # (B, W, H) f32
    return wordlevel_out, pooled_output, sequence_output


# ----------------------------------------------------------------------------
# Host-side preprocessing (mirrors tokenize / get_input_ids / get_wordbound_sum)
# ----------------------------------------------------------------------------
def get_wordbound_sum_np(wordbound, maxlen, input_masks):
    B = len(wordbound)
    rows = []
    for bound in wordbound:
        b = np.cumsum(np.asarray(bound, dtype=np.int64)) - 1
        b = np.concatenate([b, np.zeros(maxlen - b.shape[0], dtype=np.int64)])
        rows.append(b)
    input_bounds = np.stack(rows)                                       # (B, maxlen)
    input_bounds = np.concatenate(
        [input_bounds, np.full((B, 1), maxlen - 1, dtype=np.int64)], axis=-1)
    num_classes = int(input_bounds.max()) + 1                           # == maxlen
    onehot = np.eye(num_classes, dtype=np.int64)[input_bounds]          # (B, maxlen+1, W)
    onehot = onehot[:, :-1]                                             # (B, maxlen, W)
    onehot = onehot * input_masks[:, :, None]
    wordmask = onehot.sum(axis=1) != 0                                  # (B, W) bool
    last = wordmask.sum(axis=1) - 1
    wordmask[np.arange(B), last] = False                                # drop </s> word
    return onehot.astype(np.float32), wordmask


if __name__ == "__main__":
    # hidden=256, heads=4 -> head_dim=64 -> head-group lane width 128 (lane-dense).
    cfg = dict(vocab=64, hidden=256, heads=4, layers=2, intermediate=512, max_pos=64)

    # TODO(synk): RobertaTokenizer string tokenization has no TPU equivalent; synthesized here.
    subtok_counts = [[2, 1, 3, 2, 1, 2], [1, 2, 2, 1, 3]]  # sub-tokens per word, per utterance
    wordbound, utt_lens = [], []
    for counts in subtok_counts:
        bound = [1]                       # <s>
        for c in counts:
            bound += [1] + [0] * (c - 1)  # word start flags
        bound.append(1)                   # </s>
        wordbound.append(bound)
        utt_lens.append(len(bound))       # == number of tokens in this utterance
    maxlen = max(utt_lens)
    B = len(wordbound)

    key = jax.random.PRNGKey(0)
    key, k_ids = jax.random.split(key)
    rand_ids = np.asarray(jax.random.randint(k_ids, (B, maxlen), 3, cfg["vocab"]),
                          dtype=np.int32)
    input_ids = np.full((B, maxlen), 1, dtype=np.int32)   # pad token id = 1
    input_masks = np.zeros((B, maxlen), dtype=np.int32)
    for b in range(B):
        L = utt_lens[b]
        input_ids[b, :L] = rand_ids[b, :L]
        input_masks[b, :L] = 1

    input_bounds, wordmask = get_wordbound_sum_np(wordbound, maxlen, input_masks)

    params = init_params(key, cfg)

    fwd = jax.jit(functools.partial(roberta_forward, cfg=cfg))
    wordlevel_out, pooled_output, sequence_output = fwd(
        params,
        jnp.asarray(input_ids),
        jnp.asarray(input_masks),
        jnp.asarray(input_bounds),
    )

    # Module return signature:
    # (wordlevel_out[:, 1:], wordmask[:, 1:], pooled_output, inputs, sequence_output)
    outputs = (
        wordlevel_out[:, 1:],
        jnp.asarray(wordmask)[:, 1:],
        pooled_output,
        jnp.asarray(input_ids),
        sequence_output,
    )
    jax.block_until_ready(outputs)
    print("KERNEL_OK")
</pallas_src>

<mosaic_0001>
module attributes {stable_mosaic.version = 11 : i64} {
  func.func @_dense_kernel(%arg0: i32, %arg1: i32, %arg2: i32, %arg3: memref<26x256xbf16, #tpu.memory_space<vmem>>, %arg4: memref<256x768xbf16, #tpu.memory_space<vmem>>, %arg5: memref<1x768xf32, #tpu.memory_space<vmem>>, %arg6: memref<26x768xbf16, #tpu.memory_space<vmem>>, %arg7: memref<26x768xf32, #tpu.memory_space<vmem>>) attributes {dimension_semantics = [#tpu.dimension_semantics<parallel>, #tpu.dimension_semantics<parallel>, #tpu.dimension_semantics<arbitrary>], iteration_bounds = array<i64: 1, 1, 1>, scalar_prefetch = 0 : i64, scratch_operands = 1 : i64, tpu.core_type = #tpu.core_type<tc>, window_params = [{transform_indices = @transform_0, window_bounds = array<i64: 26, 256>}, {transform_indices = @transform_1, window_bounds = array<i64: 256, 768>}, {transform_indices = @transform_2, window_bounds = array<i64: 1, 768>}, {transform_indices = @transform_3, window_bounds = array<i64: 26, 768>}]} {
    %c0_i32 = arith.constant 0 : i32
    %0 = arith.cmpi eq, %arg2, %c0_i32 : i32
    %1 = arith.extui %0 : i1 to i32
    %c0_i32_0 = arith.constant 0 : i32
    %2 = arith.cmpi ne, %1, %c0_i32_0 : i32
    scf.if %2 {
      %cst_10 = arith.constant 0.000000e+00 : f32
      %12 = vector.broadcast %cst_10 : f32 to vector<26x768xf32>
      %c0_11 = arith.constant 0 : index
      %c0_12 = arith.constant 0 : index
      %13 = vector.load %arg7[%c0_11, %c0_12] : memref<26x768xf32, #tpu.memory_space<vmem>>, vector<26x768xf32>
      tpu.vector_store %arg7[%c0_11, %c0_12], %12 {strides = array<i32>} : memref<26x768xf32, #tpu.memory_space<vmem>>, vector<26x768xf32>,
    } else {
    }
    %c0 = arith.constant 0 : index
    %c0_1 = arith.constant 0 : index
    %3 = vector.load %arg7[%c0, %c0_1] : memref<26x768xf32, #tpu.memory_space<vmem>>, vector<26x768xf32>
    %c0_2 = arith.constant 0 : index
    %c0_3 = arith.constant 0 : index
    %4 = vector.load %arg3[%c0_2, %c0_3] : memref<26x256xbf16, #tpu.memory_space<vmem>>, vector<26x256xbf16>
    %c0_4 = arith.constant 0 : index
    %c0_5 = arith.constant 0 : index
    %5 = vector.load %arg4[%c0_4, %c0_5] : memref<256x768xbf16, #tpu.memory_space<vmem>>, vector<256x768xbf16>
    %cst = arith.constant dense<0.000000e+00> : vector<26x768xf32>
    %6 = tpu.matmul %4, %5, %cst {dimension_numbers = #tpu.dot_dimension_numbers<[1], [0], [0], [1], [0, 0, 1, 1], [], []>} : vector<26x256xbf16>, vector<256x768xbf16>, vector<26x768xf32> -> vector<26x768xf32>
    %7 = arith.addf %3, %6 : vector<26x768xf32>
    %c0_6 = arith.constant 0 : index
    %c0_7 = arith.constant 0 : index
    %8 = vector.load %arg7[%c0_6, %c0_7] : memref<26x768xf32, #tpu.memory_space<vmem>>, vector<26x768xf32>
    tpu.vector_store %arg7[%c0_6, %c0_7], %7 {strides = array<i32>} : memref<26x768xf32, #tpu.memory_space<vmem>>, vector<26x768xf32>,
    %c0_i32_8 = arith.constant 0 : i32
    %9 = arith.cmpi eq, %arg2, %c0_i32_8 : i32
    %10 = arith.extui %9 : i1 to i32
    %c0_i32_9 = arith.constant 0 : i32
    %11 = arith.cmpi ne, %10, %c0_i32_9 : i32
    scf.if %11 {
      %c0_10 = arith.constant 0 : index
      %c0_11 = arith.constant 0 : index
      %12 = vector.load %arg7[%c0_10, %c0_11] : memref<26x768xf32, #tpu.memory_space<vmem>>, vector<26x768xf32>
      %c0_12 = arith.constant 0 : index
      %c0_13 = arith.constant 0 : index
      %13 = vector.load %arg5[%c0_12, %c0_13] : memref<1x768xf32, #tpu.memory_space<vmem>>, vector<1x768xf32>
      %14 = vector.broadcast %13 : vector<1x768xf32> to vector<26x768xf32>
      %15 = arith.addf %12, %14 : vector<26x768xf32>
      %16 = arith.truncf %15 : vector<26x768xf32> to vector<26x768xbf16>
      %c0_14 = arith.constant 0 : index
      %c0_15 = arith.constant 0 : index
      %17 = vector.load %arg6[%c0_14, %c0_15] : memref<26x768xbf16, #tpu.memory_space<vmem>>, vector<26x768xbf16>
      tpu.vector_store %arg6[%c0_14, %c0_15], %16 {strides = array<i32>} : memref<26x768xbf16, #tpu.memory_space<vmem>>, vector<26x768xbf16>,
    } else {
    }
    return
  }
  func.func @transform_0(%arg0: i32, %arg1: i32, %arg2: i32) -> (i32, i32) {
    %c0_i32 = arith.constant 0 : i32
    return %arg0, %arg2 : i32, i32
  }
  func.func @transform_1(%arg0: i32, %arg1: i32, %arg2: i32) -> (i32, i32) {
    %c0_i32 = arith.constant 0 : i32
    return %arg2, %arg1 : i32, i32
  }
  func.func @transform_2(%arg0: i32, %arg1: i32, %arg2: i32) -> (i32, i32) {
    %c0_i32 = arith.constant 0 : i32
    %c0_i32_0 = arith.constant 0 : i32
    return %c0_i32, %arg1 : i32, i32
  }
  func.func @transform_3(%arg0: i32, %arg1: i32, %arg2: i32) -> (i32, i32) {
    %c0_i32 = arith.constant 0 : i32
    return %arg0, %arg1 : i32, i32
  }
}

module attributes {stable_mosaic.version = 11 : i64} {
  func.func @_layernorm_kernel(%arg0: i32, %arg1: memref<26x256xf32, #tpu.memory_space<vmem>>, %arg2: memref<1x256xf32, #tpu.memory_space<vmem>>, %arg3: memref<1x256xf32, #tpu.memory_space<vmem>>, %arg4: memref<26x256xbf16, #tpu.memory_space<vmem>>) attributes {dimension_semantics = [#tpu.dimension_semantics<parallel>], iteration_bounds = array<i64: 1>, scalar_prefetch = 0 : i64, scratch_operands = 0 : i64, tpu.core_type = #tpu.core_type<tc>, window_params = [{transform_indices = @transform_0, window_bounds = array<i64: 26, 256>}, {pipeline_mode = #tpu.pipeline_mode<synchronous>, transform_indices = @transform_1, window_bounds = array<i64: 1, 256>}, {pipeline_mode = #tpu.pipeline_mode<synchronous>, transform_indices = @transform_2, window_bounds = array<i64: 1, 256>}, {transform_indices = @transform_3, window_bounds = array<i64: 26, 256>}]} {
    %c0 = arith.constant 0 : index
    %c0_0 = arith.constant 0 : index
    %0 = vector.load %arg1[%c0, %c0_0] : memref<26x256xf32, #tpu.memory_space<vmem>>, vector<26x256xf32>
    %cst = arith.constant dense<0.000000e+00> : vector<26xf32>
    %1 = vector.multi_reduction <add>, %0, %cst [1] : vector<26x256xf32> to vector<26xf32>
    %2 = vector.shape_cast %1 : vector<26xf32> to vector<26x1xf32>
    %cst_1 = arith.constant 2.560000e+02 : f32
    %3 = vector.broadcast %cst_1 : f32 to vector<26x1xf32>
    %4 = arith.divf %2, %3 : vector<26x1xf32>
    %5 = vector.broadcast %4 : vector<26x1xf32> to vector<26x256xf32>
    %6 = arith.subf %0, %5 : vector<26x256xf32>
    %7 = arith.mulf %6, %6 : vector<26x256xf32>
    %cst_2 = arith.constant dense<0.000000e+00> : vector<26xf32>
    %8 = vector.multi_reduction <add>, %7, %cst_2 [1] : vector<26x256xf32> to vector<26xf32>
    %9 = vector.shape_cast %8 : vector<26xf32> to vector<26x1xf32>
    %cst_3 = arith.constant 2.560000e+02 : f32
    %10 = vector.broadcast %cst_3 : f32 to vector<26x1xf32>
    %11 = arith.divf %9, %10 : vector<26x1xf32>
    %cst_4 = arith.constant 9.99999974E-6 : f32
    %12 = vector.broadcast %cst_4 : f32 to vector<26x1xf32>
    %13 = arith.addf %11, %12 : vector<26x1xf32>
    %14 = math.rsqrt %13 : vector<26x1xf32>
    %15 = vector.broadcast %4 : vector<26x1xf32> to vector<26x256xf32>
    %16 = arith.subf %0, %15 : vector<26x256xf32>
    %17 = vector.broadcast %14 : vector<26x1xf32> to vector<26x256xf32>
    %18 = arith.mulf %16, %17 : vector<26x256xf32>
    %c0_5 = arith.constant 0 : index
    %c0_6 = arith.constant 0 : index
    %19 = vector.load %arg2[%c0_5, %c0_6] : memref<1x256xf32, #tpu.memory_space<vmem>>, vector<1x256xf32>
    %20 = vector.broadcast %19 : vector<1x256xf32> to vector<26x256xf32>
    %21 = arith.mulf %18, %20 : vector<26x256xf32>
    %c0_7 = arith.constant 0 : index
    %c0_8 = arith.constant 0 : index
    %22 = vector.load %arg3[%c0_7, %c0_8] : memref<1x256xf32, #tpu.memory_space<vmem>>, vector<1x256xf32>
    %23 = vector.broadcast %22 : vector<1x256xf32> to vector<26x256xf32>
    %24 = arith.addf %21, %23 : vector<26x256xf32>
    %25 = arith.truncf %24 : vector<26x256xf32> to vector<26x256xbf16>
    %c0_9 = arith.constant 0 : index
    %c0_10 = arith.constant 0 : index
    %26 = vector.load %arg4[%c0_9, %c0_10] : memref<26x256xbf16, #tpu.memory_space<vmem>>, vector<26x256xbf16>
    tpu.vector_store %arg4[%c0_9, %c0_10], %25 {strides = array<i32>} : memref<26x256xbf16, #tpu.memory_space<vmem>>, vector<26x256xbf16>,
    return
  }
  func.func @transform_0(%arg0: i32) -> (i32, i32) {
    %c0_i32 = arith.constant 0 : i32
    %c0_i32_0 = arith.constant 0 : i32
    return %arg0, %c0_i32 : i32, i32
  }
  func.func @transform_1(%arg0: i32) -> (i32, i32) {
    %c0_i32 = arith.constant 0 : i32
    %c0_i32_0 = arith.constant 0 : i32
    %c0_i32_1 = arith.constant 0 : i32
    return %c0_i32, %c0_i32_0 : i32, i32
  }
  func.func @transform_2(%arg0: i32) -> (i32, i32) {
    %c0_i32 = arith.constant 0 : i32
    %c0_i32_0 = arith.constant 0 : i32
    %c0_i32_1 = arith.constant 0 : i32
    return %c0_i32, %c0_i32_0 : i32, i32
  }
  func.func @transform_3(%arg0: i32) -> (i32, i32) {
    %c0_i32 = arith.constant 0 : i32
    %c0_i32_0 = arith.constant 0 : i32
    return %arg0, %c0_i32 : i32, i32
  }
}

module attributes {stable_mosaic.version = 11 : i64} {
  func.func @_attn_kernel(%arg0: i32, %arg1: i32, %arg2: i32, %arg3: memref<1x13x128xbf16, #tpu.memory_space<vmem>>, %arg4: memref<1x13x128xbf16, #tpu.memory_space<vmem>>, %arg5: memref<1x13x128xbf16, #tpu.memory_space<vmem>>, %arg6: memref<1x1x13xf32, #tpu.memory_space<vmem>>, %arg7: memref<1x13x128xbf16, #tpu.memory_space<vmem>>) attributes {dimension_semantics = [#tpu.dimension_semantics<parallel>, #tpu.dimension_semantics<parallel>, #tpu.dimension_semantics<parallel>], iteration_bounds = array<i64: 2, 2, 1>, scalar_prefetch = 0 : i64, scratch_operands = 0 : i64, tpu.core_type = #tpu.core_type<tc>, window_params = [{transform_indices = @transform_0, window_bounds = array<i64: 1, 13, 128>}, {transform_indices = @transform_1, window_bounds = array<i64: 1, 13, 128>}, {transform_indices = @transform_2, window_bounds = array<i64: 1, 13, 128>}, {transform_indices = @transform_3, window_bounds = array<i64: 1, 1, 13>}, {transform_indices = @transform_4, window_bounds = array<i64: 1, 13, 128>}]} {
    %c0 = arith.constant 0 : index
    %c0_0 = arith.constant 0 : index
    %c0_1 = arith.constant 0 : index
    %0 = vector.load %arg6[%c0, %c0_0, %c0_1] : memref<1x1x13xf32, #tpu.memory_space<vmem>>, vector<1x1x13xf32>
    %1 = vector.shape_cast %0 : vector<1x1x13xf32> to vector<1x13xf32>
    %c0_2 = arith.constant 0 : index
    %c0_3 = arith.constant 0 : index
    %c0_4 = arith.constant 0 : index
    %2 = vector.load %arg3[%c0_2, %c0_3, %c0_4] : memref<1x13x128xbf16, #tpu.memory_space<vmem>>, vector<1x13x64xbf16>
    %3 = vector.shape_cast %2 : vector<1x13x64xbf16> to vector<13x64xbf16>
    %c0_5 = arith.constant 0 : index
    %c0_6 = arith.constant 0 : index
    %c0_7 = arith.constant 0 : index
    %4 = vector.load %arg4[%c0_5, %c0_6, %c0_7] : memref<1x13x128xbf16, #tpu.memory_space<vmem>>, vector<1x13x64xbf16>
    %5 = vector.shape_cast %4 : vector<1x13x64xbf16> to vector<13x64xbf16>
    %c0_8 = arith.constant 0 : index
    %c0_9 = arith.constant 0 : index
    %c0_10 = arith.constant 0 : index
    %6 = vector.load %arg5[%c0_8, %c0_9, %c0_10] : memref<1x13x128xbf16, #tpu.memory_space<vmem>>, vector<1x13x64xbf16>
    %7 = vector.shape_cast %6 : vector<1x13x64xbf16> to vector<13x64xbf16>
    %cst = arith.constant dense<0.000000e+00> : vector<13x13xf32>
    %8 = tpu.matmul %3, %5, %cst {dimension_numbers = #tpu.dot_dimension_numbers<[1], [1], [0], [0], [0, 0, 1, 0], [], []>} : vector<13x64xbf16>, vector<13x64xbf16>, vector<13x13xf32> -> vector<13x13xf32>
    %cst_11 = arith.constant 1.250000e-01 : f32
    %9 = vector.broadcast %cst_11 : f32 to vector<13x13xf32>
    %10 = arith.mulf %8, %9 : vector<13x13xf32>
    %11 = vector.broadcast %1 : vector<1x13xf32> to vector<13x13xf32>
    %12 = arith.addf %10, %11 : vector<13x13xf32>
    %cst_12 = arith.constant dense<0xFF800000> : vector<13xf32>
    %13 = vector.multi_reduction <maximumf>, %12, %cst_12 [1] : vector<13x13xf32> to vector<13xf32>
    %14 = vector.shape_cast %13 : vector<13xf32> to vector<13x1xf32>
    %15 = vector.broadcast %14 : vector<13x1xf32> to vector<13x13xf32>
    %16 = arith.subf %12, %15 : vector<13x13xf32>
    %17 = math.exp %16 : vector<13x13xf32>
    %cst_13 = arith.constant dense<0.000000e+00> : vector<13xf32>
    %18 = vector.multi_reduction <add>, %17, %cst_13 [1] : vector<13x13xf32> to vector<13xf32>
    %19 = vector.shape_cast %18 : vector<13xf32> to vector<13x1xf32>
    %20 = vector.broadcast %19 : vector<13x1xf32> to vector<13x13xf32>
    %21 = arith.divf %17, %20 : vector<13x13xf32>
    %22 = arith.truncf %21 : vector<13x13xf32> to vector<13x13xbf16>
    %cst_14 = arith.constant dense<0.000000e+00> : vector<13x64xf32>
    %23 = tpu.matmul %22, %7, %cst_14 {dimension_numbers = #tpu.dot_dimension_numbers<[1], [0], [0], [1], [0, 0, 1, 1], [], []>} : vector<13x13xbf16>, vector<13x64xbf16>, vector<13x64xf32> -> vector<13x64xf32>
    %c0_15 = arith.constant 0 : index
    %c0_16 = arith.constant 0 : index
    %c64 = arith.constant 64 : index
    %24 = vector.load %arg3[%c0_15, %c0_16, %c64] : memref<1x13x128xbf16, #tpu.memory_space<vmem>>, vector<1x13x64xbf16>
    %25 = vector.shape_cast %24 : vector<1x13x64xbf16> to vector<13x64xbf16>
    %c0_17 = arith.constant 0 : index
    %c0_18 = arith.constant 0 : index
    %c64_19 = arith.constant 64 : index
    %26 = vector.load %arg4[%c0_17, %c0_18, %c64_19] : memref<1x13x128xbf16, #tpu.memory_space<vmem>>, vector<1x13x64xbf16>
    %27 = vector.shape_cast %26 : vector<1x13x64xbf16> to vector<13x64xbf16>
    %c0_20 = arith.constant 0 : index
    %c0_21 = arith.constant 0 : index
    %c64_22 = arith.constant 64 : index
    %28 = vector.load %arg5[%c0_20, %c0_21, %c64_22] : memref<1x13x128xbf16, #tpu.memory_space<vmem>>, vector<1x13x64xbf16>
    %29 = vector.shape_cast %28 : vector<1x13x64xbf16> to vector<13x64xbf16>
    %cst_23 = arith.constant dense<0.000000e+00> : vector<13x13xf32>
    %30 = tpu.matmul %25, %27, %cst_23 {dimension_numbers = #tpu.dot_dimension_numbers<[1], [1], [0], [0], [0, 0, 1, 0], [], []>} : vector<13x64xbf16>, vector<13x64xbf16>, vector<13x13xf32> -> vector<13x13xf32>
    %cst_24 = arith.constant 1.250000e-01 : f32
    %31 = vector.broadcast %cst_24 : f32 to vector<13x13xf32>
    %32 = arith.mulf %30, %31 : vector<13x13xf32>
    %33 = vector.broadcast %1 : vector<1x13xf32> to vector<13x13xf32>
    %34 = arith.addf %32, %33 : vector<13x13xf32>
    %cst_25 = arith.constant dense<0xFF800000> : vector<13xf32>
    %35 = vector.multi_reduction <maximumf>, %34, %cst_25 [1] : vector<13x13xf32> to vector<13xf32>
    %36 = vector.shape_cast %35 : vector<13xf32> to vector<13x1xf32>
    %37 = vector.broadcast %36 : vector<13x1xf32> to vector<13x13xf32>
    %38 = arith.subf %34, %37 : vector<13x13xf32>
    %39 = math.exp %38 : vector<13x13xf32>
    %cst_26 = arith.constant dense<0.000000e+00> : vector<13xf32>
    %40 = vector.multi_reduction <add>, %39, %cst_26 [1] : vector<13x13xf32> to vector<13xf32>
    %41 = vector.shape_cast %40 : vector<13xf32> to vector<13x1xf32>
    %42 = vector.broadcast %41 : vector<13x1xf32> to vector<13x13xf32>
    %43 = arith.divf %39, %42 : vector<13x13xf32>
    %44 = arith.truncf %43 : vector<13x13xf32> to vector<13x13xbf16>
    %cst_27 = arith.constant dense<0.000000e+00> : vector<13x64xf32>
    %45 = tpu.matmul %44, %29, %cst_27 {dimension_numbers = #tpu.dot_dimension_numbers<[1], [0], [0], [1], [0, 0, 1, 1], [], []>} : vector<13x13xbf16>, vector<13x64xbf16>, vector<13x64xf32> -> vector<13x64xf32>
    %46 = tpu.concatenate %23, %45 in 1 : vector<13x64xf32>, vector<13x64xf32> -> vector<13x128xf32>
    %47 = arith.truncf %46 : vector<13x128xf32> to vector<13x128xbf16>
    %c0_28 = arith.constant 0 : index
    %c0_29 = arith.constant 0 : index
    %c0_30 = arith.constant 0 : index
    %48 = vector.load %arg7[%c0_28, %c0_29, %c0_30] : memref<1x13x128xbf16, #tpu.memory_space<vmem>>, vector<1x13x128xbf16>
    %49 = vector.shape_cast %48 : vector<1x13x128xbf16> to vector<13x128xbf16>
    %50 = vector.shape_cast %47 : vector<13x128xbf16> to vector<1x13x128xbf16>
    tpu.vector_store %arg7[%c0_28, %c0_29, %c0_30], %50 {strides = array<i32>} : memref<1x13x128xbf16, #tpu.memory_space<vmem>>, vector<1x13x128xbf16>,
    return
  }
  func.func @transform_0(%arg0: i32, %arg1: i32, %arg2: i32) -> (i32, i32, i32) {
    %c0_i32 = arith.constant 0 : i32
    return %arg0, %arg2, %arg1 : i32, i32, i32
  }
  func.func @transform_1(%arg0: i32, %arg1: i32, %arg2: i32) -> (i32, i32, i32) {
    %c2_i32 = arith.constant 2 : i32
    %0 = arith.addi %c2_i32, %arg1 : i32
    %c0_i32 = arith.constant 0 : i32
    %c0_i32_0 = arith.constant 0 : i32
    return %arg0, %c0_i32, %0 : i32, i32, i32
  }
  func.func @transform_2(%arg0: i32, %arg1: i32, %arg2: i32) -> (i32, i32, i32) {
    %c4_i32 = arith.constant 4 : i32
    %0 = arith.addi %c4_i32, %arg1 : i32
    %c0_i32 = arith.constant 0 : i32
    %c0_i32_0 = arith.constant 0 : i32
    return %arg0, %c0_i32, %0 : i32, i32, i32
  }
  func.func @transform_3(%arg0: i32, %arg1: i32, %arg2: i32) -> (i32, i32, i32) {
    %c0_i32 = arith.constant 0 : i32
    %c0_i32_0 = arith.constant 0 : i32
    %c0_i32_1 = arith.constant 0 : i32
    return %arg0, %c0_i32, %c0_i32_0 : i32, i32, i32
  }
  func.func @transform_4(%arg0: i32, %arg1: i32, %arg2: i32) -> (i32, i32, i32) {
    %c0_i32 = arith.constant 0 : i32
    return %arg0, %arg2, %arg1 : i32, i32, i32
  }
}

module attributes {stable_mosaic.version = 11 : i64} {
  func.func @_dense_ln_kernel(%arg0: i32, %arg1: i32, %arg2: memref<26x256xbf16, #tpu.memory_space<vmem>>, %arg3: memref<256x256xbf16, #tpu.memory_space<vmem>>, %arg4: memref<1x256xf32, #tpu.memory_space<vmem>>, %arg5: memref<26x256xbf16, #tpu.memory_space<vmem>>, %arg6: memref<1x256xf32, #tpu.memory_space<vmem>>, %arg7: memref<1x256xf32, #tpu.memory_space<vmem>>, %arg8: memref<26x256xbf16, #tpu.memory_space<vmem>>, %arg9: memref<26x256xf32, #tpu.memory_space<vmem>>) attributes {dimension_semantics = [#tpu.dimension_semantics<parallel>, #tpu.dimension_semantics<arbitrary>], iteration_bounds = array<i64: 1, 1>, scalar_prefetch = 0 : i64, scratch_operands = 1 : i64, tpu.core_type = #tpu.core_type<tc>, window_params = [{transform_indices = @transform_0, window_bounds = array<i64: 26, 256>}, {transform_indices = @transform_1, window_bounds = array<i64: 256, 256>}, {pipeline_mode = #tpu.pipeline_mode<synchronous>, transform_indices = @transform_2, window_bounds = array<i64: 1, 256>}, {transform_indices = @transform_3, window_bounds = array<i64: 26, 256>}, {pipeline_mode = #tpu.pipeline_mode<synchronous>, transform_indices = @transform_4, window_bounds = array<i64: 1, 256>}, {pipeline_mode = #tpu.pipeline_mode<synchronous>, transform_indices = @transform_5, window_bounds = array<i64: 1, 256>}, {transform_indices = @transform_6, window_bounds = array<i64: 26, 256>}]} {
    %c0_i32 = arith.constant 0 : i32
    %0 = arith.cmpi eq, %arg1, %c0_i32 : i32
    %1 = arith.extui %0 : i1 to i32
    %c0_i32_0 = arith.constant 0 : i32
    %2 = arith.cmpi ne, %1, %c0_i32_0 : i32
    scf.if %2 {
      %cst_10 = arith.constant 0.000000e+00 : f32
      %12 = vector.broadcast %cst_10 : f32 to vector<26x256xf32>
      %c0_11 = arith.constant 0 : index
      %c0_12 = arith.constant 0 : index
      %13 = vector.load %arg9[%c0_11, %c0_12] : memref<26x256xf32, #tpu.memory_space<vmem>>, vector<26x256xf32>
      tpu.vector_store %arg9[%c0_11, %c0_12], %12 {strides = array<i32>} : memref<26x256xf32, #tpu.memory_space<vmem>>, vector<26x256xf32>,
    } else {
    }
    %c0 = arith.constant 0 : index
    %c0_1 = arith.constant 0 : index
    %3 = vector.load %arg9[%c0, %c0_1] : memref<26x256xf32, #tpu.memory_space<vmem>>, vector<26x256xf32>
    %c0_2 = arith.constant 0 : index
    %c0_3 = arith.constant 0 : index
    %4 = vector.load %arg2[%c0_2, %c0_3] : memref<26x256xbf16, #tpu.memory_space<vmem>>, vector<26x256xbf16>
    %c0_4 = arith.constant 0 : index
    %c0_5 = arith.constant 0 : index
    %5 = vector.load %arg3[%c0_4, %c0_5] : memref<256x256xbf16, #tpu.memory_space<vmem>>, vector<256x256xbf16>
    %cst = arith.constant dense<0.000000e+00> : vector<26x256xf32>
    %6 = tpu.matmul %4, %5, %cst {dimension_numbers = #tpu.dot_dimension_numbers<[1], [0], [0], [1], [0, 0, 1, 1], [], []>} : vector<26x256xbf16>, vector<256x256xbf16>, vector<26x256xf32> -> vector<26x256xf32>
    %7 = arith.addf %3, %6 : vector<26x256xf32>
    %c0_6 = arith.constant 0 : index
    %c0_7 = arith.constant 0 : index
    %8 = vector.load %arg9[%c0_6, %c0_7] : memref<26x256xf32, #tpu.memory_space<vmem>>, vector<26x256xf32>
    tpu.vector_store %arg9[%c0_6, %c0_7], %7 {strides = array<i32>} : memref<26x256xf32, #tpu.memory_space<vmem>>, vector<26x256xf32>,
    %c0_i32_8 = arith.constant 0 : i32
    %9 = arith.cmpi eq, %arg1, %c0_i32_8 : i32
    %10 = arith.extui %9 : i1 to i32
    %c0_i32_9 = arith.constant 0 : i32
    %11 = arith.cmpi ne, %10, %c0_i32_9 : i32
    scf.if %11 {
      %c0_10 = arith.constant 0 : index
      %c0_11 = arith.constant 0 : index
      %12 = vector.load %arg9[%c0_10, %c0_11] : memref<26x256xf32, #tpu.memory_space<vmem>>, vector<26x256xf32>
      %c0_12 = arith.constant 0 : index
      %c0_13 = arith.constant 0 : index
      %13 = vector.load %arg4[%c0_12, %c0_13] : memref<1x256xf32, #tpu.memory_space<vmem>>, vector<1x256xf32>
      %14 = vector.broadcast %13 : vector<1x256xf32> to vector<26x256xf32>
      %15 = arith.addf %12, %14 : vector<26x256xf32>
      %c0_14 = arith.constant 0 : index
      %c0_15 = arith.constant 0 : index
      %16 = vector.load %arg5[%c0_14, %c0_15] : memref<26x256xbf16, #tpu.memory_space<vmem>>, vector<26x256xbf16>
      %17 = arith.extf %16 : vector<26x256xbf16> to vector<26x256xf32>
      %18 = arith.addf %15, %17 : vector<26x256xf32>
      %cst_16 = arith.constant dense<0.000000e+00> : vector<26xf32>
      %19 = vector.multi_reduction <add>, %18, %cst_16 [1] : vector<26x256xf32> to vector<26xf32>
      %20 = vector.shape_cast %19 : vector<26xf32> to vector<26x1xf32>
      %cst_17 = arith.constant 2.560000e+02 : f32
      %21 = vector.broadcast %cst_17 : f32 to vector<26x1xf32>
      %22 = arith.divf %20, %21 : vector<26x1xf32>
      %23 = vector.broadcast %22 : vector<26x1xf32> to vector<26x256xf32>
      %24 = arith.subf %18, %23 : vector<26x256xf32>
      %25 = arith.mulf %24, %24 : vector<26x256xf32>
      %cst_18 = arith.constant dense<0.000000e+00> : vector<26xf32>
      %26 = vector.multi_reduction <add>, %25, %cst_18 [1] : vector<26x256xf32> to vector<26xf32>
      %27 = vector.shape_cast %26 : vector<26xf32> to vector<26x1xf32>
      %cst_19 = arith.constant 2.560000e+02 : f32
      %28 = vector.broadcast %cst_19 : f32 to vector<26x1xf32>
      %29 = arith.divf %27, %28 : vector<26x1xf32>
      %cst_20 = arith.constant 9.99999974E-6 : f32
      %30 = vector.broadcast %cst_20 : f32 to vector<26x1xf32>
      %31 = arith.addf %29, %30 : vector<26x1xf32>
      %32 = math.rsqrt %31 : vector<26x1xf32>
      %33 = vector.broadcast %22 : vector<26x1xf32> to vector<26x256xf32>
      %34 = arith.subf %18, %33 : vector<26x256xf32>
      %35 = vector.broadcast %32 : vector<26x1xf32> to vector<26x256xf32>
      %36 = arith.mulf %34, %35 : vector<26x256xf32>
      %c0_21 = arith.constant 0 : index
      %c0_22 = arith.constant 0 : index
      %37 = vector.load %arg6[%c0_21, %c0_22] : memref<1x256xf32, #tpu.memory_space<vmem>>, vector<1x256xf32>
      %38 = vector.broadcast %37 : vector<1x256xf32> to vector<26x256xf32>
      %39 = arith.mulf %36, %38 : vector<26x256xf32>
      %c0_23 = arith.constant 0 : index
      %c0_24 = arith.constant 0 : index
      %40 = vector.load %arg7[%c0_23, %c0_24] : memref<1x256xf32, #tpu.memory_space<vmem>>, vector<1x256xf32>
      %41 = vector.broadcast %40 : vector<1x256xf32> to vector<26x256xf32>
      %42 = arith.addf %39, %41 : vector<26x256xf32>
      %43 = arith.truncf %42 : vector<26x256xf32> to vector<26x256xbf16>
      %c0_25 = arith.constant 0 : index
      %c0_26 = arith.constant 0 : index
      %44 = vector.load %arg8[%c0_25, %c0_26] : memref<26x256xbf16, #tpu.memory_space<vmem>>, vector<26x256xbf16>
      tpu.vector_store %arg8[%c0_25, %c0_26], %43 {strides = array<i32>} : memref<26x256xbf16, #tpu.memory_space<vmem>>, vector<26x256xbf16>,
    } else {
    }
    return
  }
  func.func @transform_0(%arg0: i32, %arg1: i32) -> (i32, i32) {
    %c0_i32 = arith.constant 0 : i32
    return %arg0, %arg1 : i32, i32
  }
  func.func @transform_1(%arg0: i32, %arg1: i32) -> (i32, i32) {
    %c0_i32 = arith.constant 0 : i32
    %c0_i32_0 = arith.constant 0 : i32
    return %arg1, %c0_i32 : i32, i32
  }
  func.func @transform_2(%arg0: i32, %arg1: i32) -> (i32, i32) {
    %c0_i32 = arith.constant 0 : i32
    %c0_i32_0 = arith.constant 0 : i32
    %c0_i32_1 = arith.constant 0 : i32
    return %c0_i32, %c0_i32_0 : i32, i32
  }
  func.func @transform_3(%arg0: i32, %arg1: i32) -> (i32, i32) {
    %c0_i32 = arith.constant 0 : i32
    %c0_i32_0 = arith.constant 0 : i32
    return %arg0, %c0_i32 : i32, i32
  }
  func.func @transform_4(%arg0: i32, %arg1: i32) -> (i32, i32) {
    %c0_i32 = arith.constant 0 : i32
    %c0_i32_0 = arith.constant 0 : i32
    %c0_i32_1 = arith.constant 0 : i32
    return %c0_i32, %c0_i32_0 : i32, i32
  }
  func.func @transform_5(%arg0: i32, %arg1: i32) -> (i32, i32) {
    %c0_i32 = arith.constant 0 : i32
    %c0_i32_0 = arith.constant 0 : i32
    %c0_i32_1 = arith.constant 0 : i32
    return %c0_i32, %c0_i32_0 : i32, i32
  }
  func.func @transform_6(%arg0: i32, %arg1: i32) -> (i32, i32) {
    %c0_i32 = arith.constant 0 : i32
    %c0_i32_0 = arith.constant 0 : i32
    return %arg0, %c0_i32 : i32, i32
  }
}

module attributes {stable_mosaic.version = 11 : i64} {
  func.func @_dense_ln_kernel(%arg0: i32, %arg1: i32, %arg2: memref<26x512xbf16, #tpu.memory_space<vmem>>, %arg3: memref<512x256xbf16, #tpu.memory_space<vmem>>, %arg4: memref<1x256xf32, #tpu.memory_space<vmem>>, %arg5: memref<26x256xbf16, #tpu.memory_space<vmem>>, %arg6: memref<1x256xf32, #tpu.memory_space<vmem>>, %arg7: memref<1x256xf32, #tpu.memory_space<vmem>>, %arg8: memref<26x256xbf16, #tpu.memory_space<vmem>>, %arg9: memref<26x256xf32, #tpu.memory_space<vmem>>) attributes {dimension_semantics = [#tpu.dimension_semantics<parallel>, #tpu.dimension_semantics<arbitrary>], iteration_bounds = array<i64: 1, 1>, scalar_prefetch = 0 : i64, scratch_operands = 1 : i64, tpu.core_type = #tpu.core_type<tc>, window_params = [{transform_indices = @transform_0, window_bounds = array<i64: 26, 512>}, {transform_indices = @transform_1, window_bounds = array<i64: 512, 256>}, {pipeline_mode = #tpu.pipeline_mode<synchronous>, transform_indices = @transform_2, window_bounds = array<i64: 1, 256>}, {transform_indices = @transform_3, window_bounds = array<i64: 26, 256>}, {pipeline_mode = #tpu.pipeline_mode<synchronous>, transform_indices = @transform_4, window_bounds = array<i64: 1, 256>}, {pipeline_mode = #tpu.pipeline_mode<synchronous>, transform_indices = @transform_5, window_bounds = array<i64: 1, 256>}, {transform_indices = @transform_6, window_bounds = array<i64: 26, 256>}]} {
    %c0_i32 = arith.constant 0 : i32
    %0 = arith.cmpi eq, %arg1, %c0_i32 : i32
    %1 = arith.extui %0 : i1 to i32
    %c0_i32_0 = arith.constant 0 : i32
    %2 = arith.cmpi ne, %1, %c0_i32_0 : i32
    scf.if %2 {
      %cst_10 = arith.constant 0.000000e+00 : f32
      %12 = vector.broadcast %cst_10 : f32 to vector<26x256xf32>
      %c0_11 = arith.constant 0 : index
      %c0_12 = arith.constant 0 : index
      %13 = vector.load %arg9[%c0_11, %c0_12] : memref<26x256xf32, #tpu.memory_space<vmem>>, vector<26x256xf32>
      tpu.vector_store %arg9[%c0_11, %c0_12], %12 {strides = array<i32>} : memref<26x256xf32, #tpu.memory_space<vmem>>, vector<26x256xf32>,
    } else {
    }
    %c0 = arith.constant 0 : index
    %c0_1 = arith.constant 0 : index
    %3 = vector.load %arg9[%c0, %c0_1] : memref<26x256xf32, #tpu.memory_space<vmem>>, vector<26x256xf32>
    %c0_2 = arith.constant 0 : index
    %c0_3 = arith.constant 0 : index
    %4 = vector.load %arg2[%c0_2, %c0_3] : memref<26x512xbf16, #tpu.memory_space<vmem>>, vector<26x512xbf16>
    %c0_4 = arith.constant 0 : index
    %c0_5 = arith.constant 0 : index
    %5 = vector.load %arg3[%c0_4, %c0_5] : memref<512x256xbf16, #tpu.memory_space<vmem>>, vector<512x256xbf16>
    %cst = arith.constant dense<0.000000e+00> : vector<26x256xf32>
    %6 = tpu.matmul %4, %5, %cst {dimension_numbers = #tpu.dot_dimension_numbers<[1], [0], [0], [1], [0, 0, 1, 1], [], []>} : vector<26x512xbf16>, vector<512x256xbf16>, vector<26x256xf32> -> vector<26x256xf32>
    %7 = arith.addf %3, %6 : vector<26x256xf32>
    %c0_6 = arith.constant 0 : index
    %c0_7 = arith.constant 0 : index
    %8 = vector.load %arg9[%c0_6, %c0_7] : memref<26x256xf32, #tpu.memory_space<vmem>>, vector<26x256xf32>
    tpu.vector_store %arg9[%c0_6, %c0_7], %7 {strides = array<i32>} : memref<26x256xf32, #tpu.memory_space<vmem>>, vector<26x256xf32>,
    %c0_i32_8 = arith.constant 0 : i32
    %9 = arith.cmpi eq, %arg1, %c0_i32_8 : i32
    %10 = arith.extui %9 : i1 to i32
    %c0_i32_9 = arith.constant 0 : i32
    %11 = arith.cmpi ne, %10, %c0_i32_9 : i32
    scf.if %11 {
      %c0_10 = arith.constant 0 : index
      %c0_11 = arith.constant 0 : index
      %12 = vector.load %arg9[%c0_10, %c0_11] : memref<26x256xf32, #tpu.memory_space<vmem>>, vector<26x256xf32>
      %c0_12 = arith.constant 0 : index
      %c0_13 = arith.constant 0 : index
      %13 = vector.load %arg4[%c0_12, %c0_13] : memref<1x256xf32, #tpu.memory_space<vmem>>, vector<1x256xf32>
      %14 = vector.broadcast %13 : vector<1x256xf32> to vector<26x256xf32>
      %15 = arith.addf %12, %14 : vector<26x256xf32>
      %c0_14 = arith.constant 0 : index
      %c0_15 = arith.constant 0 : index
      %16 = vector.load %arg5[%c0_14, %c0_15] : memref<26x256xbf16, #tpu.memory_space<vmem>>, vector<26x256xbf16>
      %17 = arith.extf %16 : vector<26x256xbf16> to vector<26x256xf32>
      %18 = arith.addf %15, %17 : vector<26x256xf32>
      %cst_16 = arith.constant dense<0.000000e+00> : vector<26xf32>
      %19 = vector.multi_reduction <add>, %18, %cst_16 [1] : vector<26x256xf32> to vector<26xf32>
      %20 = vector.shape_cast %19 : vector<26xf32> to vector<26x1xf32>
      %cst_17 = arith.constant 2.560000e+02 : f32
      %21 = vector.broadcast %cst_17 : f32 to vector<26x1xf32>
      %22 = arith.divf %20, %21 : vector<26x1xf32>
      %23 = vector.broadcast %22 : vector<26x1xf32> to vector<26x256xf32>
      %24 = arith.subf %18, %23 : vector<26x256xf32>
      %25 = arith.mulf %24, %24 : vector<26x256xf32>
      %cst_18 = arith.constant dense<0.000000e+00> : vector<26xf32>
      %26 = vector.multi_reduction <add>, %25, %cst_18 [1] : vector<26x256xf32> to vector<26xf32>
      %27 = vector.shape_cast %26 : vector<26xf32> to vector<26x1xf32>
      %cst_19 = arith.constant 2.560000e+02 : f32
      %28 = vector.broadcast %cst_19 : f32 to vector<26x1xf32>
      %29 = arith.divf %27, %28 : vector<26x1xf32>
      %cst_20 = arith.constant 9.99999974E-6 : f32
      %30 = vector.broadcast %cst_20 : f32 to vector<26x1xf32>
      %31 = arith.addf %29, %30 : vector<26x1xf32>
      %32 = math.rsqrt %31 : vector<26x1xf32>
      %33 = vector.broadcast %22 : vector<26x1xf32> to vector<26x256xf32>
      %34 = arith.subf %18, %33 : vector<26x256xf32>
      %35 = vector.broadcast %32 : vector<26x1xf32> to vector<26x256xf32>
      %36 = arith.mulf %34, %35 : vector<26x256xf32>
      %c0_21 = arith.constant 0 : index
      %c0_22 = arith.constant 0 : index
      %37 = vector.load %arg6[%c0_21, %c0_22] : memref<1x256xf32, #tpu.memory_space<vmem>>, vector<1x256xf32>
      %38 = vector.broadcast %37 : vector<1x256xf32> to vector<26x256xf32>
      %39 = arith.mulf %36, %38 : vector<26x256xf32>
      %c0_23 = arith.constant 0 : index
      %c0_24 = arith.constant 0 : index
      %40 = vector.load %arg7[%c0_23, %c0_24] : memref<1x256xf32, #tpu.memory_space<vmem>>, vector<1x256xf32>
      %41 = vector.broadcast %40 : vector<1x256xf32> to vector<26x256xf32>
      %42 = arith.addf %39, %41 : vector<26x256xf32>
      %43 = arith.truncf %42 : vector<26x256xf32> to vector<26x256xbf16>
      %c0_25 = arith.constant 0 : index
      %c0_26 = arith.constant 0 : index
      %44 = vector.load %arg8[%c0_25, %c0_26] : memref<26x256xbf16, #tpu.memory_space<vmem>>, vector<26x256xbf16>
      tpu.vector_store %arg8[%c0_25, %c0_26], %43 {strides = array<i32>} : memref<26x256xbf16, #tpu.memory_space<vmem>>, vector<26x256xbf16>,
    } else {
    }
    return
  }
  func.func @transform_0(%arg0: i32, %arg1: i32) -> (i32, i32) {
    %c0_i32 = arith.constant 0 : i32
    return %arg0, %arg1 : i32, i32
  }
  func.func @transform_1(%arg0: i32, %arg1: i32) -> (i32, i32) {
    %c0_i32 = arith.constant 0 : i32
    %c0_i32_0 = arith.constant 0 : i32
    return %arg1, %c0_i32 : i32, i32
  }
  func.func @transform_2(%arg0: i32, %arg1: i32) -> (i32, i32) {
    %c0_i32 = arith.constant 0 : i32
    %c0_i32_0 = arith.constant 0 : i32
    %c0_i32_1 = arith.constant 0 : i32
    return %c0_i32, %c0_i32_0 : i32, i32
  }
  func.func @transform_3(%arg0: i32, %arg1: i32) -> (i32, i32) {
    %c0_i32 = arith.constant 0 : i32
    %c0_i32_0 = arith.constant 0 : i32
    return %arg0, %c0_i32 : i32, i32
  }
  func.func @transform_4(%arg0: i32, %arg1: i32) -> (i32, i32) {
    %c0_i32 = arith.constant 0 : i32
    %c0_i32_0 = arith.constant 0 : i32
    %c0_i32_1 = arith.constant 0 : i32
    return %c0_i32, %c0_i32_0 : i32, i32
  }
  func.func @transform_5(%arg0: i32, %arg1: i32) -> (i32, i32) {
    %c0_i32 = arith.constant 0 : i32
    %c0_i32_0 = arith.constant 0 : i32
    %c0_i32_1 = arith.constant 0 : i32
    return %c0_i32, %c0_i32_0 : i32, i32
  }
  func.func @transform_6(%arg0: i32, %arg1: i32) -> (i32, i32) {
    %c0_i32 = arith.constant 0 : i32
    %c0_i32_0 = arith.constant 0 : i32
    return %arg0, %c0_i32 : i32, i32
  }
}

module attributes {stable_mosaic.version = 11 : i64} {
  func.func @_dense_kernel(%arg0: i32, %arg1: i32, %arg2: i32, %arg3: memref<26x256xbf16, #tpu.memory_space<vmem>>, %arg4: memref<256x512xbf16, #tpu.memory_space<vmem>>, %arg5: memref<1x512xf32, #tpu.memory_space<vmem>>, %arg6: memref<26x512xbf16, #tpu.memory_space<vmem>>, %arg7: memref<26x512xf32, #tpu.memory_space<vmem>>) attributes {dimension_semantics = [#tpu.dimension_semantics<parallel>, #tpu.dimension_semantics<parallel>, #tpu.dimension_semantics<arbitrary>], iteration_bounds = array<i64: 1, 1, 1>, scalar_prefetch = 0 : i64, scratch_operands = 1 : i64, tpu.core_type = #tpu.core_type<tc>, window_params = [{transform_indices = @transform_0, window_bounds = array<i64: 26, 256>}, {transform_indices = @transform_1, window_bounds = array<i64: 256, 512>}, {transform_indices = @transform_2, window_bounds = array<i64: 1, 512>}, {transform_indices = @transform_3, window_bounds = array<i64: 26, 512>}]} {
    %c0_i32 = arith.constant 0 : i32
    %0 = arith.cmpi eq, %arg2, %c0_i32 : i32
    %1 = arith.extui %0 : i1 to i32
    %c0_i32_0 = arith.constant 0 : i32
    %2 = arith.cmpi ne, %1, %c0_i32_0 : i32
    scf.if %2 {
      %cst_10 = arith.constant 0.000000e+00 : f32
      %12 = vector.broadcast %cst_10 : f32 to vector<26x512xf32>
      %c0_11 = arith.constant 0 : index
      %c0_12 = arith.constant 0 : index
      %13 = vector.load %arg7[%c0_11, %c0_12] : memref<26x512xf32, #tpu.memory_space<vmem>>, vector<26x512xf32>
      tpu.vector_store %arg7[%c0_11, %c0_12], %12 {strides = array<i32>} : memref<26x512xf32, #tpu.memory_space<vmem>>, vector<26x512xf32>,
    } else {
    }
    %c0 = arith.constant 0 : index
    %c0_1 = arith.constant 0 : index
    %3 = vector.load %arg7[%c0, %c0_1] : memref<26x512xf32, #tpu.memory_space<vmem>>, vector<26x512xf32>
    %c0_2 = arith.constant 0 : index
    %c0_3 = arith.constant 0 : index
    %4 = vector.load %arg3[%c0_2, %c0_3] : memref<26x256xbf16, #tpu.memory_space<vmem>>, vector<26x256xbf16>
    %c0_4 = arith.constant 0 : index
    %c0_5 = arith.constant 0 : index
    %5 = vector.load %arg4[%c0_4, %c0_5] : memref<256x512xbf16, #tpu.memory_space<vmem>>, vector<256x512xbf16>
    %cst = arith.constant dense<0.000000e+00> : vector<26x512xf32>
    %6 = tpu.matmul %4, %5, %cst {dimension_numbers = #tpu.dot_dimension_numbers<[1], [0], [0], [1], [0, 0, 1, 1], [], []>} : vector<26x256xbf16>, vector<256x512xbf16>, vector<26x512xf32> -> vector<26x512xf32>
    %7 = arith.addf %3, %6 : vector<26x512xf32>
    %c0_6 = arith.constant 0 : index
    %c0_7 = arith.constant 0 : index
    %8 = vector.load %arg7[%c0_6, %c0_7] : memref<26x512xf32, #tpu.memory_space<vmem>>, vector<26x512xf32>
    tpu.vector_store %arg7[%c0_6, %c0_7], %7 {strides = array<i32>} : memref<26x512xf32, #tpu.memory_space<vmem>>, vector<26x512xf32>,
    %c0_i32_8 = arith.constant 0 : i32
    %9 = arith.cmpi eq, %arg2, %c0_i32_8 : i32
    %10 = arith.extui %9 : i1 to i32
    %c0_i32_9 = arith.constant 0 : i32
    %11 = arith.cmpi ne, %10, %c0_i32_9 : i32
    scf.if %11 {
      %c0_10 = arith.constant 0 : index
      %c0_11 = arith.constant 0 : index
      %12 = vector.load %arg7[%c0_10, %c0_11] : memref<26x512xf32, #tpu.memory_space<vmem>>, vector<26x512xf32>
      %c0_12 = arith.constant 0 : index
      %c0_13 = arith.constant 0 : index
      %13 = vector.load %arg5[%c0_12, %c0_13] : memref<1x512xf32, #tpu.memory_space<vmem>>, vector<1x512xf32>
      %14 = vector.broadcast %13 : vector<1x512xf32> to vector<26x512xf32>
      %15 = arith.addf %12, %14 : vector<26x512xf32>
      %cst_14 = arith.constant 5.000000e-01 : f32
      %16 = vector.broadcast %cst_14 : f32 to vector<26x512xf32>
      %17 = arith.mulf %16, %15 : vector<26x512xf32>
      %cst_15 = arith.constant 4.471500e-02 : f32
      %18 = vector.broadcast %cst_15 : f32 to vector<26x512xf32>
      %19 = arith.mulf %18, %15 : vector<26x512xf32>
      %20 = arith.mulf %19, %15 : vector<26x512xf32>
      %21 = arith.mulf %20, %15 : vector<26x512xf32>
      %22 = arith.addf %15, %21 : vector<26x512xf32>
      %cst_16 = arith.constant 0.797884583 : f32
      %23 = vector.broadcast %cst_16 : f32 to vector<26x512xf32>
      %24 = arith.mulf %23, %22 : vector<26x512xf32>
      %25 = math.tanh %24 : vector<26x512xf32>
      %cst_17 = arith.constant 1.000000e+00 : f32
      %26 = vector.broadcast %cst_17 : f32 to vector<26x512xf32>
      %27 = arith.addf %26, %25 : vector<26x512xf32>
      %28 = arith.mulf %17, %27 : vector<26x512xf32>
      %29 = arith.truncf %28 : vector<26x512xf32> to vector<26x512xbf16>
      %c0_18 = arith.constant 0 : index
      %c0_19 = arith.constant 0 : index
      %30 = vector.load %arg6[%c0_18, %c0_19] : memref<26x512xbf16, #tpu.memory_space<vmem>>, vector<26x512xbf16>
      tpu.vector_store %arg6[%c0_18, %c0_19], %29 {strides = array<i32>} : memref<26x512xbf16, #tpu.memory_space<vmem>>, vector<26x512xbf16>,
    } else {
    }
    return
  }
  func.func @transform_0(%arg0: i32, %arg1: i32, %arg2: i32) -> (i32, i32) {
    %c0_i32 = arith.constant 0 : i32
    return %arg0, %arg2 : i32, i32
  }
  func.func @transform_1(%arg0: i32, %arg1: i32, %arg2: i32) -> (i32, i32) {
    %c0_i32 = arith.constant 0 : i32
    return %arg2, %arg1 : i32, i32
  }
  func.func @transform_2(%arg0: i32, %arg1: i32, %arg2: i32) -> (i32, i32) {
    %c0_i32 = arith.constant 0 : i32
    %c0_i32_0 = arith.constant 0 : i32
    return %c0_i32, %arg1 : i32, i32
  }
  func.func @transform_3(%arg0: i32, %arg1: i32, %arg2: i32) -> (i32, i32) {
    %c0_i32 = arith.constant 0 : i32
    return %arg0, %arg1 : i32, i32
  }
}

module attributes {stable_mosaic.version = 11 : i64} {
  func.func @_mean_pool_kernel(%arg0: i32, %arg1: memref<1x13x256xbf16, #tpu.memory_space<vmem>>, %arg2: memref<1x13x13xbf16, #tpu.memory_space<vmem>>, %arg3: memref<1x13x1xf32, #tpu.memory_space<vmem>>, %arg4: memref<1x13x256xf32, #tpu.memory_space<vmem>>) attributes {dimension_semantics = [#tpu.dimension_semantics<parallel>], iteration_bounds = array<i64: 2>, scalar_prefetch = 0 : i64, scratch_operands = 0 : i64, tpu.core_type = #tpu.core_type<tc>, window_params = [{transform_indices = @transform_0, window_bounds = array<i64: 1, 13, 256>}, {transform_indices = @transform_1, window_bounds = array<i64: 1, 13, 13>}, {transform_indices = @transform_2, window_bounds = array<i64: 1, 13, 1>}, {transform_indices = @transform_3, window_bounds = array<i64: 1, 13, 256>}]} {
    %c0 = arith.constant 0 : index
    %c0_0 = arith.constant 0 : index
    %c0_1 = arith.constant 0 : index
    %0 = vector.load %arg2[%c0, %c0_0, %c0_1] : memref<1x13x13xbf16, #tpu.memory_space<vmem>>, vector<1x13x13xbf16>
    %1 = vector.shape_cast %0 : vector<1x13x13xbf16> to vector<13x13xbf16>
    %c0_2 = arith.constant 0 : index
    %c0_3 = arith.constant 0 : index
    %c0_4 = arith.constant 0 : index
    %2 = vector.load %arg1[%c0_2, %c0_3, %c0_4] : memref<1x13x256xbf16, #tpu.memory_space<vmem>>, vector<1x13x256xbf16>
    %3 = vector.shape_cast %2 : vector<1x13x256xbf16> to vector<13x256xbf16>
    %cst = arith.constant dense<0.000000e+00> : vector<13x256xf32>
    %4 = tpu.matmul %1, %3, %cst {dimension_numbers = #tpu.dot_dimension_numbers<[0], [0], [1], [1], [0, 1, 1, 1], [], []>} : vector<13x13xbf16>, vector<13x256xbf16>, vector<13x256xf32> -> vector<13x256xf32>
    %c0_5 = arith.constant 0 : index
    %c0_6 = arith.constant 0 : index
    %c0_7 = arith.constant 0 : index
    %5 = vector.load %arg3[%c0_5, %c0_6, %c0_7] : memref<1x13x1xf32, #tpu.memory_space<vmem>>, vector<1x13x1xf32>
    %6 = vector.shape_cast %5 : vector<1x13x1xf32> to vector<13x1xf32>
    %7 = vector.broadcast %6 : vector<13x1xf32> to vector<13x256xf32>
    %8 = arith.divf %4, %7 : vector<13x256xf32>
    %c0_8 = arith.constant 0 : index
    %c0_9 = arith.constant 0 : index
    %c0_10 = arith.constant 0 : index
    %9 = vector.load %arg4[%c0_8, %c0_9, %c0_10] : memref<1x13x256xf32, #tpu.memory_space<vmem>>, vector<1x13x256xf32>
    %10 = vector.shape_cast %9 : vector<1x13x256xf32> to vector<13x256xf32>
    %11 = vector.shape_cast %8 : vector<13x256xf32> to vector<1x13x256xf32>
    tpu.vector_store %arg4[%c0_8, %c0_9, %c0_10], %11 {strides = array<i32>} : memref<1x13x256xf32, #tpu.memory_space<vmem>>, vector<1x13x256xf32>,
    return
  }
  func.func @transform_0(%arg0: i32) -> (i32, i32, i32) {
    %c0_i32 = arith.constant 0 : i32
    %c0_i32_0 = arith.constant 0 : i32
    %c0_i32_1 = arith.constant 0 : i32
    return %arg0, %c0_i32, %c0_i32_0 : i32, i32, i32
  }
  func.func @transform_1(%arg0: i32) -> (i32, i32, i32) {
    %c0_i32 = arith.constant 0 : i32
    %c0_i32_0 = arith.constant 0 : i32
    %c0_i32_1 = arith.constant 0 : i32
    return %arg0, %c0_i32, %c0_i32_0 : i32, i32, i32
  }
  func.func @transform_2(%arg0: i32) -> (i32, i32, i32) {
    %c0_i32 = arith.constant 0 : i32
    %c0_i32_0 = arith.constant 0 : i32
    %c0_i32_1 = arith.constant 0 : i32
    return %arg0, %c0_i32, %c0_i32_0 : i32, i32, i32
  }
  func.func @transform_3(%arg0: i32) -> (i32, i32, i32) {
    %c0_i32 = arith.constant 0 : i32
    %c0_i32_0 = arith.constant 0 : i32
    %c0_i32_1 = arith.constant 0 : i32
    return %arg0, %c0_i32, %c0_i32_0 : i32, i32, i32
  }
}

module attributes {stable_mosaic.version = 11 : i64} {
  func.func @_dense_kernel(%arg0: i32, %arg1: i32, %arg2: i32, %arg3: memref<2x256xbf16, #tpu.memory_space<vmem>>, %arg4: memref<256x256xbf16, #tpu.memory_space<vmem>>, %arg5: memref<1x256xf32, #tpu.memory_space<vmem>>, %arg6: memref<2x256xf32, #tpu.memory_space<vmem>>, %arg7: memref<2x256xf32, #tpu.memory_space<vmem>>) attributes {dimension_semantics = [#tpu.dimension_semantics<parallel>, #tpu.dimension_semantics<parallel>, #tpu.dimension_semantics<arbitrary>], iteration_bounds = array<i64: 1, 1, 1>, scalar_prefetch = 0 : i64, scratch_operands = 1 : i64, tpu.core_type = #tpu.core_type<tc>, window_params = [{transform_indices = @transform_0, window_bounds = array<i64: 2, 256>}, {transform_indices = @transform_1, window_bounds = array<i64: 256, 256>}, {transform_indices = @transform_2, window_bounds = array<i64: 1, 256>}, {transform_indices = @transform_3, window_bounds = array<i64: 2, 256>}]} {
    %c0_i32 = arith.constant 0 : i32
    %0 = arith.cmpi eq, %arg2, %c0_i32 : i32
    %1 = arith.extui %0 : i1 to i32
    %c0_i32_0 = arith.constant 0 : i32
    %2 = arith.cmpi ne, %1, %c0_i32_0 : i32
    scf.if %2 {
      %cst_10 = arith.constant 0.000000e+00 : f32
      %12 = vector.broadcast %cst_10 : f32 to vector<2x256xf32>
      %c0_11 = arith.constant 0 : index
      %c0_12 = arith.constant 0 : index
      %13 = vector.load %arg7[%c0_11, %c0_12] : memref<2x256xf32, #tpu.memory_space<vmem>>, vector<2x256xf32>
      tpu.vector_store %arg7[%c0_11, %c0_12], %12 {strides = array<i32>} : memref<2x256xf32, #tpu.memory_space<vmem>>, vector<2x256xf32>,
    } else {
    }
    %c0 = arith.constant 0 : index
    %c0_1 = arith.constant 0 : index
    %3 = vector.load %arg7[%c0, %c0_1] : memref<2x256xf32, #tpu.memory_space<vmem>>, vector<2x256xf32>
    %c0_2 = arith.constant 0 : index
    %c0_3 = arith.constant 0 : index
    %4 = vector.load %arg3[%c0_2, %c0_3] : memref<2x256xbf16, #tpu.memory_space<vmem>>, vector<2x256xbf16>
    %c0_4 = arith.constant 0 : index
    %c0_5 = arith.constant 0 : index
    %5 = vector.load %arg4[%c0_4, %c0_5] : memref<256x256xbf16, #tpu.memory_space<vmem>>, vector<256x256xbf16>
    %cst = arith.constant dense<0.000000e+00> : vector<2x256xf32>
    %6 = tpu.matmul %4, %5, %cst {dimension_numbers = #tpu.dot_dimension_numbers<[1], [0], [0], [1], [0, 0, 1, 1], [], []>} : vector<2x256xbf16>, vector<256x256xbf16>, vector<2x256xf32> -> vector<2x256xf32>
    %7 = arith.addf %3, %6 : vector<2x256xf32>
    %c0_6 = arith.constant 0 : index
    %c0_7 = arith.constant 0 : index
    %8 = vector.load %arg7[%c0_6, %c0_7] : memref<2x256xf32, #tpu.memory_space<vmem>>, vector<2x256xf32>
    tpu.vector_store %arg7[%c0_6, %c0_7], %7 {strides = array<i32>} : memref<2x256xf32, #tpu.memory_space<vmem>>, vector<2x256xf32>,
    %c0_i32_8 = arith.constant 0 : i32
    %9 = arith.cmpi eq, %arg2, %c0_i32_8 : i32
    %10 = arith.extui %9 : i1 to i32
    %c0_i32_9 = arith.constant 0 : i32
    %11 = arith.cmpi ne, %10, %c0_i32_9 : i32
    scf.if %11 {
      %c0_10 = arith.constant 0 : index
      %c0_11 = arith.constant 0 : index
      %12 = vector.load %arg7[%c0_10, %c0_11] : memref<2x256xf32, #tpu.memory_space<vmem>>, vector<2x256xf32>
      %c0_12 = arith.constant 0 : index
      %c0_13 = arith.constant 0 : index
      %13 = vector.load %arg5[%c0_12, %c0_13] : memref<1x256xf32, #tpu.memory_space<vmem>>, vector<1x256xf32>
      %14 = vector.broadcast %13 : vector<1x256xf32> to vector<2x256xf32>
      %15 = arith.addf %12, %14 : vector<2x256xf32>
      %16 = math.tanh %15 : vector<2x256xf32>
      %c0_14 = arith.constant 0 : index
      %c0_15 = arith.constant 0 : index
      %17 = vector.load %arg6[%c0_14, %c0_15] : memref<2x256xf32, #tpu.memory_space<vmem>>, vector<2x256xf32>
      tpu.vector_store %arg6[%c0_14, %c0_15], %16 {strides = array<i32>} : memref<2x256xf32, #tpu.memory_space<vmem>>, vector<2x256xf32>,
    } else {
    }
    return
  }
  func.func @transform_0(%arg0: i32, %arg1: i32, %arg2: i32) -> (i32, i32) {
    %c0_i32 = arith.constant 0 : i32
    return %arg0, %arg2 : i32, i32
  }
  func.func @transform_1(%arg0: i32, %arg1: i32, %arg2: i32) -> (i32, i32) {
    %c0_i32 = arith.constant 0 : i32
    return %arg2, %arg1 : i32, i32
  }
  func.func @transform_2(%arg0: i32, %arg1: i32, %arg2: i32) -> (i32, i32) {
    %c0_i32 = arith.constant 0 : i32
    %c0_i32_0 = arith.constant 0 : i32
    return %c0_i32, %arg1 : i32, i32
  }
  func.func @transform_3(%arg0: i32, %arg1: i32, %arg2: i32) -> (i32, i32) {
    %c0_i32 = arith.constant 0 : i32
    return %arg0, %arg1 : i32, i32
  }
}

</mosaic_0001>

<bundles_post_ra>
// kernel: roberta_forward.13
= control target key start
LH: loop header
LB: loop body
LE: loop exit
PB: predicated region body
PF: predicated region fallthrough
CT: control target
= control target key end

     0   :  { %vm31_vm0 = vcmask 1041408   ;;  %v94_v48 = vlaneseq  ;;  %s266_s0 = inlined_call_operand.vmem [shape: f32[26,256], index: 0, kind: input, shape index: {}]   ;;  %s267_s1 = inlined_call_operand.vmem [shape: f32[1,256], index: 1, kind: input, shape index: {}]   ;;  %s268_s2 = inlined_call_operand.vmem [shape: f32[1,256], index: 2, kind: input, shape index: {}]   ;;  %s269_s3 = inlined_call_operand.vmem [shape: bf16[26,256], index: 3, kind: output, shape index: {}]  }
   0x1   :  { %v16_v0 = vld [vmem:[%s266_s0 + $0x10] sm:$0xff]  ;;  %v17_v1 = vld [vmem:[%s266_s0 + $0x18] sm:$0xff]  ;;  %v14_v6 = vld [vmem:[%s266_s0] sm:$0xff] }
   0x2   :  { %v20_v2 = vld [vmem:[%s266_s0 + $0x30] sm:$0x3]  ;;  %v25_v3 = vadd.f32 %v17_v1, %v16_v0  ;;  %v21_v4 = vld [vmem:[%s266_s0 + $0x38] sm:$0x3]  ;;  %v15_v8 = vld [vmem:[%s266_s0 + $0x8] sm:$0xff]  ;;  %v95_v53 = vshrl.u32 %v94_v48, 7 }
   0x3   :  { %v32_v5 = vsel %vm31_vm0, %v20_v2, 0.0  ;;  %v33_v7 = vsel %vm31_vm0, %v21_v4, 0.0  ;;  %v18_v9 = vld [vmem:[%s266_s0 + $0x20] sm:$0xff]  ;;  %v19_v10 = vld [vmem:[%s266_s0 + $0x28] sm:$0xff]  ;;  %v22_v13 = vadd.f32 %v15_v8, %v14_v6 }
   0x4   :  { %26 = vadd.xlane.f32.xlu1 %v25_v3  ;;  %v34_v11 = vadd.f32 %v33_v7, %v32_v5  ;;  %v28_v12 = vadd.f32 %v19_v10, %v18_v9  ;;  %v96_v57 = vsub.s32 0, %v95_v53  ;;  %v100_v58 = vsub.s32 1, %v95_v53  ;;  %v92_v60 = vld [vmem:[%s267_s1] sm:$0x3] }
   0x5   :  { %v112_v61 = vld [vmem:[%s268_s2] sm:$0x3] }
   0x6   :  { %35 = vadd.xlane.f32.xlu0 %v34_v11  ;;  %v97_v62 = vrot.slane %v92_v60, %v96_v57  ;;  %v101_v63 = vrot.slane %v92_v60, %v100_v58 }
   0x8   :  { %29 = vadd.xlane.f32.xlu1 %v28_v12 }
   0xa   :  { %23 = vadd.xlane.f32.xlu0 %v22_v13 }
  0x8d   :  { %v27_v14 = vpop.xlane.xlu1 %26 }
  0x8e   :  { %v39_v15 = vmul.f32 0.00390625, %v27_v14 }
  0x8f   :  { %v36_v16 = vpop.xlane.xlu0 %35 }
  0x90   :  { %v44_v17 = vsub.f32 %v16_v0, %v39_v15  ;;  %v45_v18 = vsub.f32 %v17_v1, %v39_v15  ;;  %v41_v19 = vmul.f32 0.00390625, %v36_v16  ;;  %v117_v1 = vrot.slane %v112_v61, %v96_v57 }
  0x91   :  { %v30_v20 = vpop.xlane.xlu1 %29 }
  0x92   :  { %v226_v21 = vsub.f32 %v20_v2, %v41_v19  ;;  %v228_v22 = vsub.f32 %v21_v4, %v41_v19  ;;  %v52_v23 = vmul.f32 %v44_v17, %v44_v17  ;;  %v53_v24 = vmul.f32 %v45_v18, %v45_v18 }
  0x93   :  { %v24_v25 = vpop.xlane.xlu0 %23  ;;  %v40_v26 = vmul.f32 0.00390625, %v30_v20  ;;  %v121_v2 = vrot.slane %v112_v61, %v100_v58 }
  0x94   :  { %v38_v27 = vmul.f32 0.00390625, %v24_v25  ;;  %v61_v28 = vadd.f32 %v53_v24, %v52_v23  ;;  %v56_v29 = vmul.f32 %v226_v21, %v226_v21  ;;  %v57_v30 = vmul.f32 %v228_v22, %v228_v22 }
  0x95   :  { %v234_v31 = vsub.f32 %v18_v9, %v40_v26  ;;  %v236_v32 = vsub.f32 %v19_v10, %v40_v26 }
  0x96   :  { %v42_v33 = vsub.f32 %v14_v6, %v38_v27  ;;  %v43_v34 = vsub.f32 %v15_v8, %v38_v27  ;;  %62 = vadd.xlane.f32.xlu1 %v61_v28  ;;  %v67_v35 = vsel %vm31_vm0, %v56_v29, 0.0  ;;  %v68_v36 = vsel %vm31_vm0, %v57_v30, 0.0 }
  0x97   :  { %v69_v37 = vadd.f32 %v68_v36, %v67_v35  ;;  %v54_v40 = vmul.f32 %v234_v31, %v234_v31  ;;  %v55_v41 = vmul.f32 %v236_v32, %v236_v32 }
  0x98   :  { %v50_v38 = vmul.f32 %v42_v33, %v42_v33  ;;  %v51_v39 = vmul.f32 %v43_v34, %v43_v34 }
  0x99   :  { %v64_v43 = vadd.f32 %v55_v41, %v54_v40 }
  0x9a   :  { %70 = vadd.xlane.f32.xlu1 %v69_v37  ;;  %v58_v42 = vadd.f32 %v51_v39, %v50_v38 }
  0x9c   :  { %59 = vadd.xlane.f32.xlu0 %v58_v42 }
  0xa0   :  { %65 = vadd.xlane.f32.xlu0 %v64_v43 }
 0x11f   :  { %v63_v44 = vpop.xlane.xlu1 %62 }
 0x120   :  { %v73_v45 = vmul.f32 0.00390625, %v63_v44 }
 0x122   :  { %v77_v46 = vadd.f32 1e-05, %v73_v45 }
 0x123   :  { %v71_v47 = vpop.xlane.xlu1 %70 }
 0x124   :  { %172 = vrsqrt.f32 %v77_v46  ;;  %v75_v49 = vmul.f32 0.00390625, %v71_v47 }
 0x125   :  { %v60_v50 = vpop.xlane.xlu0 %59 }
 0x126   :  { %v79_v51 = vadd.f32 1e-05, %v75_v49  ;;  %v72_v52 = vmul.f32 0.00390625, %v60_v50 }
 0x128   :  { %174 = vrsqrt.f32 %v79_v51  ;;  %v76_v54 = vadd.f32 1e-05, %v72_v52 }
 0x129   :  { %v66_v55 = vpop.xlane.xlu0 %65 }
 0x12a   :  { %176 = vrsqrt.f32 %v76_v54  ;;  %v74_v56 = vmul.f32 0.00390625, %v66_v55 }
 0x12c   :  { %v78_v59 = vadd.f32 1e-05, %v74_v56 }
 0x12e   :  { %178 = vrsqrt.f32 %v78_v59 }
 0x131   :  { %v173_v0 = vpop.eup %172 }
 0x132   :  { %v86_v3 = vmul.f32 %v173_v0, %v44_v17  ;;  %v87_v4 = vmul.f32 %v173_v0, %v45_v18 }
 0x134   :  { %v106_v5 = vmul.f32 %v97_v62, %v86_v3  ;;  %v107_v6 = vmul.f32 %v101_v63, %v87_v4 }
 0x135   :  { %v175_v7 = vpop.eup %174 }
 0x136   :  { %v126_v8 = vadd.f32 %v117_v1, %v106_v5  ;;  %v127_v9 = vadd.f32 %v121_v2, %v107_v6  ;;  %v90_v10 = vmul.f32 %v175_v7, %v226_v21  ;;  %v91_v11 = vmul.f32 %v175_v7, %v228_v22 }
 0x137   :  { %v177_v12 = vpop.eup %176 }
 0x138   :  { %v169_v13 = vpack.c.bf16 %v127_v9, %v126_v8  ;;  %v110_v14 = vmul.f32 %v97_v62, %v90_v10  ;;  %v111_v15 = vmul.f32 %v101_v63, %v91_v11  ;;  %v84_v16 = vmul.f32 %v177_v12, %v42_v33 }
 0x139   :  { %v85_v19 = vmul.f32 %v177_v12, %v43_v34 }
 0x13a   :  { %157 = vst [vmem:[%s269_s3 + $0x8] sm:$0xff] %v169_v13  ;;  %v130_v17 = vadd.f32 %v117_v1, %v110_v14  ;;  %v131_v18 = vadd.f32 %v121_v2, %v111_v15  ;;  %v104_v20 = vmul.f32 %v97_v62, %v84_v16 }
 0x13b   :  { %v179_v23 = vpop.eup %178  ;;  %v105_v24 = vmul.f32 %v101_v63, %v85_v19 }
 0x13c   :  { %v171_v25 = vpack.c.bf16 %v131_v18, %v130_v17  ;;  %v124_v26 = vadd.f32 %v117_v1, %v104_v20  ;;  %v88_v21 = vmul.f32 %v179_v23, %v234_v31  ;;  %v89_v22 = vmul.f32 %v179_v23, %v236_v32 }
 0x13d   :  { %v125_v27 = vadd.f32 %v121_v2, %v105_v24 }
 0x13e   :  { %159 = vst [vmem:[%s269_s3 + $0x18] sm:$0x11] %v171_v25  ;;  %v108_v28 = vmul.f32 %v97_v62, %v88_v21  ;;  %v109_v29 = vmul.f32 %v101_v63, %v89_v22 }
 0x13f   :  { %v168_v30 = vpack.c.bf16 %v125_v27, %v124_v26 }
 0x140   :  { %v128_v33 = vadd.f32 %v117_v1, %v108_v28  ;;  %v129_v34 = vadd.f32 %v121_v2, %v109_v29 }
 0x141   :  { %156 = vst [vmem:[%s269_s3] sm:$0xff] %v168_v30 }
 0x142   :  { %v170_v35 = vpack.c.bf16 %v129_v34, %v128_v33 }
 0x144   :  { %158 = vst [vmem:[%s269_s3 + $0x10] sm:$0xff] %v170_v35 }

// kernel: roberta_forward.15
= control target key start
LH: loop header
LB: loop body
LE: loop exit
PB: predicated region body
PF: predicated region fallthrough
CT: control target
= control target key end

     0   :  { %s1474_s0 = inlined_call_operand.vmem [shape: bf16[2,13,768], index: 0, kind: input, shape index: {}, may-alias: {0,1,2}]   ;;  %s1475_s1 = inlined_call_operand.vmem [shape: bf16[2,13,768], index: 1, kind: input, shape index: {}, may-alias: {0,1,2}]   ;;  %s1476_s2 = inlined_call_operand.vmem [shape: bf16[2,13,768], index: 2, kind: input, shape index: {}, may-alias: {0,1,2}]   ;;  %s1477_s3 = inlined_call_operand.vmem [shape: f32[2,1,13], index: 3, kind: input, shape index: {}]   ;;  %s1478_s4 = inlined_call_operand.vmem [shape: bf16[2,13,256], index: 4, kind: output, shape index: {}]  }
   0x1   :  { %1481 = sst [smem:[#allocation10_spill]] %s1478_s4 }
   0x2   :  { %s1237_s15 = smov 0   ;;  %s1239_s16 = smov 0  }
   0x3   :  { %s1241_s17 = smov 0   ;;  %s1243_s18 = smov 0  }
   0x4   :  { %s1245_s19 = smov 0   ;;  %s1247_s20 = smov 0  }
   0x5   :  { %s1249_s21 = smov 0   ;;  %s1251_s22 = smov 0  }
   0x6   :  { %s1253_s23 = smov 0   ;;  %s1255_s24 = smov 0  }
   0x7   :  { %s1257_s25 = smov 0  }
   0x8 LB: > { %1482 = sst [smem:[#allocation6_spill]] %s1190_s21  ;;  %s29_s27 = sadd.s32 1, %s1198_s23  ;;  %s1206_s25 = sphi %s1257_s25, %s14_s25   ;;  %s1202_s24 = sphi %s1255_s24, %s1505_s24   ;;  %s1198_s23 = sphi %s1253_s23, %s1504_s23   ;;  %s1194_s22 = sphi %s1251_s22, %s1503_s22   ;;  %s1190_s21 = sphi %s1249_s21, %s1502_s21   ;;  %s1186_s20 = sphi %s1247_s20, %s1501_s20   ;;  %s1182_s19 = sphi %s1245_s19, %s1500_s19   ;;  %s1178_s18 = sphi %s1243_s18, %s1499_s18   ;;  %s1174_s17 = sphi %s1241_s17, %s1498_s17   ;;  %s1170_s16 = sphi %s1239_s16, %s1497_s16   ;;  %s1166_s15 = sphi %s1237_s15, %s1496_s15  }
   0x9   : > { %p31_p0 = scmp.ge.s32.totalorder %s29_s27, 2  ;;  %s33_s28 = sadd.s32 1, %s1202_s24 }
   0xa   : > { %s44_s29 = sadd.s32 1, %s1186_s20  ;;  %p51_p1 = scmp.ne.s32.totalorder %s1186_s20, %s1182_s19 }
   0xb   : > { %s1507_s27 = smov (%p31_p0, %s29_s27), 0  ;;  %s1509_s28 = smov (!%p31_p0, %s33_s28), %s1202_s24 }
   0xc   : > { %1483 = sst [smem:[#allocation7_spill]] %s1507_s27  ;;  %s40_s30 = ssub.s32 %s1198_s23, %s1507_s27 }
   0xd   : > { %p52_p2 = scmp.eq.s32.totalorder %s1206_s25, 0  ;;  %p35_p3 = scmp.ge.s32.totalorder %s1509_s28, 2 }
   0xe   : > { %s67_s5 = sadd.s32 2, %s1198_s23  ;;  %s68_s7 = sadd.s32 2, %s1507_s27 }
   0xf   : > { %p1310_p4 = por %p52_p2, %p51_p1  ;;  %s1511_s28 = smov (%p35_p3, %s1509_s28), 0 }
  0x10   : > { %1485 = sst [smem:[#allocation8_spill]] %s1511_s28  ;;  %s70_s8 = ssub.s32 %s67_s5, %s68_s7 }
  0x11   : > { %s74_s9 = sadd.s32 1, %s1178_s18  ;;  %s37_s10 = ssub.s32 %s1202_s24, %s1511_s28 }
  0x12   : > { %p81_p5 = scmp.ne.s32.totalorder %s1178_s18, %s1174_s17  ;;  %s41_s11 = sor.u32 %s40_s30, %s37_s10 }
  0x13   : > { %s71_s12 = sor.u32 %s70_s8, %s37_s10  ;;  %p42_p6 = scmp.eq.s32.totalorder %s41_s11, 0 }
  0x14   : > { %p72_p7 = scmp.eq.s32.totalorder %s71_s12, 0  ;;  %p1324_p8 = por %p81_p5, %p52_p2 }
  0x15   : > { %s97_s14 = sadd.s32 4, %s1198_s23  ;;  %s98_s7 = sadd.s32 4, %s1507_s27 }
  0x16   : > { %s1330_s26 = scalar_select %p42_p6, %s1186_s20, %s44_s29  }
  0x17   : > { %s1333_s5 = scalar_select %p72_p7, %s1178_s18, %s74_s9  }
  0x18   : > { %1487 = sst [smem:[#allocation9_spill]] %s1330_s26  ;;  %s104_s28 = sadd.s32 1, %s1170_s16 }
  0x19   : > { %s100_s4 = ssub.s32 %s97_s14, %s98_s7  ;;  %p111_p9 = scmp.ne.s32.totalorder %s1170_s16, %s1166_s15 }
  0x1a   : > { %s101_s30 = sor.u32 %s100_s4, %s37_s10  ;;  %s1488_s21 = sadd.s32 4294967295, %s1206_s25  }
  0x1b   : > { %p171_p10 = scmp.eq.s32.totalorder %s1488_s21, 3  ;;  %p102_p11 = scmp.eq.s32.totalorder %s101_s30, 0 }
  0x1c   : > { %p1343_p12 = por %p111_p9, %p52_p2  ;;  %p938_p0 = scmp.ge.s32.totalorder %s1206_s25, 4 }
  0x1d   : > { %p1350_p13 = por %p171_p10, %p51_p1 }
  0x1e   : > { %s1355_s29 = scalar_select %p102_p11, %s1170_s16, %s104_s28  }
  0x1f   : > { %193 = sbr.rel (%p938_p0) target bundleno = 60 (0x3c), region = 16 }
  0x24   : > { %196 = sbr.rel (!%p1310_p4) target bundleno = 44 (0x2c), region = 20  ;;  %s198_s4 = sand.u32 (%p1310_p4), 1, %s1186_s20  }
  0x25   : > { %s1003_s21 = smul.u32 (%p1310_p4), 12, %s1202_s24  ;;  %s939_s9 = sshll.u32 (%p1310_p4), %s198_s4, 3 }
  0x26   : > { %s200_s28 = scalar_lea.vmem (%p1310_p4), [#allocation2], %s939_s9 }
  0x27   : > { %s205_s10 = sadd.s32 (%p1310_p4), %s1198_s23, %s1003_s21 }
  0x28   : > { %s940_s12 = sshll.u32 (%p1310_p4), %s205_s10, 2 }
  0x29   : > { %s207_s30 = scalar_lea.vmem %s1474_s0, %s940_s12 }
  0x2a   : > { %v224_v0 = vld [vmem:[%s207_s30] sm:$0xf]  ;;  %v226_v1 = vld [vmem:[%s207_s30 + $0x18] sm:$0xf] }
  0x2b   : > { %225 = vst [vmem:[%s200_s28] sm:$0xf] %v224_v0  ;;  %227 = vst [vmem:[%s200_s28 + $0x4] sm:$0xf] %v226_v1 }
  0x2c PF: > { %255 = sbr.rel (!%p1324_p8) target bundleno = 52 (0x34), region = 61  ;;  %s257_s6 = sand.u32 (%p1324_p8), 1, %s1178_s18  }
  0x2d   : > { %s827_s4 = smul.u32 (%p1324_p8), 12, %s1202_s24  ;;  %s941_s21 = sshll.u32 (%p1324_p8), %s257_s6, 3 }
  0x2e   : > { %s259_s9 = scalar_lea.vmem (%p1324_p8), [#allocation3], %s941_s21 }
  0x2f   : > { %s828_s10 = sadd.s32 (%p1324_p8), %s1198_s23, %s827_s4 }
  0x30   : > { %s942_s27 = sshll.u32 (%p1324_p8), %s828_s10, 2 }
  0x31   : > { %s830_s12 = scalar_lea.vmem %s1475_s1, %s942_s27 }
  0x32   : > { %v943_v2 = vld [vmem:[%s830_s12 + $0x8] sm:$0xf]  ;;  %v944_v3 = vld [vmem:[%s830_s12 + $0x20] sm:$0xf] }
  0x33   : > { %282 = vst [vmem:[%s259_s9] sm:$0xf] %v943_v2  ;;  %284 = vst [vmem:[%s259_s9 + $0x4] sm:$0xf] %v944_v3 }
  0x34 PF: > { %312 = sbr.rel (!%p1343_p12) target bundleno = 60 (0x3c), region = 102  ;;  %s314_s13 = sand.u32 (%p1343_p12), 1, %s1170_s16  }
  0x35   : > { %s834_s7 = smul.u32 (%p1343_p12), 12, %s1202_s24  ;;  %s945_s30 = sshll.u32 (%p1343_p12), %s314_s13, 3 }
  0x36   : > { %s316_s21 = scalar_lea.vmem (%p1343_p12), [#allocation4], %s945_s30 }
  0x37   : > { %s835_s28 = sadd.s32 (%p1343_p12), %s1198_s23, %s834_s7 }
  0x38   : > { %s946_s6 = sshll.u32 (%p1343_p12), %s835_s28, 2 }
  0x39   : > { %s837_s27 = scalar_lea.vmem %s1476_s2, %s946_s6 }
  0x3a   : > { %v947_v4 = vld [vmem:[%s837_s27 + $0x10] sm:$0xf]  ;;  %v948_v5 = vld [vmem:[%s837_s27 + $0x28] sm:$0xf] }
  0x3b   : > { %339 = vst [vmem:[%s316_s21] sm:$0xf] %v947_v4  ;;  %341 = vst [vmem:[%s316_s21 + $0x4] sm:$0xf] %v948_v5 }
  0x3c PF: > { %p949_p1 = scmp.ge.s32.totalorder %s1206_s25, 1  ;;  %p374_p2 = scmp.lt.s32.totalorder %s1206_s25, 5 }
  0x3e   : > { %p375_p3 = pnand %p949_p1, %p374_p2 }
  0x3f   : > { %s388_s8 = sand.u32 (!%p375_p3), 1, %s1174_s17   ;;  %s381_s10 = sand.u32 (!%p375_p3), 1, %s1182_s19  }
  0x40   : > { %378 = sbr.rel (%p375_p3) target bundleno = 1446 (0x5a6), region = 147  ;;  %s951_s14 = sshll.u32 (!%p375_p3), %s388_s8, 3 }
  0x41   : > { %s1389_s12 = sshll.u32 (!%p375_p3), %s381_s10, 3  ;;  %s390_s17 = scalar_lea.vmem (!%p375_p3), [#allocation3], %s951_s14 }
  0x42   : > { %s383_s19 = scalar_lea.vmem (!%p375_p3), [#allocation2], %s1389_s12  ;;  %p433_p4 = scmp.lt.s32.totalorder (!%p375_p3), %s1194_s22, 1 }
  0x43   : > { %s1210_s28 = smov (!%p375_p3), 64   ;;  %s395_s6 = sand.u32 (!%p375_p3), 1, %s1166_s15  }
  0x44   : > { %s952_s4 = sshll.u32 (!%p375_p3), %s395_s6, 3  ;;  %s429_s15 = scalar_lea.vmem (!%p375_p3), [#allocation5], %s1389_s12 }
  0x45   : > { %v1208_v6 = vmov 0.0   ;;  %vm1209_vm0 = vmmov 0   ;;  %vm455_vm1 = vcmask 523264   ;;  %v1101_v7 = vld [vmem:[%s390_s17] sm:$0x7f]   ;;  %s434_s9 = scalar_select %p433_p4, %s1194_s22, 1 }
  0x46   : > { %979 = vmatprep.subr.bf16.mxu0 %v1208_v6  ;;  %981 = vmatprep.mubr.msk.bf16.mxu0 %vm1209_vm0, %v1208_v6  ;;  %v460_v8 = vsel %vm455_vm1, %v1101_v7, 0  ;;  %v1102_v9 = vld [vmem:[%s383_s19] sm:$0x7f]   ;;  %vm513_vm2 = vcmask 105472   ;;  %vm517_vm3 = vcmask 102400   ;;  %vm546_vm4 = vcmask 1045504  }
  0x47   : > { %985 = vmatprep.subr.bf16.mxu1 %v1208_v6  ;;  %987 = vmatprep.mubr.msk.bf16.mxu1 %vm1209_vm0, %v1208_v6  ;;  %s435_s30 = scalar_lea.vmem %s1477_s3, %s434_s9  ;;  %vm547_vm5 = vcmask 1046528   ;;  %v1211_v31 = vmov 65535   ;;  %s397_s26 = scalar_lea.vmem [#allocation4], %s952_s4  ;;  %vm740_vm6 = vcmask 1042432   ;;  %vm741_vm7 = vsmask.f32 2304 }
  0x48   : > { %980 = vmatpush3.bf16.xpose.msra.mxu0 %v460_v8  ;;  %v1405_v11 = vld [vmem:[%s435_s30] ss:$0 sm:$0xff]  ;;  %v548_v32 = vsel %vm546_vm4, 4294967295, %v1211_v31  ;;  %vm742_vm8 = vmand %vm740_vm6, %vm741_vm7  ;;  %s1491_s27 = sld [smem:[#allocation6_spill]] (%p1350_p13)  ;;  %s965_s21 = sshll.u32 (%p1350_p13), %s1194_s22, 2 }
  0x49   : > { %997 = vmatprep.subr.bf16.mxu0 %v1208_v6  ;;  %v549_v33 = vsel %vm547_vm5, %v548_v32, 0  ;;  %v1103_v34 = vld [vmem:[%s397_s26] sm:$0x7f]   ;;  %s1492_s17 = sld [smem:[#allocation10_spill]] (%p1350_p13) }
  0x4a   : > { %v551_v35 = vand.u32 %v1103_v34, %v549_v33 }
  0x4c   : > { %986 = vmatpush3.bf16.msra.mxu1 %v551_v35 }
  0x4d   : > { %991 = vmatprep.subr.bf16.mxu1 %v1208_v6 }
  0x4e   : > { %s757_s8 = sadd.s32 (%p1350_p13), %s1491_s27, %s965_s21 }
  0x4f   : > { %982 = vmatmul.mubr.msk.bf16.vlgmr.msra.gmra.mxu0 %vm455_vm1, %v1102_v9  ;;  %s966_s10 = sshll.u32 (%p1350_p13), %s757_s8, 2 }
  0x50   : > { %999 = vmatprep.mubr.msk.bf16.mxu0 %vm1209_vm0, %v1208_v6  ;;  %s759_s19 = scalar_lea.vmem (%p1350_p13), %s1492_s17, %s966_s10 }
 0x10f   : > { %v496_v10 = vpop.f32.mrf.mxu0 }
 0x110   : > { %v503_v12 = vmul.f32 0.125, %v496_v10 }
 0x111   : > { %v983_v13 = vpop.f32.mrf.mxu0 }
 0x112   : > { %v511_v14 = vadd.f32 %v1405_v11, %v503_v12 }
 0x113   : > { %v499_v15 = vpop.f32.mrf.mxu0 }
 0x114   : > { %v504_v16 = vmul.f32 0.125, %v499_v15  ;;  %v514_v17 = vsel %vm513_vm2, %v511_v14, -inf }
 0x115   : > { %515 = vmax.xlane.f32.xlu0 %v514_v17  ;;  %v984_v18 = vpop.f32.mrf.mxu0 }
 0x116   : > { %v512_v19 = vadd.f32 %v1405_v11, %v504_v16 }
 0x118   : > { %v518_v20 = vsel %vm517_vm3, %v512_v19, -inf }
 0x119   : > { %519 = vmax.xlane.f32.xlu0 %v518_v20 }
 0x12f   : > { %596 = vrot.lane.b32.xlu0 %v1101_v7, %s1210_s28 }
 0x19e   : > { %v516_v21 = vpop.xlane.xlu0 %515 }
 0x19f   : > { %v521_v22 = vsub.f32 %v511_v14, %v516_v21 }
 0x1a1   : > { %v523_v23 = vmul.f32 1.442695, %v521_v22 }
 0x1a2   : > { %v520_v24 = vpop.xlane.xlu0 %519 }
 0x1a3   : > { %1104 = vpow2.f32 %v523_v23  ;;  %v522_v25 = vsub.f32 %v512_v19, %v520_v24  ;;  %v743_v23 = vld [vmem:[%s429_s15 + $0x4] sm:$0x7] }
 0x1a5   : > { %v525_v26 = vmul.f32 1.442695, %v522_v25 }
 0x1a6   : > { %v597_v40 = vpop.permute.xlu0 %596 }
 0x1a7   : > { %1106 = vpow2.f32 %v525_v26  ;;  %v602_v43 = vsel %vm455_vm1, %v597_v40, 0 }
 0x1b0   : > { %v1105_v27 = vpop.eup %1104 }
 0x1b1   : > { %v527_v28 = vsel %vm513_vm2, %v1105_v27, 0.0 }
 0x1b2   : > { %528 = vadd.xlane.f32.xlu1 %v527_v28 }
 0x1b4   : > { %v1107_v29 = vpop.eup %1106 }
 0x1b5   : > { %v530_v30 = vsel %vm517_vm3, %v1107_v29, 0.0 }
 0x1b6   : > { %531 = vadd.xlane.f32.xlu1 %v530_v30 }
 0x1c7   : > { %594 = vrot.lane.b32.xlu1 %v1102_v9, %s1210_s28 }
 0x23b   : > { %v529_v36 = vpop.xlane.xlu1 %528 }
 0x23c   : > { %1108 = vrcp.f32 %v529_v36 }
 0x23f   : > { %v532_v37 = vpop.xlane.xlu1 %531 }
 0x240   : > { %1110 = vrcp.f32 %v532_v37 }
 0x243   : > { %v595_v45 = vpop.permute.xlu1 %594 }
 0x249   : > { %v1109_v38 = vpop.eup %1108 }
 0x24a   : > { %v534_v41 = vmul.f32 %v1109_v38, %v1105_v27 }
 0x24d   : > { %v1111_v39 = vpop.eup %1110 }
 0x24e   : > { %v536_v42 = vmul.f32 %v1111_v39, %v1107_v29 }
 0x250   : > { %v537_v44 = vpack.c.bf16 %v536_v42, %v534_v41 }
 0x252   : > { %988 = vmatmul.mubr.msk.bf16.vlgmr.msra.gmra.mxu1 %vm513_vm2, %v537_v44 }
 0x253   : > { %992 = vmatpush3.bf16.xpose.msra.mxu1 %v602_v43  ;;  %993 = vmatprep.mubr.msk.bf16.mxu1 %vm1209_vm0, %v1208_v6 }
 0x25a   : > { %994 = vmatmul.mubr.msk.bf16.vlgmr.msra.gmra.mxu1 %vm455_vm1, %v595_v45 }
 0x312   : > { %v587_v46 = vpop.f32.mrf.mxu1 }
 0x314   : > { %v989_v47 = vpop.f32.mrf.mxu1 }
 0x316   : > { %v590_v48 = vpop.f32.mrf.mxu1 }
 0x318   : > { %v990_v49 = vpop.f32.mrf.mxu1 }
 0x31a   : > { %v638_v50 = vpop.f32.mrf.mxu1 }
 0x31b   : > { %v645_v51 = vmul.f32 0.125, %v638_v50 }
 0x31c   : > { %v995_v52 = vpop.f32.mrf.mxu1 }
 0x31d   : > { %v647_v53 = vadd.f32 %v1405_v11, %v645_v51 }
 0x31e   : > { %v641_v54 = vpop.f32.mrf.mxu1 }
 0x31f   : > { %v646_v55 = vmul.f32 0.125, %v641_v54  ;;  %v649_v56 = vsel %vm513_vm2, %v647_v53, -inf }
 0x320   : > { %650 = vmax.xlane.f32.xlu1 %v649_v56  ;;  %v996_v57 = vpop.f32.mrf.mxu1 }
 0x321   : > { %v648_v58 = vadd.f32 %v1405_v11, %v646_v55 }
 0x323   : > { %v652_v59 = vsel %vm517_vm3, %v648_v58, -inf }
 0x324   : > { %653 = vmax.xlane.f32.xlu0 %v652_v59 }
 0x3a9   : > { %v651_v60 = vpop.xlane.xlu1 %650 }
 0x3aa   : > { %v655_v61 = vsub.f32 %v647_v53, %v651_v60 }
 0x3ac   : > { %v657_v62 = vmul.f32 1.442695, %v655_v61 }
 0x3ad   : > { %v654_v63 = vpop.xlane.xlu0 %653 }
 0x3ae   : > { %1112 = vpow2.f32 %v657_v62  ;;  %v656_v0 = vsub.f32 %v648_v58, %v654_v63 }
 0x3b0   : > { %v659_v1 = vmul.f32 1.442695, %v656_v0 }
 0x3b2   : > { %1114 = vpow2.f32 %v659_v1 }
 0x3bb   : > { %v1113_v2 = vpop.eup %1112 }
 0x3bc   : > { %v661_v3 = vsel %vm513_vm2, %v1113_v2, 0.0 }
 0x3bd   : > { %662 = vadd.xlane.f32.xlu0 %v661_v3 }
 0x3bf   : > { %v1115_v4 = vpop.eup %1114 }
 0x3c0   : > { %v664_v5 = vsel %vm517_vm3, %v1115_v4, 0.0 }
 0x3c1   : > { %665 = vadd.xlane.f32.xlu1 %v664_v5 }
 0x3d3   : > { %672 = vrot.lane.b32.xlu0 %v1103_v34, %s1210_s28 }
 0x446   : > { %v663_v6 = vpop.xlane.xlu0 %662 }
 0x447   : > { %1116 = vrcp.f32 %v663_v6 }
 0x44a   : > { %v666_v7 = vpop.xlane.xlu1 %665  ;;  %v673_v8 = vpop.permute.xlu0 %672 }
 0x44b   : > { %1118 = vrcp.f32 %v666_v7  ;;  %v678_v9 = vand.u32 %v673_v8, %v549_v33 }
 0x44d   : > { %998 = vmatpush3.bf16.msra.mxu0 %v678_v9 }
 0x454   : > { %v1117_v10 = vpop.eup %1116 }
 0x455   : > { %v668_v12 = vmul.f32 %v1117_v10, %v1113_v2 }
 0x458   : > { %v1119_v11 = vpop.eup %1118 }
 0x459   : > { %v670_v13 = vmul.f32 %v1119_v11, %v1115_v4 }
 0x45b   : > { %v671_v14 = vpack.c.bf16 %v670_v13, %v668_v12 }
 0x45d   : > { %1000 = vmatmul.mubr.msk.bf16.vlgmr.msra.gmra.mxu0 %vm513_vm2, %v671_v14 }
 0x51d   : > { %v714_v15 = vpop.f32.mrf.mxu0 }
 0x51f   : > { %v1001_v16 = vpop.f32.mrf.mxu0 }
 0x521   : > { %v717_v17 = vpop.f32.mrf.mxu0 }
 0x522   : > { %v1096_v18 = vpack.i.bf16 %v714_v15, %v717_v17 }
 0x523   : > { %v1002_v19 = vpop.f32.mrf.mxu0 }
 0x524   : > { %1097 = vrot.lane.b32.xlu1 %v1096_v18, %s1210_s28 }
 0x596   : > { %v1098_v20 = vpop.permute.xlu1 %1097 }
 0x597   : > { %v1100_v21 = vunpack.i.h.bf16 %v1098_v20  ;;  %v1099_v22 = vunpack.i.l.bf16 %v1098_v20 }
 0x599   : > { %v729_v24 = vsel %vm455_vm1, %v587_v46, %v1100_v21  ;;  %v730_v25 = vsel %vm455_vm1, %v590_v48, %v1099_v22  ;;  %752 = sbr.rel (!%p1350_p13) target bundleno = 1446 (0x5a6), region = 163 }
 0x59a   : > { %v969_v26 = vpack.c.bf16 %v729_v24, %v729_v24  ;;  %v970_v27 = vpack.c.bf16 %v730_v25, %v730_v25 }
 0x59c   : > { %739 = vst [vmem:[%s429_s15] sm:$0xf] %v969_v26  ;;  %v744_v28 = vsel %vm742_vm8, %v970_v27, %v743_v23 }
 0x59d   : > { %745 = vst [vmem:[%s429_s15 + $0x4] sm:$0x7] %v744_v28 }
 0x5a3   : > { %v776_v29 = vld [vmem:[%s429_s15] sm:$0xf] }
 0x5a4   : > { %v778_v30 = vld [vmem:[%s429_s15 + $0x4] sm:$0xf]  ;;  %777 = vst [vmem:[%s759_s19] sm:$0xf] %v776_v29 }
 0x5a5   : > { %779 = vst [vmem:[%s759_s19 + $0x8] sm:$0xf] %v778_v30 }
 0x5a6 PF: > { %s14_s25 = sadd.s32 1, %s1206_s25   ;;  %s1493_s22 = sld [smem:[#allocation9_spill]] }
 0x5a7   : > { %p11_p5 = scmp.ge.s32.totalorder %s14_s25, 6   ;;  %s1494_s11 = sld [smem:[#allocation7_spill]] }
 0x5a8   : > { %s1495_s9 = sld [smem:[#allocation8_spill]]  ;;  %s1496_s15 = smov %s1170_s16 }
 0x5a9   : > { %s1497_s16 = smov %s1355_s29  ;;  %s1498_s17 = smov %s1178_s18 }
 0x5aa   : > { %s1499_s18 = smov %s1333_s5  ;;  %s1500_s19 = smov %s1186_s20 }
 0x5ab   : > { %s1502_s21 = smov %s1198_s23  ;;  %13 = sbr.rel (!%p11_p5) target bundleno = 8 (0x8), region = 254 }
 0x5ac   : > { %s1501_s20 = smov %s1493_s22  ;;  %s1503_s22 = smov %s1202_s24 }
 0x5ad   : > { %s1504_s23 = smov %s1494_s11 }
 0x5ae   : > { %s1505_s24 = smov %s1495_s9 }

// kernel: roberta_forward.16
= control target key start
LH: loop header
LB: loop body
LE: loop exit
PB: predicated region body
PF: predicated region fallthrough
CT: control target
= control target key end

     0   :  { %v660_v1 = vmov 0.0   ;;  %v341_v37 = vlaneseq  ;;  %vm388_vm0 = vcmask 1041408   ;;  %s861_s1 = inlined_call_operand.vmem [shape: bf16[256,256], index: 1, kind: input, shape index: {}]   ;;  %s862_s0 = inlined_call_operand.vmem [shape: bf16[26,256], index: 0, kind: input, shape index: {}]   ;;  %s863_s2 = inlined_call_operand.vmem [shape: f32[1,256], index: 2, kind: input, shape index: {}]   ;;  %s864_s3 = inlined_call_operand.vmem [shape: bf16[26,256], index: 3, kind: input, shape index: {}]   ;;  %s865_s4 = inlined_call_operand.vmem [shape: f32[1,256], index: 4, kind: input, shape index: {}]   ;;  %s866_s5 = inlined_call_operand.vmem [shape: f32[1,256], index: 5, kind: input, shape index: {}]   ;;  %s867_s6 = inlined_call_operand.vmem [shape: bf16[26,256], index: 6, kind: output, shape index: {}]  }
   0x1   :  { %v598_v0 = vld [vmem:[%s861_s1 + $0x74] ss:$8 sps:$4 sm:$0xff]   ;;  %33 = vst [vmem:[#allocation2 + $0x28] sm:$0x3] %v660_v1  ;;  %34 = vst [vmem:[#allocation2 + $0x38] sm:$0x3] %v660_v1 }
   0x2   :  { %v600_v2 = vld [vmem:[%s861_s1 + $0x70] ss:$8 sps:$4 sm:$0xff]   ;;  %259 = vmatprep.subr.bf16.mxu0 %v598_v0  ;;  %565 = vmatprep.subr.bf16.mxu1 %v598_v0  ;;  %v601_v3 = vld [vmem:[%s861_s1 + $0x64] ss:$8 sps:$4 sm:$0xff]   ;;  %v603_v4 = vld [vmem:[%s861_s1 + $0x60] ss:$8 sps:$4 sm:$0xff]  }
   0x3   :  { %260 = vmatpush1.bf16.msra.mxu0 %v600_v2  ;;  %581 = vmatpush1.bf16.msra.mxu1 %v600_v2  ;;  %v604_v5 = vld [vmem:[%s861_s1 + $0x54] ss:$8 sps:$4 sm:$0xff]   ;;  %v606_v6 = vld [vmem:[%s861_s1 + $0x50] ss:$8 sps:$4 sm:$0xff]   ;;  %v607_v7 = vld [vmem:[%s861_s1 + $0x44] ss:$8 sps:$4 sm:$0xff]  }
   0x4   :  { %261 = vmatprep.subr.bf16.mxu0 %v601_v3  ;;  %566 = vmatprep.subr.bf16.mxu1 %v601_v3  ;;  %v609_v8 = vld [vmem:[%s861_s1 + $0x40] ss:$8 sps:$4 sm:$0xff]   ;;  %v610_v9 = vld [vmem:[%s861_s1 + $0x34] ss:$8 sps:$4 sm:$0xff]   ;;  %v612_v10 = vld [vmem:[%s861_s1 + $0x30] ss:$8 sps:$4 sm:$0xff]  }
   0x5   :  { %v613_v11 = vld [vmem:[%s861_s1 + $0x24] ss:$8 sps:$4 sm:$0xff]   ;;  %v615_v12 = vld [vmem:[%s861_s1 + $0x20] ss:$8 sps:$4 sm:$0xff]   ;;  %v616_v13 = vld [vmem:[%s861_s1 + $0x14] ss:$8 sps:$4 sm:$0xff]  }
   0x6   :  { %v648_v14 = vld [vmem:[%s862_s0 + $0x4] ss:$8 sps:$4 sm:$0xff]   ;;  %v618_v15 = vld [vmem:[%s861_s1 + $0x10] ss:$8 sps:$4 sm:$0xff]   ;;  %v621_v18 = vld [vmem:[%s861_s1] ss:$8 sps:$4 sm:$0xff]  }
   0x7   :  { %262 = vmatpush1.bf16.msra.mxu0 %v603_v4  ;;  %582 = vmatpush1.bf16.msra.mxu1 %v603_v4  ;;  %v619_v16 = vld [vmem:[%s861_s1 + $0x4] ss:$8 sps:$4 sm:$0xff]   ;;  %v651_v17 = vld [vmem:[%s862_s0 + $0x14] ss:$8 sps:$4 sm:$0x1f]   ;;  %v342_v38 = vshrl.u32 %v341_v37, 7 }
   0x8   :  { %263 = vmatprep.subr.bf16.mxu0 %v604_v5  ;;  %567 = vmatprep.subr.bf16.mxu1 %v604_v5  ;;  %v622_v19 = vld [vmem:[%s861_s1 + $0xf4] ss:$8 sps:$4 sm:$0xff]   ;;  %v624_v20 = vld [vmem:[%s861_s1 + $0xf0] ss:$8 sps:$4 sm:$0xff]   ;;  %v625_v21 = vld [vmem:[%s861_s1 + $0xe4] ss:$8 sps:$4 sm:$0xff]  }
   0x9   :  { %291 = vmatprep.mubr.bf16.mxu0 %v648_v14  ;;  %301 = vmatprep.mubr.bf16.mxu1 %v651_v17  ;;  %v627_v22 = vld [vmem:[%s861_s1 + $0xe0] ss:$8 sps:$4 sm:$0xff]   ;;  %v628_v23 = vld [vmem:[%s861_s1 + $0xd4] ss:$8 sps:$4 sm:$0xff]   ;;  %v630_v24 = vld [vmem:[%s861_s1 + $0xd0] ss:$8 sps:$4 sm:$0xff]  }
   0xa   :  { %v631_v25 = vld [vmem:[%s861_s1 + $0xc4] ss:$8 sps:$4 sm:$0xff]   ;;  %v633_v26 = vld [vmem:[%s861_s1 + $0xc0] ss:$8 sps:$4 sm:$0xff]   ;;  %v634_v27 = vld [vmem:[%s861_s1 + $0xb4] ss:$8 sps:$4 sm:$0xff]  }
   0xb   :  { %264 = vmatpush1.bf16.msra.mxu0 %v606_v6  ;;  %583 = vmatpush1.bf16.msra.mxu1 %v606_v6  ;;  %v636_v28 = vld [vmem:[%s861_s1 + $0xb0] ss:$8 sps:$4 sm:$0xff]   ;;  %v637_v29 = vld [vmem:[%s861_s1 + $0xa4] ss:$8 sps:$4 sm:$0xff]   ;;  %v639_v30 = vld [vmem:[%s861_s1 + $0xa0] ss:$8 sps:$4 sm:$0xff]  }
   0xc   :  { %265 = vmatprep.subr.bf16.mxu0 %v607_v7  ;;  %568 = vmatprep.subr.bf16.mxu1 %v607_v7  ;;  %v640_v31 = vld [vmem:[%s861_s1 + $0x94] ss:$8 sps:$4 sm:$0xff]   ;;  %v642_v32 = vld [vmem:[%s861_s1 + $0x90] ss:$8 sps:$4 sm:$0xff]   ;;  %v643_v33 = vld [vmem:[%s861_s1 + $0x84] ss:$8 sps:$4 sm:$0xff]  }
   0xd   :  { %v645_v34 = vld [vmem:[%s861_s1 + $0x80] ss:$8 sps:$4 sm:$0xff]   ;;  %v649_v36 = vld [vmem:[%s862_s0 + $0x10] ss:$8 sps:$4 sm:$0x1f]   ;;  %v804_v41 = vsub.s32 0, %v342_v38 }
   0xe   :  { %v646_v35 = vld [vmem:[%s862_s0] ss:$8 sps:$4 sm:$0xff]   ;;  %v809_v43 = vsub.s32 1, %v342_v38  ;;  %v42_v50 = vld [vmem:[#allocation2 + $0x38] sm:$0x3]  ;;  %v361_v60 = vld [vmem:[%s864_s3 + $0x10] sm:$0xff] }
   0xf   :  { %266 = vmatpush1.bf16.msra.mxu0 %v609_v8  ;;  %584 = vmatpush1.bf16.msra.mxu1 %v609_v8  ;;  %v339_v42 = vld [vmem:[%s863_s2] sm:$0x3]  ;;  %v41_v46 = vld [vmem:[#allocation2 + $0x28] sm:$0x3]  ;;  %v368_v0 = vunpack.c.h.bf16 %v361_v60  ;;  %v362_v1 = vld [vmem:[%s864_s3 + $0x18] sm:$0x11]  ;;  %v367_v4 = vunpack.c.l.bf16 %v361_v60 }
  0x10   :  { %267 = vmatprep.subr.bf16.mxu0 %v610_v9  ;;  %569 = vmatprep.subr.bf16.mxu1 %v610_v9  ;;  %v360_v47 = vld [vmem:[%s864_s3 + $0x8] sm:$0xff]  ;;  %v344_v51 = vrot.slane %v339_v42, %v804_v41  ;;  %v348_v53 = vrot.slane %v339_v42, %v809_v43  ;;  %v369_v6 = vunpack.c.l.bf16 %v362_v1  ;;  %v359_v9 = vld [vmem:[%s864_s3] sm:$0xff] }
  0x11   :  { %v365_v54 = vunpack.c.l.bf16 %v360_v47  ;;  %v366_v59 = vunpack.c.h.bf16 %v360_v47  ;;  %v363_v17 = vunpack.c.l.bf16 %v359_v9 }
  0x13   :  { %268 = vmatpush1.bf16.msra.mxu0 %v612_v10  ;;  %585 = vmatpush1.bf16.msra.mxu1 %v612_v10 }
  0x14   :  { %269 = vmatprep.subr.bf16.mxu0 %v613_v11  ;;  %570 = vmatprep.subr.bf16.mxu1 %v613_v11  ;;  %v370_v11 = vunpack.c.h.bf16 %v362_v1 }
  0x17   :  { %270 = vmatpush1.bf16.msra.mxu0 %v615_v12  ;;  %586 = vmatpush1.bf16.msra.mxu1 %v615_v12 }
  0x18   :  { %271 = vmatprep.subr.bf16.mxu0 %v616_v13  ;;  %571 = vmatprep.subr.bf16.mxu1 %v616_v13 }
  0x1b   :  { %272 = vmatpush1.bf16.msra.mxu0 %v618_v15  ;;  %587 = vmatpush1.bf16.msra.mxu1 %v618_v15 }
  0x1c   :  { %273 = vmatprep.subr.bf16.mxu0 %v619_v16  ;;  %572 = vmatprep.subr.bf16.mxu1 %v619_v16 }
  0x1f   :  { %274 = vmatpush1.bf16.msra.mxu0 %v621_v18  ;;  %588 = vmatpush1.bf16.msra.mxu1 %v621_v18 }
  0x20   :  { %275 = vmatprep.subr.bf16.mxu0 %v622_v19  ;;  %573 = vmatprep.subr.bf16.mxu1 %v622_v19 }
  0x23   :  { %276 = vmatpush2.bf16.msra.mxu0 %v624_v20  ;;  %589 = vmatpush2.bf16.msra.mxu1 %v624_v20  ;;  %v364_v20 = vunpack.c.h.bf16 %v359_v9 }
  0x24   :  { %277 = vmatprep.subr.bf16.mxu0 %v625_v21  ;;  %574 = vmatprep.subr.bf16.mxu1 %v625_v21 }
  0x27   :  { %278 = vmatpush2.bf16.msra.mxu0 %v627_v22  ;;  %590 = vmatpush2.bf16.msra.mxu1 %v627_v22 }
  0x28   :  { %279 = vmatprep.subr.bf16.mxu0 %v628_v23  ;;  %575 = vmatprep.subr.bf16.mxu1 %v628_v23 }
  0x2b   :  { %280 = vmatpush2.bf16.msra.mxu0 %v630_v24  ;;  %591 = vmatpush2.bf16.msra.mxu1 %v630_v24 }
  0x2c   :  { %281 = vmatprep.subr.bf16.mxu0 %v631_v25  ;;  %576 = vmatprep.subr.bf16.mxu1 %v631_v25 }
  0x2f   :  { %282 = vmatpush2.bf16.msra.mxu0 %v633_v26  ;;  %592 = vmatpush2.bf16.msra.mxu1 %v633_v26 }
  0x30   :  { %283 = vmatprep.subr.bf16.mxu0 %v634_v27  ;;  %577 = vmatprep.subr.bf16.mxu1 %v634_v27 }
  0x33   :  { %284 = vmatpush2.bf16.msra.mxu0 %v636_v28  ;;  %593 = vmatpush2.bf16.msra.mxu1 %v636_v28 }
  0x34   :  { %285 = vmatprep.subr.bf16.mxu0 %v637_v29  ;;  %578 = vmatprep.subr.bf16.mxu1 %v637_v29 }
  0x37   :  { %286 = vmatpush2.bf16.msra.mxu0 %v639_v30  ;;  %594 = vmatpush2.bf16.msra.mxu1 %v639_v30 }
  0x38   :  { %287 = vmatprep.subr.bf16.mxu0 %v640_v31  ;;  %579 = vmatprep.subr.bf16.mxu1 %v640_v31 }
  0x3b   :  { %288 = vmatpush2.bf16.msra.mxu0 %v642_v32  ;;  %595 = vmatpush2.bf16.msra.mxu1 %v642_v32 }
  0x3c   :  { %289 = vmatprep.subr.bf16.mxu0 %v643_v33  ;;  %580 = vmatprep.subr.bf16.mxu1 %v643_v33 }
  0x3f   :  { %290 = vmatpush2.bf16.msra.mxu0 %v645_v34  ;;  %596 = vmatpush2.bf16.msra.mxu1 %v645_v34 }
  0x42   :  { %292 = vmatmul.mubr.bf16.vlgmr.msra.gmra.mxu0 %v646_v35  ;;  %302 = vmatmul.mubr.bf16.vlgmr.msra.gmra.mxu1 %v649_v36 }
 0x102   :  { %v293_v39 = vpop.f32.mrf.mxu0  ;;  %v303_v40 = vpop.f32.mrf.mxu1 }
 0x103   :  { %v355_v3 = vadd.f32 %v344_v51, %v303_v40  ;;  %v351_v18 = vadd.f32 %v344_v51, %v293_v39 }
 0x104   :  { %v295_v44 = vpop.f32.mrf.mxu0  ;;  %v305_v45 = vpop.f32.mrf.mxu1 }
 0x105   :  { %v356_v63 = vadd.f32 %v348_v53, %v305_v45  ;;  %v375_v12 = vadd.f32 %v367_v4, %v355_v3  ;;  %v352_v19 = vadd.f32 %v348_v53, %v295_v44  ;;  %v371_v25 = vadd.f32 %v363_v17, %v351_v18  ;;  %v449_v3 = vld [vmem:[%s865_s4] sm:$0x3] }
 0x106   :  { %v297_v48 = vpop.f32.mrf.mxu0  ;;  %v307_v49 = vpop.f32.mrf.mxu1 }
 0x107   :  { %v318_v52 = vadd.f32 %v307_v49, %v41_v46  ;;  %v353_v58 = vadd.f32 %v344_v51, %v297_v48  ;;  %v376_v7 = vadd.f32 %v368_v0, %v356_v63  ;;  %v372_v26 = vadd.f32 %v364_v20, %v352_v19 }
 0x108   :  { %v299_v55 = vpop.f32.mrf.mxu0  ;;  %v309_v56 = vpop.f32.mrf.mxu1 }
 0x109   :  { %326 = vst [vmem:[#allocation2 + $0x28] sm:$0x3] %v318_v52  ;;  %v319_v57 = vadd.f32 %v309_v56, %v42_v50  ;;  %v354_v61 = vadd.f32 %v348_v53, %v299_v55  ;;  %v373_v62 = vadd.f32 %v365_v54, %v353_v58  ;;  %v385_v16 = vadd.f32 %v376_v7, %v375_v12 }
 0x10a   :  { %v379_v27 = vadd.f32 %v372_v26, %v371_v25 }
 0x10b   :  { %327 = vst [vmem:[#allocation2 + $0x38] sm:$0x3] %v319_v57  ;;  %v374_v2 = vadd.f32 %v366_v59, %v354_v61 }
 0x10d   :  { %v382_v5 = vadd.f32 %v374_v2, %v373_v62 }
 0x10f   :  { %383 = vadd.xlane.f32.xlu1 %v382_v5  ;;  %v469_v5 = vld [vmem:[%s866_s5] sm:$0x3] }
 0x110   :  { %v337_v8 = vld [vmem:[#allocation2 + $0x28] sm:$0x3] }
 0x111   :  { %v357_v10 = vadd.f32 %v344_v51, %v337_v8  ;;  %v458_v8 = vrot.slane %v449_v3, %v809_v43 }
 0x112   :  { %v338_v13 = vld [vmem:[#allocation2 + $0x38] sm:$0x3] }
 0x113   :  { %v358_v14 = vadd.f32 %v348_v53, %v338_v13  ;;  %v377_v15 = vadd.f32 %v369_v6, %v357_v10  ;;  %386 = vadd.xlane.f32.xlu1 %v385_v16  ;;  %v478_v13 = vrot.slane %v469_v5, %v809_v43 }
 0x115   :  { %v378_v21 = vadd.f32 %v370_v11, %v358_v14  ;;  %v389_v22 = vsel %vm388_vm0, %v377_v15, 0.0 }
 0x117   :  { %v390_v23 = vsel %vm388_vm0, %v378_v21, 0.0 }
 0x118   :  { %v391_v24 = vadd.f32 %v390_v23, %v389_v22 }
 0x11a   :  { %392 = vadd.xlane.f32.xlu0 %v391_v24 }
 0x11e   :  { %380 = vadd.xlane.f32.xlu0 %v379_v27 }
 0x198   :  { %v384_v28 = vpop.xlane.xlu1 %383 }
 0x199   :  { %v396_v29 = vmul.f32 0.00390625, %v384_v28 }
 0x19b   :  { %v401_v30 = vsub.f32 %v373_v62, %v396_v29  ;;  %v402_v31 = vsub.f32 %v374_v2, %v396_v29 }
 0x19c   :  { %v387_v35 = vpop.xlane.xlu1 %386 }
 0x19d   :  { %v409_v32 = vmul.f32 %v401_v30, %v401_v30  ;;  %v410_v33 = vmul.f32 %v402_v31, %v402_v31  ;;  %v397_v38 = vmul.f32 0.00390625, %v387_v35 }
 0x19f   :  { %v418_v34 = vadd.f32 %v410_v33, %v409_v32  ;;  %v827_v47 = vsub.f32 %v375_v12, %v397_v38  ;;  %v829_v48 = vsub.f32 %v376_v7, %v397_v38  ;;  %v454_v7 = vrot.slane %v449_v3, %v804_v41 }
 0x1a0   :  { %v474_v12 = vrot.slane %v469_v5, %v804_v41 }
 0x1a1   :  { %419 = vadd.xlane.f32.xlu1 %v418_v34  ;;  %v411_v57 = vmul.f32 %v827_v47, %v827_v47  ;;  %v412_v58 = vmul.f32 %v829_v48, %v829_v48 }
 0x1a3   :  { %v393_v36 = vpop.xlane.xlu0 %392  ;;  %v421_v59 = vadd.f32 %v412_v58, %v411_v57 }
 0x1a4   :  { %v398_v37 = vmul.f32 0.00390625, %v393_v36 }
 0x1a6   :  { %v405_v39 = vsub.f32 %v377_v15, %v398_v37  ;;  %v406_v40 = vsub.f32 %v378_v21, %v398_v37 }
 0x1a7   :  { %v381_v42 = vpop.xlane.xlu0 %380 }
 0x1a8   :  { %v395_v44 = vmul.f32 0.00390625, %v381_v42  ;;  %v413_v45 = vmul.f32 %v405_v39, %v405_v39  ;;  %v414_v46 = vmul.f32 %v406_v40, %v406_v40 }
 0x1aa   :  { %v399_v49 = vsub.f32 %v371_v25, %v395_v44  ;;  %v400_v50 = vsub.f32 %v372_v26, %v395_v44  ;;  %v424_v51 = vsel %vm388_vm0, %v413_v45, 0.0  ;;  %v425_v52 = vsel %vm388_vm0, %v414_v46, 0.0 }
 0x1ab   :  { %v426_v53 = vadd.f32 %v425_v52, %v424_v51 }
 0x1ac   :  { %v407_v54 = vmul.f32 %v399_v49, %v399_v49  ;;  %v408_v55 = vmul.f32 %v400_v50, %v400_v50 }
 0x1ad   :  { %427 = vadd.xlane.f32.xlu1 %v426_v53 }
 0x1ae   :  { %v415_v56 = vadd.f32 %v408_v55, %v407_v54 }
 0x1b0   :  { %416 = vadd.xlane.f32.xlu0 %v415_v56 }
 0x1b4   :  { %422 = vadd.xlane.f32.xlu0 %v421_v59 }
 0x22a   :  { %v420_v60 = vpop.xlane.xlu1 %419 }
 0x22b   :  { %v430_v61 = vmul.f32 0.00390625, %v420_v60 }
 0x22d   :  { %v434_v62 = vadd.f32 1e-05, %v430_v61 }
 0x22f   :  { %652 = vrsqrt.f32 %v434_v62 }
 0x236   :  { %v428_v63 = vpop.xlane.xlu1 %427 }
 0x237   :  { %v432_v0 = vmul.f32 0.00390625, %v428_v63 }
 0x239   :  { %v436_v1 = vadd.f32 1e-05, %v432_v0  ;;  %v417_v2 = vpop.xlane.xlu0 %416 }
 0x23a   :  { %v429_v4 = vmul.f32 0.00390625, %v417_v2 }
 0x23b   :  { %654 = vrsqrt.f32 %v436_v1 }
 0x23c   :  { %v433_v6 = vadd.f32 1e-05, %v429_v4  ;;  %v653_v10 = vpop.eup %652 }
 0x23d   :  { %v423_v9 = vpop.xlane.xlu0 %422  ;;  %v443_v14 = vmul.f32 %v653_v10, %v401_v30  ;;  %v444_v15 = vmul.f32 %v653_v10, %v402_v31 }
 0x23e   :  { %656 = vrsqrt.f32 %v433_v6  ;;  %v431_v11 = vmul.f32 0.00390625, %v423_v9 }
 0x23f   :  { %v463_v17 = vmul.f32 %v454_v7, %v443_v14  ;;  %v464_v18 = vmul.f32 %v458_v8, %v444_v15 }
 0x240   :  { %v435_v16 = vadd.f32 1e-05, %v431_v11 }
 0x241   :  { %v483_v19 = vadd.f32 %v474_v12, %v463_v17  ;;  %v484_v20 = vadd.f32 %v478_v13, %v464_v18 }
 0x242   :  { %658 = vrsqrt.f32 %v435_v16 }
 0x243   :  { %v562_v21 = vpack.c.bf16 %v484_v20, %v483_v19 }
 0x245   :  { %514 = vst [vmem:[%s867_s6 + $0x8] sm:$0xff] %v562_v21 }
 0x248   :  { %v655_v22 = vpop.eup %654 }
 0x249   :  { %v447_v23 = vmul.f32 %v655_v22, %v405_v39  ;;  %v448_v24 = vmul.f32 %v655_v22, %v406_v40 }
 0x24b   :  { %v657_v25 = vpop.eup %656  ;;  %v467_v41 = vmul.f32 %v454_v7, %v447_v23  ;;  %v468_v26 = vmul.f32 %v458_v8, %v448_v24 }
 0x24c   :  { %v441_v43 = vmul.f32 %v657_v25, %v399_v49  ;;  %v442_v27 = vmul.f32 %v657_v25, %v400_v50 }
 0x24d   :  { %v487_v28 = vadd.f32 %v474_v12, %v467_v41  ;;  %v488_v29 = vadd.f32 %v478_v13, %v468_v26 }
 0x24e   :  { %v461_v30 = vmul.f32 %v454_v7, %v441_v43  ;;  %v462_v31 = vmul.f32 %v458_v8, %v442_v27 }
 0x24f   :  { %v659_v32 = vpop.eup %658  ;;  %v564_v33 = vpack.c.bf16 %v488_v29, %v487_v28 }
 0x250   :  { %v481_v34 = vadd.f32 %v474_v12, %v461_v30  ;;  %v482_v35 = vadd.f32 %v478_v13, %v462_v31  ;;  %v445_v36 = vmul.f32 %v659_v32, %v827_v47  ;;  %v446_v37 = vmul.f32 %v659_v32, %v829_v48 }
 0x251   :  { %516 = vst [vmem:[%s867_s6 + $0x18] sm:$0x11] %v564_v33 }
 0x252   :  { %v561_v38 = vpack.c.bf16 %v482_v35, %v481_v34  ;;  %v465_v39 = vmul.f32 %v454_v7, %v445_v36  ;;  %v466_v40 = vmul.f32 %v458_v8, %v446_v37 }
 0x254   :  { %513 = vst [vmem:[%s867_s6] sm:$0xff] %v561_v38  ;;  %v485_v42 = vadd.f32 %v474_v12, %v465_v39  ;;  %v486_v44 = vadd.f32 %v478_v13, %v466_v40 }
 0x256   :  { %v563_v45 = vpack.c.bf16 %v486_v44, %v485_v42 }
 0x258   :  { %515 = vst [vmem:[%s867_s6 + $0x10] sm:$0xff] %v563_v45 }

// kernel: roberta_forward.14
= control target key start
LH: loop header
LB: loop body
LE: loop exit
PB: predicated region body
PF: predicated region fallthrough
CT: control target
= control target key end

     0   :  { %v1351_v7 = vmov 0.0   ;;  %s1738_s1 = inlined_call_operand.vmem [shape: bf16[256,768], index: 1, kind: input, shape index: {}]   ;;  %s1739_s0 = inlined_call_operand.vmem [shape: bf16[26,256], index: 0, kind: input, shape index: {}]   ;;  %s1740_s2 = inlined_call_operand.vmem [shape: f32[1,768], index: 2, kind: input, shape index: {}]   ;;  %s1741_s3 = inlined_call_operand.vmem [shape: bf16[26,768], index: 3, kind: output, shape index: {}]  }
   0x1   :  { %v1201_v0 = vld [vmem:[%s1738_s1 + $0x154] ss:$24 sps:$4 sm:$0xff]   ;;  %v1205_v2 = vld [vmem:[%s1738_s1 + $0x150] ss:$24 sps:$4 sm:$0xff]   ;;  %v1207_v4 = vld [vmem:[%s1738_s1 + $0x124] ss:$24 sps:$4 sm:$0xff]  }
   0x2   :  { %v1203_v1 = vld [vmem:[%s1738_s1 + $0x15c] ss:$24 sps:$4 sm:$0xff]   ;;  %666 = vmatprep.subr.bf16.mxu0 %v1201_v0  ;;  %v1206_v3 = vld [vmem:[%s1738_s1 + $0x158] ss:$24 sps:$4 sm:$0xff]   ;;  %v1209_v5 = vld [vmem:[%s1738_s1 + $0x12c] ss:$24 sps:$4 sm:$0xff]  }
   0x3   :  { %719 = vmatprep.subr.bf16.mxu1 %v1203_v1  ;;  %667 = vmatpush1.bf16.msra.mxu0 %v1205_v2  ;;  %v1211_v6 = vld [vmem:[%s1738_s1 + $0x120] ss:$24 sps:$4 sm:$0xff]   ;;  %36 = vst [vmem:[#allocation2 + $0x30] sm:$0x3] %v1351_v7  ;;  %37 = vst [vmem:[#allocation2 + $0x58] sm:$0x3] %v1351_v7 }
   0x4   :  { %720 = vmatpush1.bf16.msra.mxu1 %v1206_v3  ;;  %38 = vst [vmem:[#allocation2 + $0x80] sm:$0x3] %v1351_v7  ;;  %39 = vst [vmem:[#allocation2 + $0xb8] sm:$0x3] %v1351_v7  ;;  %668 = vmatprep.subr.bf16.mxu0 %v1207_v4  ;;  %v1212_v8 = vld [vmem:[%s1738_s1 + $0x128] ss:$24 sps:$4 sm:$0xff]  }
   0x5   :  { %40 = vst [vmem:[#allocation2 + $0x20] sm:$0x3] %v1351_v7  ;;  %41 = vst [vmem:[#allocation2 + $0x8] sm:$0x3] %v1351_v7  ;;  %721 = vmatprep.subr.bf16.mxu1 %v1209_v5  ;;  %v1213_v9 = vld [vmem:[%s1738_s1 + $0xf4] ss:$24 sps:$4 sm:$0xff]  }
   0x6   :  { %v1215_v10 = vld [vmem:[%s1738_s1 + $0xfc] ss:$24 sps:$4 sm:$0xff]   ;;  %v1217_v11 = vld [vmem:[%s1738_s1 + $0xf0] ss:$24 sps:$4 sm:$0xff]   ;;  %v1221_v14 = vld [vmem:[%s1738_s1 + $0xcc] ss:$24 sps:$4 sm:$0xff]  }
   0x7   :  { %v1218_v12 = vld [vmem:[%s1738_s1 + $0xf8] ss:$24 sps:$4 sm:$0xff]   ;;  %669 = vmatpush1.bf16.msra.mxu0 %v1211_v6  ;;  %v1219_v13 = vld [vmem:[%s1738_s1 + $0xc4] ss:$24 sps:$4 sm:$0xff]   ;;  %v1224_v16 = vld [vmem:[%s1738_s1 + $0xc8] ss:$24 sps:$4 sm:$0xff]  }
   0x8   :  { %722 = vmatpush1.bf16.msra.mxu1 %v1212_v8  ;;  %670 = vmatprep.subr.bf16.mxu0 %v1213_v9  ;;  %v1223_v15 = vld [vmem:[%s1738_s1 + $0xc0] ss:$24 sps:$4 sm:$0xff]   ;;  %v1225_v17 = vld [vmem:[%s1738_s1 + $0x94] ss:$24 sps:$4 sm:$0xff]   ;;  %v1229_v19 = vld [vmem:[%s1738_s1 + $0x90] ss:$24 sps:$4 sm:$0xff]  }
   0x9   :  { %723 = vmatprep.subr.bf16.mxu1 %v1215_v10  ;;  %v1227_v18 = vld [vmem:[%s1738_s1 + $0x9c] ss:$24 sps:$4 sm:$0xff]   ;;  %v1230_v20 = vld [vmem:[%s1738_s1 + $0x98] ss:$24 sps:$4 sm:$0xff]   ;;  %v1233_v22 = vld [vmem:[%s1738_s1 + $0x6c] ss:$24 sps:$4 sm:$0xff]  }
   0xa   :  { %v1231_v21 = vld [vmem:[%s1738_s1 + $0x64] ss:$24 sps:$4 sm:$0xff]   ;;  %v1235_v23 = vld [vmem:[%s1738_s1 + $0x60] ss:$24 sps:$4 sm:$0xff]   ;;  %v1237_v25 = vld [vmem:[%s1738_s1 + $0x34] ss:$24 sps:$4 sm:$0xff]  }
   0xb   :  { %671 = vmatpush1.bf16.msra.mxu0 %v1217_v11  ;;  %v1236_v24 = vld [vmem:[%s1738_s1 + $0x68] ss:$24 sps:$4 sm:$0xff]   ;;  %v1239_v26 = vld [vmem:[%s1738_s1 + $0x3c] ss:$24 sps:$4 sm:$0xff]   ;;  %v1242_v28 = vld [vmem:[%s1738_s1 + $0x38] ss:$24 sps:$4 sm:$0xff]  }
   0xc   :  { %724 = vmatpush1.bf16.msra.mxu1 %v1218_v12  ;;  %672 = vmatprep.subr.bf16.mxu0 %v1219_v13  ;;  %v1241_v27 = vld [vmem:[%s1738_s1 + $0x30] ss:$24 sps:$4 sm:$0xff]   ;;  %v1243_v29 = vld [vmem:[%s1738_s1 + $0x4] ss:$24 sps:$4 sm:$0xff]   ;;  %v1247_v31 = vld [vmem:[%s1738_s1] ss:$24 sps:$4 sm:$0xff]  }
   0xd   :  { %725 = vmatprep.subr.bf16.mxu1 %v1221_v14  ;;  %v1245_v30 = vld [vmem:[%s1738_s1 + $0xc] ss:$24 sps:$4 sm:$0xff]   ;;  %v1248_v32 = vld [vmem:[%s1738_s1 + $0x8] ss:$24 sps:$4 sm:$0xff]   ;;  %v1251_v34 = vld [vmem:[%s1738_s1 + $0x2dc] ss:$24 sps:$4 sm:$0xff]  }
   0xe   :  { %v1249_v33 = vld [vmem:[%s1738_s1 + $0x2d4] ss:$24 sps:$4 sm:$0xff]   ;;  %v1253_v35 = vld [vmem:[%s1738_s1 + $0x2d0] ss:$24 sps:$4 sm:$0xff]   ;;  %v1255_v37 = vld [vmem:[%s1738_s1 + $0x2a4] ss:$24 sps:$4 sm:$0xff]  }
   0xf   :  { %673 = vmatpush1.bf16.msra.mxu0 %v1223_v15  ;;  %v1254_v36 = vld [vmem:[%s1738_s1 + $0x2d8] ss:$24 sps:$4 sm:$0xff]   ;;  %v1257_v38 = vld [vmem:[%s1738_s1 + $0x2ac] ss:$24 sps:$4 sm:$0xff]   ;;  %v1260_v40 = vld [vmem:[%s1738_s1 + $0x2a8] ss:$24 sps:$4 sm:$0xff]  }
  0x10   :  { %726 = vmatpush1.bf16.msra.mxu1 %v1224_v16  ;;  %674 = vmatprep.subr.bf16.mxu0 %v1225_v17  ;;  %v1259_v39 = vld [vmem:[%s1738_s1 + $0x2a0] ss:$24 sps:$4 sm:$0xff]   ;;  %v1261_v41 = vld [vmem:[%s1738_s1 + $0x274] ss:$24 sps:$4 sm:$0xff]   ;;  %v1265_v43 = vld [vmem:[%s1738_s1 + $0x270] ss:$24 sps:$4 sm:$0xff]  }
  0x11   :  { %727 = vmatprep.subr.bf16.mxu1 %v1227_v18  ;;  %v1263_v42 = vld [vmem:[%s1738_s1 + $0x27c] ss:$24 sps:$4 sm:$0xff]   ;;  %v1266_v44 = vld [vmem:[%s1738_s1 + $0x278] ss:$24 sps:$4 sm:$0xff]   ;;  %v1269_v46 = vld [vmem:[%s1738_s1 + $0x24c] ss:$24 sps:$4 sm:$0xff]  }
  0x12   :  { %v1267_v45 = vld [vmem:[%s1738_s1 + $0x244] ss:$24 sps:$4 sm:$0xff]   ;;  %v1271_v47 = vld [vmem:[%s1738_s1 + $0x240] ss:$24 sps:$4 sm:$0xff]   ;;  %v1273_v50 = vld [vmem:[%s1738_s1 + $0x214] ss:$24 sps:$4 sm:$0xff]  }
  0x13   :  { %675 = vmatpush1.bf16.msra.mxu0 %v1229_v19  ;;  %v1272_v48 = vld [vmem:[%s1738_s1 + $0x248] ss:$24 sps:$4 sm:$0xff]   ;;  %v1519_v49 = vld [vmem:[%s1739_s0 + $0x4] ss:$8 sps:$4 sm:$0xff]   ;;  %v1275_v51 = vld [vmem:[%s1738_s1 + $0x21c] ss:$24 sps:$4 sm:$0xff]  }
  0x14   :  { %728 = vmatpush1.bf16.msra.mxu1 %v1230_v20  ;;  %676 = vmatprep.subr.bf16.mxu0 %v1231_v21  ;;  %v1277_v52 = vld [vmem:[%s1738_s1 + $0x210] ss:$24 sps:$4 sm:$0xff]   ;;  %v1279_v54 = vld [vmem:[%s1738_s1 + $0x1e4] ss:$24 sps:$4 sm:$0xff]   ;;  %v1283_v56 = vld [vmem:[%s1738_s1 + $0x1e0] ss:$24 sps:$4 sm:$0xff]  }
  0x15   :  { %729 = vmatprep.subr.bf16.mxu1 %v1233_v22  ;;  %698 = vmatprep.mubr.bf16.mxu0 %v1519_v49  ;;  %v1278_v53 = vld [vmem:[%s1738_s1 + $0x218] ss:$24 sps:$4 sm:$0xff]   ;;  %v1281_v55 = vld [vmem:[%s1738_s1 + $0x1ec] ss:$24 sps:$4 sm:$0xff]   ;;  %v1284_v57 = vld [vmem:[%s1738_s1 + $0x1e8] ss:$24 sps:$4 sm:$0xff]  }
  0x16   :  { %751 = vmatprep.mubr.bf16.mxu1 %v1519_v49  ;;  %v1285_v58 = vld [vmem:[%s1738_s1 + $0x1b4] ss:$24 sps:$4 sm:$0xff]   ;;  %v1289_v60 = vld [vmem:[%s1738_s1 + $0x1b0] ss:$24 sps:$4 sm:$0xff]   ;;  %v1291_v62 = vld [vmem:[%s1738_s1 + $0x184] ss:$24 sps:$4 sm:$0xff]  }
  0x17   :  { %677 = vmatpush1.bf16.msra.mxu0 %v1235_v23  ;;  %v1287_v59 = vld [vmem:[%s1738_s1 + $0x1bc] ss:$24 sps:$4 sm:$0xff]   ;;  %v1290_v61 = vld [vmem:[%s1738_s1 + $0x1b8] ss:$24 sps:$4 sm:$0xff]   ;;  %v1293_v63 = vld [vmem:[%s1738_s1 + $0x18c] ss:$24 sps:$4 sm:$0xff]  }
  0x18   :  { %730 = vmatpush1.bf16.msra.mxu1 %v1236_v24  ;;  %678 = vmatprep.subr.bf16.mxu0 %v1237_v25  ;;  %v1295_v0 = vld [vmem:[%s1738_s1 + $0x180] ss:$24 sps:$4 sm:$0xff]   ;;  %v1302_v2 = vld [vmem:[%s1738_s1 + $0x164] ss:$24 sps:$4 sm:$0xff]   ;;  %v1305_v5 = vld [vmem:[%s1738_s1 + $0x134] ss:$24 sps:$4 sm:$0xff]  }
  0x19   :  { %731 = vmatprep.subr.bf16.mxu1 %v1239_v26  ;;  %v1296_v1 = vld [vmem:[%s1738_s1 + $0x188] ss:$24 sps:$4 sm:$0xff]   ;;  %v1339_v6 = vld [vmem:[%s1739_s0 + $0x14] ss:$8 sps:$4 sm:$0x1f]  }
  0x1a   :  { %v1577_v3 = vld [vmem:[%s1739_s0] ss:$8 sps:$4 sm:$0xff]   ;;  %v1308_v8 = vld [vmem:[%s1738_s1 + $0x104] ss:$24 sps:$4 sm:$0xff]   ;;  %v1311_v11 = vld [vmem:[%s1738_s1 + $0xd4] ss:$24 sps:$4 sm:$0xff]  }
  0x1b   :  { %679 = vmatpush1.bf16.msra.mxu0 %v1241_v27  ;;  %v1300_v4 = vld [vmem:[%s1738_s1 + $0x160] ss:$24 sps:$4 sm:$0xff]   ;;  %v1303_v7 = vld [vmem:[%s1738_s1 + $0x130] ss:$24 sps:$4 sm:$0xff]   ;;  %v1314_v13 = vld [vmem:[%s1738_s1 + $0xa4] ss:$24 sps:$4 sm:$0xff]  }
  0x1c   :  { %732 = vmatpush1.bf16.msra.mxu1 %v1242_v28  ;;  %680 = vmatprep.subr.bf16.mxu0 %v1243_v29  ;;  %v1599_v9 = vld [vmem:[%s1739_s0 + $0x10] ss:$8 sps:$4 sm:$0x1f]   ;;  %v1317_v15 = vld [vmem:[%s1738_s1 + $0x74] ss:$24 sps:$4 sm:$0xff]  }
  0x1d   :  { %733 = vmatprep.subr.bf16.mxu1 %v1245_v30  ;;  %v1306_v10 = vld [vmem:[%s1738_s1 + $0x100] ss:$24 sps:$4 sm:$0xff]   ;;  %v1309_v12 = vld [vmem:[%s1738_s1 + $0xd0] ss:$24 sps:$4 sm:$0xff]   ;;  %v1320_v17 = vld [vmem:[%s1738_s1 + $0x44] ss:$24 sps:$4 sm:$0xff]  }
  0x1e   :  { %v1312_v14 = vld [vmem:[%s1738_s1 + $0xa0] ss:$24 sps:$4 sm:$0xff]   ;;  %v1315_v16 = vld [vmem:[%s1738_s1 + $0x70] ss:$24 sps:$4 sm:$0xff]   ;;  %v1323_v19 = vld [vmem:[%s1738_s1 + $0x14] ss:$24 sps:$4 sm:$0xff]  }
  0x1f   :  { %681 = vmatpush1.bf16.msra.mxu0 %v1247_v31  ;;  %v1318_v18 = vld [vmem:[%s1738_s1 + $0x40] ss:$24 sps:$4 sm:$0xff]   ;;  %v1321_v20 = vld [vmem:[%s1738_s1 + $0x10] ss:$24 sps:$4 sm:$0xff]   ;;  %v1326_v21 = vld [vmem:[%s1738_s1 + $0x2e4] ss:$24 sps:$4 sm:$0xff]  }
  0x20   :  { %734 = vmatpush1.bf16.msra.mxu1 %v1248_v32  ;;  %682 = vmatprep.subr.bf16.mxu0 %v1249_v33  ;;  %v1324_v22 = vld [vmem:[%s1738_s1 + $0x2e0] ss:$24 sps:$4 sm:$0xff]   ;;  %v1329_v23 = vld [vmem:[%s1738_s1 + $0x2b4] ss:$24 sps:$4 sm:$0xff]   ;;  %v1327_v24 = vld [vmem:[%s1738_s1 + $0x2b0] ss:$24 sps:$4 sm:$0xff]  }
  0x21   :  { %735 = vmatprep.subr.bf16.mxu1 %v1251_v34  ;;  %v1332_v25 = vld [vmem:[%s1738_s1 + $0x284] ss:$24 sps:$4 sm:$0xff]   ;;  %v1330_v26 = vld [vmem:[%s1738_s1 + $0x280] ss:$24 sps:$4 sm:$0xff]   ;;  %v1335_v27 = vld [vmem:[%s1738_s1 + $0x254] ss:$24 sps:$4 sm:$0xff]  }
  0x22   :  { %v1333_v28 = vld [vmem:[%s1738_s1 + $0x250] ss:$24 sps:$4 sm:$0xff]   ;;  %v1338_v29 = vld [vmem:[%s1738_s1 + $0x224] ss:$24 sps:$4 sm:$0xff]   ;;  %v1336_v30 = vld [vmem:[%s1738_s1 + $0x220] ss:$24 sps:$4 sm:$0xff]  }
  0x23   :  { %683 = vmatpush2.bf16.msra.mxu0 %v1253_v35  ;;  %v1344_v31 = vld [vmem:[%s1738_s1 + $0x1f4] ss:$24 sps:$4 sm:$0xff]   ;;  %v1342_v32 = vld [vmem:[%s1738_s1 + $0x1f0] ss:$24 sps:$4 sm:$0xff]   ;;  %v1347_v33 = vld [vmem:[%s1738_s1 + $0x1c4] ss:$24 sps:$4 sm:$0xff]  }
  0x24   :  { %736 = vmatpush2.bf16.msra.mxu1 %v1254_v36  ;;  %684 = vmatprep.subr.bf16.mxu0 %v1255_v37  ;;  %v1345_v34 = vld [vmem:[%s1738_s1 + $0x1c0] ss:$24 sps:$4 sm:$0xff]   ;;  %v1350_v35 = vld [vmem:[%s1738_s1 + $0x194] ss:$24 sps:$4 sm:$0xff]   ;;  %v1348_v36 = vld [vmem:[%s1738_s1 + $0x190] ss:$24 sps:$4 sm:$0xff]   ;;  %v902_v37 = vlaneseq }
  0x25   :  { %737 = vmatprep.subr.bf16.mxu1 %v1257_v38 }
  0x26   :  { %v903_v38 = vshrl.u32 %v902_v37, 7 }
  0x27   :  { %685 = vmatpush2.bf16.msra.mxu0 %v1259_v39 }
  0x28   :  { %738 = vmatpush2.bf16.msra.mxu1 %v1260_v40  ;;  %686 = vmatprep.subr.bf16.mxu0 %v1261_v41  ;;  %v920_v39 = vsub.s32 4, %v903_v38  ;;  %v900_v40 = vld [vmem:[%s1740_s2] sm:$0x3f] }
  0x29   :  { %739 = vmatprep.subr.bf16.mxu1 %v1263_v42  ;;  %v924_v42 = vsub.s32 5, %v903_v38 }
  0x2a   :  { %v1690_v41 = vrot.slane %v900_v40, %v920_v39 }
  0x2b   :  { %687 = vmatpush2.bf16.msra.mxu0 %v1265_v43  ;;  %v1692_v43 = vrot.slane %v900_v40, %v924_v42 }
  0x2c   :  { %740 = vmatpush2.bf16.msra.mxu1 %v1266_v44  ;;  %688 = vmatprep.subr.bf16.mxu0 %v1267_v45  ;;  %v904_v44 = vsub.s32 0, %v903_v38  ;;  %v912_v45 = vsub.s32 2, %v903_v38 }
  0x2d   :  { %741 = vmatprep.subr.bf16.mxu1 %v1269_v46  ;;  %v908_v46 = vsub.s32 1, %v903_v38 }
  0x2f   :  { %689 = vmatpush2.bf16.msra.mxu0 %v1271_v47  ;;  %v916_v47 = vsub.s32 3, %v903_v38 }
  0x30   :  { %742 = vmatpush2.bf16.msra.mxu1 %v1272_v48  ;;  %690 = vmatprep.subr.bf16.mxu0 %v1273_v50  ;;  %v905_v48 = vrot.slane %v900_v40, %v904_v44 }
  0x31   :  { %743 = vmatprep.subr.bf16.mxu1 %v1275_v51 }
  0x33   :  { %691 = vmatpush2.bf16.msra.mxu0 %v1277_v52  ;;  %v909_v52 = vrot.slane %v900_v40, %v908_v46  ;;  %v64_v46 = vld [vmem:[#allocation2 + $0x20] sm:$0x3] }
  0x34   :  { %744 = vmatpush2.bf16.msra.mxu1 %v1278_v53  ;;  %692 = vmatprep.subr.bf16.mxu0 %v1279_v54  ;;  %v917_v53 = vrot.slane %v900_v40, %v916_v47 }
  0x35   :  { %745 = vmatprep.subr.bf16.mxu1 %v1281_v55 }
  0x37   :  { %693 = vmatpush2.bf16.msra.mxu0 %v1283_v56 }
  0x38   :  { %746 = vmatpush2.bf16.msra.mxu1 %v1284_v57  ;;  %694 = vmatprep.subr.bf16.mxu0 %v1285_v58 }
  0x39   :  { %747 = vmatprep.subr.bf16.mxu1 %v1287_v59 }
  0x3b   :  { %695 = vmatpush2.bf16.msra.mxu0 %v1289_v60 }
  0x3c   :  { %748 = vmatpush2.bf16.msra.mxu1 %v1290_v61  ;;  %696 = vmatprep.subr.bf16.mxu0 %v1291_v62 }
  0x3d   :  { %749 = vmatprep.subr.bf16.mxu1 %v1293_v63 }
  0x3f   :  { %697 = vmatpush2.bf16.msra.mxu0 %v1295_v0 }
  0x40   :  { %750 = vmatpush2.bf16.msra.mxu1 %v1296_v1  ;;  %772 = vmatprep.subr.bf16.mxu0 %v1302_v2 }
  0x41   :  { %1168 = vmatprep.subr.bf16.mxu1 %v1302_v2 }
  0x42   :  { %699 = vmatmul.mubr.bf16.vlgmr.msra.gmra.mxu0 %v1577_v3 }
  0x43   :  { %752 = vmatmul.mubr.bf16.vlgmr.msra.gmra.mxu1 %v1577_v3  ;;  %773 = vmatpush1.bf16.msra.mxu0 %v1300_v4 }
  0x44   :  { %1184 = vmatpush1.bf16.msra.mxu1 %v1300_v4  ;;  %774 = vmatprep.subr.bf16.mxu0 %v1305_v5 }
  0x45   :  { %1169 = vmatprep.subr.bf16.mxu1 %v1305_v5  ;;  %708 = vmatprep.mubr.bf16.mxu0 %v1339_v6 }
  0x46   :  { %761 = vmatprep.mubr.bf16.mxu1 %v1339_v6 }
  0x47   :  { %775 = vmatpush1.bf16.msra.mxu0 %v1303_v7 }
  0x48   :  { %1185 = vmatpush1.bf16.msra.mxu1 %v1303_v7  ;;  %776 = vmatprep.subr.bf16.mxu0 %v1308_v8 }
  0x49   :  { %1170 = vmatprep.subr.bf16.mxu1 %v1308_v8 }
  0x4a   :  { %709 = vmatmul.mubr.bf16.gmra.mxu0 %v1599_v9 }
  0x4b   :  { %762 = vmatmul.mubr.bf16.gmra.mxu1 %v1599_v9  ;;  %777 = vmatpush1.bf16.msra.mxu0 %v1306_v10 }
  0x4c   :  { %1186 = vmatpush1.bf16.msra.mxu1 %v1306_v10  ;;  %778 = vmatprep.subr.bf16.mxu0 %v1311_v11  ;;  %v60_v10 = vld [vmem:[#allocation2 + $0x30] sm:$0x3] }
  0x4d   :  { %1171 = vmatprep.subr.bf16.mxu1 %v1311_v11  ;;  %804 = vmatprep.mubr.bf16.mxu0 %v1519_v49  ;;  %v913_v49 = vrot.slane %v900_v40, %v912_v45  ;;  %v62_v11 = vld [vmem:[#allocation2 + $0x80] sm:$0x3] }
  0x4e   :  { %814 = vmatprep.mubr.bf16.mxu1 %v1339_v6 }
  0x4f   :  { %779 = vmatpush1.bf16.msra.mxu0 %v1309_v12 }
  0x50   :  { %1187 = vmatpush1.bf16.msra.mxu1 %v1309_v12  ;;  %780 = vmatprep.subr.bf16.mxu0 %v1314_v13 }
  0x51   :  { %1172 = vmatprep.subr.bf16.mxu1 %v1314_v13 }
  0x53   :  { %781 = vmatpush1.bf16.msra.mxu0 %v1312_v14 }
  0x54   :  { %1188 = vmatpush1.bf16.msra.mxu1 %v1312_v14  ;;  %782 = vmatprep.subr.bf16.mxu0 %v1317_v15 }
  0x55   :  { %1173 = vmatprep.subr.bf16.mxu1 %v1317_v15 }
  0x57   :  { %783 = vmatpush1.bf16.msra.mxu0 %v1315_v16 }
  0x58   :  { %1189 = vmatpush1.bf16.msra.mxu1 %v1315_v16  ;;  %784 = vmatprep.subr.bf16.mxu0 %v1320_v17 }
  0x59   :  { %1174 = vmatprep.subr.bf16.mxu1 %v1320_v17 }
  0x5b   :  { %785 = vmatpush1.bf16.msra.mxu0 %v1318_v18 }
  0x5c   :  { %1190 = vmatpush1.bf16.msra.mxu1 %v1318_v18  ;;  %786 = vmatprep.subr.bf16.mxu0 %v1323_v19  ;;  %v61_v18 = vld [vmem:[#allocation2 + $0x58] sm:$0x3] }
  0x5d   :  { %1175 = vmatprep.subr.bf16.mxu1 %v1323_v19  ;;  %v63_v19 = vld [vmem:[#allocation2 + $0xb8] sm:$0x3] }
  0x5f   :  { %787 = vmatpush1.bf16.msra.mxu0 %v1321_v20 }
  0x60   :  { %1191 = vmatpush1.bf16.msra.mxu1 %v1321_v20  ;;  %788 = vmatprep.subr.bf16.mxu0 %v1326_v21 }
  0x61   :  { %1176 = vmatprep.subr.bf16.mxu1 %v1326_v21 }
  0x63   :  { %789 = vmatpush2.bf16.msra.mxu0 %v1324_v22 }
  0x64   :  { %1192 = vmatpush2.bf16.msra.mxu1 %v1324_v22  ;;  %790 = vmatprep.subr.bf16.mxu0 %v1329_v23 }
  0x65   :  { %1177 = vmatprep.subr.bf16.mxu1 %v1329_v23 }
  0x67   :  { %791 = vmatpush2.bf16.msra.mxu0 %v1327_v24 }
  0x68   :  { %1193 = vmatpush2.bf16.msra.mxu1 %v1327_v24  ;;  %792 = vmatprep.subr.bf16.mxu0 %v1332_v25 }
  0x69   :  { %1178 = vmatprep.subr.bf16.mxu1 %v1332_v25 }
  0x6b   :  { %793 = vmatpush2.bf16.msra.mxu0 %v1330_v26 }
  0x6c   :  { %1194 = vmatpush2.bf16.msra.mxu1 %v1330_v26  ;;  %794 = vmatprep.subr.bf16.mxu0 %v1335_v27 }
  0x6d   :  { %1179 = vmatprep.subr.bf16.mxu1 %v1335_v27 }
  0x6f   :  { %795 = vmatpush2.bf16.msra.mxu0 %v1333_v28 }
  0x70   :  { %1195 = vmatpush2.bf16.msra.mxu1 %v1333_v28  ;;  %796 = vmatprep.subr.bf16.mxu0 %v1338_v29 }
  0x71   :  { %1180 = vmatprep.subr.bf16.mxu1 %v1338_v29 }
  0x73   :  { %797 = vmatpush2.bf16.msra.mxu0 %v1336_v30 }
  0x74   :  { %1196 = vmatpush2.bf16.msra.mxu1 %v1336_v30  ;;  %798 = vmatprep.subr.bf16.mxu0 %v1344_v31 }
  0x75   :  { %1181 = vmatprep.subr.bf16.mxu1 %v1344_v31 }
  0x77   :  { %799 = vmatpush2.bf16.msra.mxu0 %v1342_v32 }
  0x78   :  { %1197 = vmatpush2.bf16.msra.mxu1 %v1342_v32  ;;  %800 = vmatprep.subr.bf16.mxu0 %v1347_v33 }
  0x79   :  { %1182 = vmatprep.subr.bf16.mxu1 %v1347_v33 }
  0x7b   :  { %801 = vmatpush2.bf16.msra.mxu0 %v1345_v34 }
  0x7c   :  { %1198 = vmatpush2.bf16.msra.mxu1 %v1345_v34  ;;  %802 = vmatprep.subr.bf16.mxu0 %v1350_v35 }
  0x7d   :  { %1183 = vmatprep.subr.bf16.mxu1 %v1350_v35 }
  0x7f   :  { %803 = vmatpush2.bf16.msra.mxu0 %v1348_v36 }
  0x80   :  { %1199 = vmatpush2.bf16.msra.mxu1 %v1348_v36 }
  0x82   :  { %805 = vmatmul.mubr.bf16.vlgmr.msra.gmra.mxu0 %v1577_v3 }
  0x83   :  { %815 = vmatmul.mubr.bf16.vlgmr.msra.gmra.mxu1 %v1599_v9 }
 0x102   :  { %v700_v50 = vpop.f32.mrf.mxu0 }
 0x103   :  { %v753_v51 = vpop.f32.mrf.mxu1  ;;  %v932_v56 = vadd.f32 %v905_v48, %v700_v50 }
 0x104   :  { %v702_v54 = vpop.f32.mrf.mxu0  ;;  %v934_v57 = vadd.f32 %v913_v49, %v753_v51 }
 0x105   :  { %v755_v55 = vpop.f32.mrf.mxu1  ;;  %v933_v60 = vadd.f32 %v909_v52, %v702_v54  ;;  %v65_v54 = vld [vmem:[#allocation2 + $0x8] sm:$0x3] }
 0x106   :  { %v704_v58 = vpop.f32.mrf.mxu0  ;;  %v935_v61 = vadd.f32 %v917_v53, %v755_v55 }
 0x107   :  { %v757_v59 = vpop.f32.mrf.mxu1  ;;  %v1156_v0 = vpack.c.bf16 %v933_v60, %v932_v56  ;;  %v938_v2 = vadd.f32 %v905_v48, %v704_v58 }
 0x108   :  { %v706_v62 = vpop.f32.mrf.mxu0  ;;  %v1157_v1 = vpack.c.bf16 %v935_v61, %v934_v57  ;;  %v940_v5 = vadd.f32 %v913_v49, %v757_v59 }
 0x109   :  { %v759_v63 = vpop.f32.mrf.mxu1  ;;  %1028 = vst [vmem:[%s1741_s3] sm:$0xff] %v1156_v0  ;;  %v939_v6 = vadd.f32 %v909_v52, %v706_v62 }
 0x10a   :  { %v710_v3 = vpop.f32.mrf.mxu0  ;;  %1029 = vst [vmem:[%s1741_s3 + $0x8] sm:$0xff] %v1157_v1  ;;  %v941_v7 = vadd.f32 %v917_v53, %v759_v63 }
 0x10b   :  { %v763_v4 = vpop.f32.mrf.mxu1  ;;  %v944_v12 = vadd.f32 %v905_v48, %v710_v3  ;;  %v1159_v14 = vpack.c.bf16 %v939_v6, %v938_v2 }
 0x10c   :  { %v712_v8 = vpop.f32.mrf.mxu0  ;;  %v946_v13 = vadd.f32 %v913_v49, %v763_v4  ;;  %v1160_v15 = vpack.c.bf16 %v941_v7, %v940_v5 }
 0x10d   :  { %v765_v9 = vpop.f32.mrf.mxu1  ;;  %v945_v20 = vadd.f32 %v909_v52, %v712_v8  ;;  %1031 = vst [vmem:[%s1741_s3 + $0x18] sm:$0xff] %v1159_v14 }
 0x10e   :  { %v714_v16 = vpop.f32.mrf.mxu0  ;;  %v947_v21 = vadd.f32 %v917_v53, %v765_v9  ;;  %1032 = vst [vmem:[%s1741_s3 + $0x20] sm:$0xff] %v1160_v15 }
 0x10f   :  { %v767_v17 = vpop.f32.mrf.mxu1  ;;  %v843_v22 = vadd.f32 %v714_v16, %v60_v10  ;;  %v1162_v26 = vpack.c.bf16 %v945_v20, %v944_v12 }
 0x110   :  { %v845_v23 = vadd.f32 %v767_v17, %v62_v11  ;;  %v716_v24 = vpop.f32.mrf.mxu0  ;;  %v1163_v27 = vpack.c.bf16 %v947_v21, %v946_v13 }
 0x111   :  { %v769_v25 = vpop.f32.mrf.mxu1  ;;  %867 = vst [vmem:[#allocation2 + $0x30] sm:$0x3] %v843_v22  ;;  %v844_v28 = vadd.f32 %v716_v24, %v61_v18  ;;  %1034 = vst [vmem:[%s1741_s3 + $0x30] sm:$0xff] %v1162_v26 }
 0x112   :  { %869 = vst [vmem:[#allocation2 + $0x80] sm:$0x3] %v845_v23  ;;  %v846_v29 = vadd.f32 %v769_v25, %v63_v19  ;;  %1035 = vst [vmem:[%s1741_s3 + $0x38] sm:$0xff] %v1163_v27 }
 0x113   :  { %868 = vst [vmem:[#allocation2 + $0x58] sm:$0x3] %v844_v28 }
 0x114   :  { %870 = vst [vmem:[#allocation2 + $0xb8] sm:$0x3] %v846_v29 }
 0x118   :  { %v894_v30 = vld [vmem:[#allocation2 + $0x30] sm:$0x3] }
 0x119   :  { %v896_v31 = vld [vmem:[#allocation2 + $0x80] sm:$0x3]  ;;  %v950_v32 = vadd.f32 %v905_v48, %v894_v30 }
 0x11a   :  { %v952_v33 = vadd.f32 %v913_v49, %v896_v31  ;;  %v895_v34 = vld [vmem:[#allocation2 + $0x58] sm:$0x3] }
 0x11b   :  { %v897_v35 = vld [vmem:[#allocation2 + $0xb8] sm:$0x3]  ;;  %v951_v36 = vadd.f32 %v909_v52, %v895_v34 }
 0x11c   :  { %v953_v37 = vadd.f32 %v917_v53, %v897_v35 }
 0x11d   :  { %v1165_v38 = vpack.c.bf16 %v951_v36, %v950_v32 }
 0x11e   :  { %v1166_v39 = vpack.c.bf16 %v953_v37, %v952_v33 }
 0x11f   :  { %1037 = vst [vmem:[%s1741_s3 + $0x48] sm:$0x11] %v1165_v38 }
 0x120   :  { %1038 = vst [vmem:[%s1741_s3 + $0x50] sm:$0x11] %v1166_v39 }
 0x142   :  { %v806_v40 = vpop.f32.mrf.mxu0 }
 0x143   :  { %v816_v42 = vpop.f32.mrf.mxu1  ;;  %v936_v47 = vadd.f32 %v1690_v41, %v806_v40 }
 0x144   :  { %v808_v44 = vpop.f32.mrf.mxu0  ;;  %v948_v48 = vadd.f32 %v1690_v41, %v816_v42 }
 0x145   :  { %v818_v45 = vpop.f32.mrf.mxu1  ;;  %v937_v51 = vadd.f32 %v1692_v43, %v808_v44 }
 0x146   :  { %v810_v49 = vpop.f32.mrf.mxu0  ;;  %v949_v52 = vadd.f32 %v1692_v43, %v818_v45 }
 0x147   :  { %v820_v50 = vpop.f32.mrf.mxu1  ;;  %v1158_v57 = vpack.c.bf16 %v937_v51, %v936_v47  ;;  %v942_v59 = vadd.f32 %v1690_v41, %v810_v49 }
 0x148   :  { %v847_v53 = vadd.f32 %v820_v50, %v64_v46  ;;  %v812_v55 = vpop.f32.mrf.mxu0  ;;  %v1164_v58 = vpack.c.bf16 %v949_v52, %v948_v48 }
 0x149   :  { %v822_v56 = vpop.f32.mrf.mxu1  ;;  %1030 = vst [vmem:[%s1741_s3 + $0x10] sm:$0xff] %v1158_v57  ;;  %v943_v61 = vadd.f32 %v1692_v43, %v812_v55 }
 0x14a   :  { %871 = vst [vmem:[#allocation2 + $0x20] sm:$0x3] %v847_v53  ;;  %v848_v60 = vadd.f32 %v822_v56, %v65_v54  ;;  %1036 = vst [vmem:[%s1741_s3 + $0x40] sm:$0xff] %v1164_v58 }
 0x14b   :  { %v1161_v62 = vpack.c.bf16 %v943_v61, %v942_v59 }
 0x14c   :  { %872 = vst [vmem:[#allocation2 + $0x8] sm:$0x3] %v848_v60 }
 0x14d   :  { %1033 = vst [vmem:[%s1741_s3 + $0x28] sm:$0xff] %v1161_v62 }
 0x151   :  { %v898_v63 = vld [vmem:[#allocation2 + $0x20] sm:$0x3] }
 0x152   :  { %v954_v1 = vadd.f32 %v1690_v41, %v898_v63 }
 0x153   :  { %v899_v0 = vld [vmem:[#allocation2 + $0x8] sm:$0x3] }
 0x154   :  { %v955_v2 = vadd.f32 %v1692_v43, %v899_v0 }
 0x156   :  { %v1167_v3 = vpack.c.bf16 %v955_v2, %v954_v1 }
 0x158   :  { %1039 = vst [vmem:[%s1741_s3 + $0x58] sm:$0x11] %v1167_v3 }

// kernel: roberta_forward.25
= control target key start
LH: loop header
LB: loop body
LE: loop exit
PB: predicated region body
PF: predicated region fallthrough
CT: control target
= control target key end

     0   :  { %s477_s12 = smov 0   ;;  %s505_s0 = inlined_call_operand.vmem [shape: bf16[2,13,256], index: 0, kind: input, shape index: {}]   ;;  %s506_s1 = inlined_call_operand.vmem [shape: bf16[2,13,13], index: 1, kind: input, shape index: {}]   ;;  %s507_s2 = inlined_call_operand.vmem [shape: f32[2,13,1], index: 2, kind: input, shape index: {}]   ;;  %s508_s3 = inlined_call_operand.vmem [shape: f32[2,13,256], index: 3, kind: output, shape index: {}]  }
   0x1 LB: > { %s404_s13 = sadd.s32 4294967295, %s453_s12   ;;  %p408_p0 = scmp.ge.s32.totalorder %s453_s12, 1  ;;  %s453_s12 = sphi %s477_s12, %s13_s12  }
   0x2   : > { %p157_p1 = scmp.lt.s32.totalorder %s453_s12, 3 }
   0x4   : > { %p158_p2 = pnand %p408_p0, %p157_p1 }
   0x5   : > { %p191_p3 = scmp.lt.s32.totalorder (!%p158_p2), %s404_s13, 1 }
   0x6   : > { %161 = sbr.rel (%p158_p2) target bundleno = 316 (0x13c), region = 32 }
   0xb   : > { %vm250_vm0 = vcmask 1045504   ;;  %v455_v0 = vmov 0   ;;  %s510_s13 = smov (!%p191_p3, %s404_s13), 1  ;;  %vm251_vm1 = vcmask 1046528   ;;  %v456_v1 = vmov 65535  }
   0xc   : > { %292 = vmatprep.mubr.bf16.mxu0 %v455_v0  ;;  %438 = vset.pattern.permute.xlu1 %v455_v0  ;;  %v252_v2 = vsel %vm250_vm0, 4294967295, %v456_v1  ;;  %s424_s14 = sshll.u32 %s510_s13, 3  ;;  %s423_s15 = sshll.u32 %s510_s13, 4  ;;  %vm246_vm2 = vcmask 105472  }
   0xd   : > { %s200_s18 = scalar_lea.vmem %s506_s1, %s424_s14  ;;  %s195_s21 = scalar_lea.vmem %s505_s0, %s423_s15  ;;  %v253_v3 = vsel %vm251_vm1, %v252_v2, 0 }
   0xe   : > { %v439_v4 = vld [vmem:[%s200_s18] sm:$0x7f]   ;;  %s205_s24 = scalar_lea.vmem %s507_s2, %s423_s15  ;;  %s426_s25 = sshll.u32 %s510_s13, 5 }
   0xf   : > { %v440_v5 = vld [vmem:[%s195_s21 + $0x4] ss:$8 sps:$4 sm:$0x7f]   ;;  %222 = vxpose.xlu0.c.b16.start.end [1/1] (short) (narrow) %v439_v4, 16  ;;  %s210_s28 = scalar_lea.vmem %s508_s3, %s426_s25 }
  0x10   : > { %v442_v6 = vld [vmem:[%s195_s21] ss:$8 sps:$4 sm:$0x7f]   ;;  %v258_v7 = vand.u32 %v440_v5, %v253_v3 }
  0x11   : > { %v304_v8 = vld [vmem:[%s205_s24 + $0x8] sm:$0x1f]  ;;  %v255_v9 = vand.u32 %v442_v6, %v253_v3  ;;  %v303_v10 = vld [vmem:[%s205_s24] sm:$0xff] }
  0x12   : > { %312 = vperm.xlu1 %438, %v304_v8   ;;  %274 = vmatprep.subr.bf16.mxu0 %v258_v7 }
  0x13   : > { %275 = vmatpush1.bf16.msra.mxu0 %v255_v9 }
  0x18   : > { %437 = vset.pattern.permute.xlu0 %v455_v0 }
  0x19   : > { %307 = vperm.xlu0 %437, %v303_v10  }
  0x71   : > { %v230_v11 = vpop.trf.xlu0 }
  0x72   : > { %420 = vmatmul.mubr.msk.bf16.vlgmr.msra.gmra.mxu0 %vm246_vm2, %v230_v11 }
  0x8d   : > { %v313_v13 = vpop.permute.xlu1 %312 }
  0x94   : > { %v308_v12 = vpop.permute.xlu0 %307 }
  0x95   : > { %443 = vrcp.f32 %v308_v12 }
  0x96   : > { %445 = vrcp.f32 %v313_v13 }
  0xa2   : > { %v444_v14 = vpop.eup %443 }
  0xa3   : > { %v446_v17 = vpop.eup %445 }
 0x132   : > { %v294_v15 = vpop.f32.mrf.mxu0 }
 0x133   : > { %v316_v16 = vmul.f32 %v444_v14, %v294_v15 }
 0x134   : > { %v296_v18 = vpop.f32.mrf.mxu0 }
 0x135   : > { %321 = vst [vmem:[%s210_s28] sm:$0xff] %v316_v16  ;;  %v317_v19 = vmul.f32 %v444_v14, %v296_v18 }
 0x136   : > { %v298_v20 = vpop.f32.mrf.mxu0 }
 0x137   : > { %322 = vst [vmem:[%s210_s28 + $0x8] sm:$0xff] %v317_v19  ;;  %v319_v21 = vmul.f32 %v446_v17, %v298_v20 }
 0x138   : > { %v300_v22 = vpop.f32.mrf.mxu0 }
 0x139   : > { %323 = vst [vmem:[%s210_s28 + $0x10] sm:$0x1f] %v319_v21  ;;  %v320_v23 = vmul.f32 %v446_v17, %v300_v22 }
 0x13b   : > { %324 = vst [vmem:[%s210_s28 + $0x18] sm:$0x1f] %v320_v23 }
 0x13c PF: > { %s13_s12 = sadd.s32 1, %s453_s12  }
 0x13d   : > { %p10_p4 = scmp.ge.s32.totalorder %s13_s12, 4  }
 0x13f   :  { %12 = sbr.rel (!%p10_p4) target bundleno = 1 (0x1), region = 68 }

// kernel: roberta_forward.18
= control target key start
LH: loop header
LB: loop body
LE: loop exit
PB: predicated region body
PF: predicated region fallthrough
CT: control target
= control target key end

     0   :  { %vm657_vm0 = vcmask 1041408   ;;  %s1299_s1 = inlined_call_operand.vmem [shape: bf16[512,256], index: 1, kind: input, shape index: {}]   ;;  %s1300_s0 = inlined_call_operand.vmem [shape: bf16[26,512], index: 0, kind: input, shape index: {}]   ;;  %s1301_s2 = inlined_call_operand.vmem [shape: f32[1,256], index: 2, kind: input, shape index: {}]   ;;  %s1302_s3 = inlined_call_operand.vmem [shape: bf16[26,256], index: 3, kind: input, shape index: {}]   ;;  %s1303_s4 = inlined_call_operand.vmem [shape: f32[1,256], index: 4, kind: input, shape index: {}]   ;;  %s1304_s5 = inlined_call_operand.vmem [shape: f32[1,256], index: 5, kind: input, shape index: {}]   ;;  %s1305_s6 = inlined_call_operand.vmem [shape: bf16[26,256], index: 6, kind: output, shape index: {}]  }
   0x1   :  { %v871_v0 = vld [vmem:[%s1299_s1 + $0x74] ss:$8 sps:$4 sm:$0xff]   ;;  %v875_v2 = vld [vmem:[%s1299_s1 + $0x70] ss:$8 sps:$4 sm:$0xff]   ;;  %v877_v4 = vld [vmem:[%s1299_s1 + $0x64] ss:$8 sps:$4 sm:$0xff]  }
   0x2   :  { %v873_v1 = vld [vmem:[%s1299_s1 + $0x174] ss:$8 sps:$4 sm:$0xff]   ;;  %475 = vmatprep.subr.bf16.mxu0 %v871_v0  ;;  %v876_v3 = vld [vmem:[%s1299_s1 + $0x170] ss:$8 sps:$4 sm:$0xff]   ;;  %v879_v5 = vld [vmem:[%s1299_s1 + $0x164] ss:$8 sps:$4 sm:$0xff]  }
   0x3   :  { %528 = vmatprep.subr.bf16.mxu1 %v873_v1  ;;  %476 = vmatpush1.bf16.msra.mxu0 %v875_v2  ;;  %v881_v6 = vld [vmem:[%s1299_s1 + $0x60] ss:$8 sps:$4 sm:$0xff]   ;;  %v883_v8 = vld [vmem:[%s1299_s1 + $0x54] ss:$8 sps:$4 sm:$0xff]   ;;  %v887_v10 = vld [vmem:[%s1299_s1 + $0x50] ss:$8 sps:$4 sm:$0xff]  }
   0x4   :  { %529 = vmatpush1.bf16.msra.mxu1 %v876_v3  ;;  %477 = vmatprep.subr.bf16.mxu0 %v877_v4  ;;  %v882_v7 = vld [vmem:[%s1299_s1 + $0x160] ss:$8 sps:$4 sm:$0xff]   ;;  %v885_v9 = vld [vmem:[%s1299_s1 + $0x154] ss:$8 sps:$4 sm:$0xff]   ;;  %v888_v11 = vld [vmem:[%s1299_s1 + $0x150] ss:$8 sps:$4 sm:$0xff]  }
   0x5   :  { %530 = vmatprep.subr.bf16.mxu1 %v879_v5  ;;  %v889_v12 = vld [vmem:[%s1299_s1 + $0x44] ss:$8 sps:$4 sm:$0xff]   ;;  %v893_v14 = vld [vmem:[%s1299_s1 + $0x40] ss:$8 sps:$4 sm:$0xff]   ;;  %v895_v16 = vld [vmem:[%s1299_s1 + $0x34] ss:$8 sps:$4 sm:$0xff]  }
   0x6   :  { %v891_v13 = vld [vmem:[%s1299_s1 + $0x144] ss:$8 sps:$4 sm:$0xff]   ;;  %v894_v15 = vld [vmem:[%s1299_s1 + $0x140] ss:$8 sps:$4 sm:$0xff]   ;;  %v897_v17 = vld [vmem:[%s1299_s1 + $0x134] ss:$8 sps:$4 sm:$0xff]  }
   0x7   :  { %478 = vmatpush1.bf16.msra.mxu0 %v881_v6  ;;  %v899_v18 = vld [vmem:[%s1299_s1 + $0x30] ss:$8 sps:$4 sm:$0xff]   ;;  %v901_v20 = vld [vmem:[%s1299_s1 + $0x24] ss:$8 sps:$4 sm:$0xff]   ;;  %v905_v22 = vld [vmem:[%s1299_s1 + $0x20] ss:$8 sps:$4 sm:$0xff]  }
   0x8   :  { %531 = vmatpush1.bf16.msra.mxu1 %v882_v7  ;;  %479 = vmatprep.subr.bf16.mxu0 %v883_v8  ;;  %v900_v19 = vld [vmem:[%s1299_s1 + $0x130] ss:$8 sps:$4 sm:$0xff]   ;;  %v903_v21 = vld [vmem:[%s1299_s1 + $0x124] ss:$8 sps:$4 sm:$0xff]   ;;  %v906_v23 = vld [vmem:[%s1299_s1 + $0x120] ss:$8 sps:$4 sm:$0xff]  }
   0x9   :  { %532 = vmatprep.subr.bf16.mxu1 %v885_v9  ;;  %v907_v24 = vld [vmem:[%s1299_s1 + $0x14] ss:$8 sps:$4 sm:$0xff]   ;;  %v911_v26 = vld [vmem:[%s1299_s1 + $0x10] ss:$8 sps:$4 sm:$0xff]   ;;  %v913_v28 = vld [vmem:[%s1299_s1 + $0x4] ss:$8 sps:$4 sm:$0xff]   ;;  %v610_v9 = vlaneseq }
   0xa   :  { %v909_v25 = vld [vmem:[%s1299_s1 + $0x114] ss:$8 sps:$4 sm:$0xff]   ;;  %v912_v27 = vld [vmem:[%s1299_s1 + $0x110] ss:$8 sps:$4 sm:$0xff]   ;;  %v915_v29 = vld [vmem:[%s1299_s1 + $0x104] ss:$8 sps:$4 sm:$0xff]  }
   0xb   :  { %480 = vmatpush1.bf16.msra.mxu0 %v887_v10  ;;  %v917_v30 = vld [vmem:[%s1299_s1] ss:$8 sps:$4 sm:$0xff]   ;;  %v919_v32 = vld [vmem:[%s1299_s1 + $0xf4] ss:$8 sps:$4 sm:$0xff]   ;;  %v923_v34 = vld [vmem:[%s1299_s1 + $0xf0] ss:$8 sps:$4 sm:$0xff]  }
   0xc   :  { %533 = vmatpush1.bf16.msra.mxu1 %v888_v11  ;;  %481 = vmatprep.subr.bf16.mxu0 %v889_v12  ;;  %v918_v31 = vld [vmem:[%s1299_s1 + $0x100] ss:$8 sps:$4 sm:$0xff]   ;;  %v921_v33 = vld [vmem:[%s1299_s1 + $0x1f4] ss:$8 sps:$4 sm:$0xff]   ;;  %v924_v35 = vld [vmem:[%s1299_s1 + $0x1f0] ss:$8 sps:$4 sm:$0xff]  }
   0xd   :  { %534 = vmatprep.subr.bf16.mxu1 %v891_v13  ;;  %v925_v36 = vld [vmem:[%s1299_s1 + $0xe4] ss:$8 sps:$4 sm:$0xff]   ;;  %v929_v38 = vld [vmem:[%s1299_s1 + $0xe0] ss:$8 sps:$4 sm:$0xff]   ;;  %v931_v40 = vld [vmem:[%s1299_s1 + $0xd4] ss:$8 sps:$4 sm:$0xff]  }
   0xe   :  { %v927_v37 = vld [vmem:[%s1299_s1 + $0x1e4] ss:$8 sps:$4 sm:$0xff]   ;;  %v930_v39 = vld [vmem:[%s1299_s1 + $0x1e0] ss:$8 sps:$4 sm:$0xff]   ;;  %v933_v41 = vld [vmem:[%s1299_s1 + $0x1d4] ss:$8 sps:$4 sm:$0xff]  }
   0xf   :  { %482 = vmatpush1.bf16.msra.mxu0 %v893_v14  ;;  %v935_v42 = vld [vmem:[%s1299_s1 + $0xd0] ss:$8 sps:$4 sm:$0xff]   ;;  %v937_v44 = vld [vmem:[%s1299_s1 + $0xc4] ss:$8 sps:$4 sm:$0xff]   ;;  %v941_v46 = vld [vmem:[%s1299_s1 + $0xc0] ss:$8 sps:$4 sm:$0xff]  }
  0x10   :  { %535 = vmatpush1.bf16.msra.mxu1 %v894_v15  ;;  %483 = vmatprep.subr.bf16.mxu0 %v895_v16  ;;  %v936_v43 = vld [vmem:[%s1299_s1 + $0x1d0] ss:$8 sps:$4 sm:$0xff]   ;;  %v939_v45 = vld [vmem:[%s1299_s1 + $0x1c4] ss:$8 sps:$4 sm:$0xff]   ;;  %v942_v47 = vld [vmem:[%s1299_s1 + $0x1c0] ss:$8 sps:$4 sm:$0xff]  }
  0x11   :  { %536 = vmatprep.subr.bf16.mxu1 %v897_v17  ;;  %v943_v48 = vld [vmem:[%s1299_s1 + $0xb4] ss:$8 sps:$4 sm:$0xff]   ;;  %v947_v52 = vld [vmem:[%s1299_s1 + $0xb0] ss:$8 sps:$4 sm:$0xff]   ;;  %v949_v54 = vld [vmem:[%s1299_s1 + $0xa4] ss:$8 sps:$4 sm:$0xff]  }
  0x12   :  { %v969_v49 = vld [vmem:[%s1300_s0 + $0x4] ss:$16 sps:$4 sm:$0xff]   ;;  %v972_v51 = vld [vmem:[%s1300_s0 + $0xc] ss:$16 sps:$4 sm:$0xff]   ;;  %v948_v53 = vld [vmem:[%s1299_s1 + $0x1b0] ss:$8 sps:$4 sm:$0xff]  }
  0x13   :  { %484 = vmatpush1.bf16.msra.mxu0 %v899_v18  ;;  %v945_v50 = vld [vmem:[%s1299_s1 + $0x1b4] ss:$8 sps:$4 sm:$0xff]   ;;  %507 = vmatprep.mubr.bf16.mxu0 %v969_v49  ;;  %v951_v55 = vld [vmem:[%s1299_s1 + $0x1a4] ss:$8 sps:$4 sm:$0xff]   ;;  %v953_v56 = vld [vmem:[%s1299_s1 + $0xa0] ss:$8 sps:$4 sm:$0xff]  }
  0x14   :  { %537 = vmatpush1.bf16.msra.mxu1 %v900_v19  ;;  %485 = vmatprep.subr.bf16.mxu0 %v901_v20  ;;  %v954_v57 = vld [vmem:[%s1299_s1 + $0x1a0] ss:$8 sps:$4 sm:$0xff]   ;;  %v955_v58 = vld [vmem:[%s1299_s1 + $0x94] ss:$8 sps:$4 sm:$0xff]   ;;  %v959_v60 = vld [vmem:[%s1299_s1 + $0x90] ss:$8 sps:$4 sm:$0xff]  }
  0x15   :  { %538 = vmatprep.subr.bf16.mxu1 %v903_v21  ;;  %560 = vmatprep.mubr.bf16.mxu1 %v972_v51  ;;  %v957_v59 = vld [vmem:[%s1299_s1 + $0x194] ss:$8 sps:$4 sm:$0xff]   ;;  %v960_v61 = vld [vmem:[%s1299_s1 + $0x190] ss:$8 sps:$4 sm:$0xff]   ;;  %v961_v62 = vld [vmem:[%s1299_s1 + $0x84] ss:$8 sps:$4 sm:$0xff]  }
  0x16   :  { %v963_v63 = vld [vmem:[%s1299_s1 + $0x184] ss:$8 sps:$4 sm:$0xff]   ;;  %v965_v0 = vld [vmem:[%s1299_s1 + $0x80] ss:$8 sps:$4 sm:$0xff]   ;;  %v987_v8 = vmov 0.0   ;;  %v611_v10 = vshrl.u32 %v610_v9, 7 }
  0x17   :  { %486 = vmatpush1.bf16.msra.mxu0 %v905_v22  ;;  %v966_v1 = vld [vmem:[%s1299_s1 + $0x180] ss:$8 sps:$4 sm:$0xff]   ;;  %v973_v4 = vld [vmem:[%s1300_s0 + $0x24] ss:$16 sps:$4 sm:$0x1f]  }
  0x18   :  { %539 = vmatpush1.bf16.msra.mxu1 %v906_v23  ;;  %487 = vmatprep.subr.bf16.mxu0 %v907_v24  ;;  %v967_v2 = vld [vmem:[%s1300_s0] ss:$16 sps:$4 sm:$0xff]   ;;  %v970_v3 = vld [vmem:[%s1300_s0 + $0x8] ss:$16 sps:$4 sm:$0xff]   ;;  %33 = vst [vmem:[#allocation2 + $0x28] sm:$0x3] %v987_v8 }
  0x19   :  { %540 = vmatprep.subr.bf16.mxu1 %v909_v25  ;;  %v975_v5 = vld [vmem:[%s1300_s0 + $0x2c] ss:$16 sps:$4 sm:$0x1f]   ;;  %v977_v6 = vld [vmem:[%s1300_s0 + $0x20] ss:$16 sps:$4 sm:$0x1f]  }
  0x1a   :  { %v978_v7 = vld [vmem:[%s1300_s0 + $0x28] ss:$16 sps:$4 sm:$0x1f]   ;;  %34 = vst [vmem:[#allocation2 + $0x38] sm:$0x3] %v987_v8  ;;  %v1241_v17 = vsub.s32 0, %v611_v10 }
  0x1b   :  { %488 = vmatpush1.bf16.msra.mxu0 %v911_v26  ;;  %v608_v20 = vld [vmem:[%s1301_s2] sm:$0x3]  ;;  %v1246_v21 = vsub.s32 1, %v611_v10  ;;  %v629_v23 = vld [vmem:[%s1302_s3 + $0x8] sm:$0xff] }
  0x1c   :  { %541 = vmatpush1.bf16.msra.mxu1 %v912_v27  ;;  %489 = vmatprep.subr.bf16.mxu0 %v913_v28  ;;  %v613_v27 = vrot.slane %v608_v20, %v1241_v17 }
  0x1d   :  { %542 = vmatprep.subr.bf16.mxu1 %v915_v29 }
  0x1f   :  { %490 = vmatpush1.bf16.msra.mxu0 %v917_v30  ;;  %v617_v30 = vrot.slane %v608_v20, %v1246_v21 }
  0x20   :  { %543 = vmatpush1.bf16.msra.mxu1 %v918_v31  ;;  %491 = vmatprep.subr.bf16.mxu0 %v919_v32  ;;  %v634_v31 = vunpack.c.l.bf16 %v629_v23 }
  0x21   :  { %544 = vmatprep.subr.bf16.mxu1 %v921_v33 }
  0x23   :  { %492 = vmatpush2.bf16.msra.mxu0 %v923_v34  ;;  %v635_v34 = vunpack.c.h.bf16 %v629_v23 }
  0x24   :  { %545 = vmatpush2.bf16.msra.mxu1 %v924_v35  ;;  %493 = vmatprep.subr.bf16.mxu0 %v925_v36  ;;  %v630_v35 = vld [vmem:[%s1302_s3 + $0x10] sm:$0xff] }
  0x25   :  { %546 = vmatprep.subr.bf16.mxu1 %v927_v37 }
  0x27   :  { %494 = vmatpush2.bf16.msra.mxu0 %v929_v38 }
  0x28   :  { %547 = vmatpush2.bf16.msra.mxu1 %v930_v39  ;;  %495 = vmatprep.subr.bf16.mxu0 %v931_v40 }
  0x29   :  { %548 = vmatprep.subr.bf16.mxu1 %v933_v41  ;;  %v41_v41 = vld [vmem:[#allocation2 + $0x28] sm:$0x3] }
  0x2b   :  { %496 = vmatpush2.bf16.msra.mxu0 %v935_v42 }
  0x2c   :  { %549 = vmatpush2.bf16.msra.mxu1 %v936_v43  ;;  %497 = vmatprep.subr.bf16.mxu0 %v937_v44  ;;  %v636_v44 = vunpack.c.l.bf16 %v630_v35 }
  0x2d   :  { %550 = vmatprep.subr.bf16.mxu1 %v939_v45  ;;  %v637_v45 = vunpack.c.h.bf16 %v630_v35 }
  0x2f   :  { %498 = vmatpush2.bf16.msra.mxu0 %v941_v46 }
  0x30   :  { %551 = vmatpush2.bf16.msra.mxu1 %v942_v47  ;;  %499 = vmatprep.subr.bf16.mxu0 %v943_v48 }
  0x31   :  { %552 = vmatprep.subr.bf16.mxu1 %v945_v50  ;;  %v42_v50 = vld [vmem:[#allocation2 + $0x38] sm:$0x3] }
  0x33   :  { %500 = vmatpush2.bf16.msra.mxu0 %v947_v52 }
  0x34   :  { %553 = vmatpush2.bf16.msra.mxu1 %v948_v53  ;;  %501 = vmatprep.subr.bf16.mxu0 %v949_v54 }
  0x35   :  { %554 = vmatprep.subr.bf16.mxu1 %v951_v55 }
  0x37   :  { %502 = vmatpush2.bf16.msra.mxu0 %v953_v56 }
  0x38   :  { %555 = vmatpush2.bf16.msra.mxu1 %v954_v57  ;;  %503 = vmatprep.subr.bf16.mxu0 %v955_v58 }
  0x39   :  { %556 = vmatprep.subr.bf16.mxu1 %v957_v59 }
  0x3b   :  { %504 = vmatpush2.bf16.msra.mxu0 %v959_v60  ;;  %v631_v60 = vld [vmem:[%s1302_s3 + $0x18] sm:$0x11] }
  0x3c   :  { %557 = vmatpush2.bf16.msra.mxu1 %v960_v61  ;;  %505 = vmatprep.subr.bf16.mxu0 %v961_v62  ;;  %v638_v61 = vunpack.c.l.bf16 %v631_v60 }
  0x3d   :  { %558 = vmatprep.subr.bf16.mxu1 %v963_v63 }
  0x3f   :  { %506 = vmatpush2.bf16.msra.mxu0 %v965_v0  ;;  %v639_v0 = vunpack.c.h.bf16 %v631_v60 }
  0x40   :  { %559 = vmatpush2.bf16.msra.mxu1 %v966_v1 }
  0x42   :  { %508 = vmatmul.mubr.bf16.vlgmr.msra.gmra.mxu0 %v967_v2 }
  0x43   :  { %561 = vmatmul.mubr.bf16.vlgmr.msra.gmra.mxu1 %v970_v3  ;;  %517 = vmatprep.mubr.bf16.mxu0 %v973_v4  ;;  %v628_v4 = vld [vmem:[%s1302_s3] sm:$0xff] }
  0x44   :  { %570 = vmatprep.mubr.bf16.mxu1 %v975_v5  ;;  %v632_v9 = vunpack.c.l.bf16 %v628_v4 }
  0x4a   :  { %518 = vmatmul.mubr.bf16.gmra.mxu0 %v977_v6  ;;  %v633_v6 = vunpack.c.h.bf16 %v628_v4 }
  0x4b   :  { %571 = vmatmul.mubr.bf16.gmra.mxu1 %v978_v7 }
 0x102   :  { %v509_v11 = vpop.f32.mrf.mxu0 }
 0x103   :  { %v562_v12 = vpop.f32.mrf.mxu1 }
 0x104   :  { %v1239_v13 = vadd.f32 %v562_v12, %v509_v11  ;;  %v511_v14 = vpop.f32.mrf.mxu0 }
 0x105   :  { %v564_v15 = vpop.f32.mrf.mxu1 }
 0x106   :  { %v565_v16 = vadd.f32 %v564_v15, %v511_v14  ;;  %v513_v18 = vpop.f32.mrf.mxu0  ;;  %v620_v8 = vadd.f32 %v613_v27, %v1239_v13 }
 0x107   :  { %v566_v19 = vpop.f32.mrf.mxu1 }
 0x108   :  { %v567_v22 = vadd.f32 %v566_v19, %v513_v18  ;;  %v515_v24 = vpop.f32.mrf.mxu0  ;;  %v621_v5 = vadd.f32 %v617_v30, %v565_v16  ;;  %v640_v15 = vadd.f32 %v632_v9, %v620_v8 }
 0x109   :  { %v568_v25 = vpop.f32.mrf.mxu1 }
 0x10a   :  { %v569_v26 = vadd.f32 %v568_v25, %v515_v24  ;;  %v519_v28 = vpop.f32.mrf.mxu0  ;;  %v622_v33 = vadd.f32 %v613_v27, %v567_v22  ;;  %v641_v14 = vadd.f32 %v633_v6, %v621_v5 }
 0x10b   :  { %v572_v29 = vpop.f32.mrf.mxu1 }
 0x10c   :  { %v573_v32 = vadd.f32 %v572_v29, %v519_v28  ;;  %v521_v36 = vpop.f32.mrf.mxu0  ;;  %v623_v39 = vadd.f32 %v617_v30, %v569_v26  ;;  %v642_v43 = vadd.f32 %v634_v31, %v622_v33  ;;  %v648_v18 = vadd.f32 %v641_v14, %v640_v15 }
 0x10d   :  { %v574_v37 = vpop.f32.mrf.mxu1 }
 0x10e   :  { %v575_v38 = vadd.f32 %v574_v37, %v521_v36  ;;  %v523_v40 = vpop.f32.mrf.mxu0  ;;  %v643_v47 = vadd.f32 %v635_v34, %v623_v39  ;;  %v624_v48 = vadd.f32 %v613_v27, %v573_v32 }
 0x10f   :  { %v576_v42 = vpop.f32.mrf.mxu1 }
 0x110   :  { %v577_v46 = vadd.f32 %v576_v42, %v523_v40  ;;  %v525_v49 = vpop.f32.mrf.mxu0  ;;  %v651_v54 = vadd.f32 %v643_v47, %v642_v43  ;;  %v625_v55 = vadd.f32 %v617_v30, %v575_v38  ;;  %v644_v57 = vadd.f32 %v636_v44, %v624_v48 }
 0x111   :  { %v578_v51 = vpop.f32.mrf.mxu1 }
 0x112   :  { %v587_v52 = vadd.f32 %v577_v46, %v41_v41  ;;  %v579_v53 = vadd.f32 %v578_v51, %v525_v49  ;;  %652 = vadd.xlane.f32.xlu1 %v651_v54  ;;  %v645_v58 = vadd.f32 %v637_v45, %v625_v55  ;;  %v718_v51 = vld [vmem:[%s1303_s4] sm:$0x3] }
 0x113   :  { %v727_v54 = vrot.slane %v718_v51, %v1246_v21 }
 0x114   :  { %595 = vst [vmem:[#allocation2 + $0x28] sm:$0x3] %v587_v52  ;;  %v588_v56 = vadd.f32 %v579_v53, %v42_v50  ;;  %v654_v59 = vadd.f32 %v645_v58, %v644_v57  ;;  %v738_v52 = vld [vmem:[%s1304_s5] sm:$0x3]  ;;  %v723_v53 = vrot.slane %v718_v51, %v1241_v17 }
 0x116   :  { %596 = vst [vmem:[#allocation2 + $0x38] sm:$0x3] %v588_v56  ;;  %655 = vadd.xlane.f32.xlu1 %v654_v59  ;;  %v743_v56 = vrot.slane %v738_v52, %v1241_v17 }
 0x11b   :  { %v606_v62 = vld [vmem:[#allocation2 + $0x28] sm:$0x3] }
 0x11c   :  { %v626_v63 = vadd.f32 %v613_v27, %v606_v62 }
 0x11d   :  { %v607_v1 = vld [vmem:[#allocation2 + $0x38] sm:$0x3] }
 0x11e   :  { %v627_v2 = vadd.f32 %v617_v30, %v607_v1  ;;  %v646_v3 = vadd.f32 %v638_v61, %v626_v63 }
 0x120   :  { %v647_v7 = vadd.f32 %v639_v0, %v627_v2  ;;  %v658_v10 = vsel %vm657_vm0, %v646_v3, 0.0 }
 0x122   :  { %v659_v11 = vsel %vm657_vm0, %v647_v7, 0.0 }
 0x123   :  { %v660_v12 = vadd.f32 %v659_v11, %v658_v10 }
 0x125   :  { %661 = vadd.xlane.f32.xlu0 %v660_v12 }
 0x129   :  { %649 = vadd.xlane.f32.xlu0 %v648_v18 }
 0x19b   :  { %v653_v19 = vpop.xlane.xlu1 %652 }
 0x19c   :  { %v665_v20 = vmul.f32 0.00390625, %v653_v19 }
 0x19e   :  { %v670_v22 = vsub.f32 %v642_v43, %v665_v20  ;;  %v671_v23 = vsub.f32 %v643_v47, %v665_v20 }
 0x19f   :  { %v656_v13 = vpop.xlane.xlu1 %655 }
 0x1a0   :  { %v678_v16 = vmul.f32 %v670_v22, %v670_v22  ;;  %v679_v24 = vmul.f32 %v671_v23, %v671_v23  ;;  %v666_v28 = vmul.f32 0.00390625, %v656_v13 }
 0x1a2   :  { %v687_v25 = vadd.f32 %v679_v24, %v678_v16  ;;  %v1265_v35 = vsub.f32 %v644_v57, %v666_v28  ;;  %v1267_v36 = vsub.f32 %v645_v58, %v666_v28  ;;  %v747_v58 = vrot.slane %v738_v52, %v1246_v21 }
 0x1a4   :  { %688 = vadd.xlane.f32.xlu1 %v687_v25  ;;  %v680_v45 = vmul.f32 %v1265_v35, %v1265_v35  ;;  %v681_v46 = vmul.f32 %v1267_v36, %v1267_v36 }
 0x1a6   :  { %v690_v47 = vadd.f32 %v681_v46, %v680_v45 }
 0x1ae   :  { %v662_v26 = vpop.xlane.xlu0 %661 }
 0x1af   :  { %v667_v27 = vmul.f32 0.00390625, %v662_v26 }
 0x1b1   :  { %v674_v29 = vsub.f32 %v646_v3, %v667_v27  ;;  %v675_v30 = vsub.f32 %v647_v7, %v667_v27 }
 0x1b2   :  { %v650_v31 = vpop.xlane.xlu0 %649 }
 0x1b3   :  { %v664_v32 = vmul.f32 0.00390625, %v650_v31  ;;  %v682_v33 = vmul.f32 %v674_v29, %v674_v29  ;;  %v683_v34 = vmul.f32 %v675_v30, %v675_v30 }
 0x1b5   :  { %v668_v37 = vsub.f32 %v640_v15, %v664_v32  ;;  %v669_v38 = vsub.f32 %v641_v14, %v664_v32  ;;  %v693_v39 = vsel %vm657_vm0, %v682_v33, 0.0  ;;  %v694_v40 = vsel %vm657_vm0, %v683_v34, 0.0 }
 0x1b6   :  { %v695_v41 = vadd.f32 %v694_v40, %v693_v39 }
 0x1b7   :  { %v676_v42 = vmul.f32 %v668_v37, %v668_v37  ;;  %v677_v43 = vmul.f32 %v669_v38, %v669_v38 }
 0x1b8   :  { %696 = vadd.xlane.f32.xlu1 %v695_v41 }
 0x1b9   :  { %v684_v44 = vadd.f32 %v677_v43, %v676_v42 }
 0x1bb   :  { %685 = vadd.xlane.f32.xlu0 %v684_v44 }
 0x1bf   :  { %691 = vadd.xlane.f32.xlu0 %v690_v47 }
 0x22d   :  { %v689_v48 = vpop.xlane.xlu1 %688 }
 0x22e   :  { %v699_v49 = vmul.f32 0.00390625, %v689_v48 }
 0x230   :  { %v703_v50 = vadd.f32 1e-05, %v699_v49 }
 0x232   :  { %979 = vrsqrt.f32 %v703_v50 }
 0x23f   :  { %v980_v55 = vpop.eup %979 }
 0x240   :  { %v712_v59 = vmul.f32 %v980_v55, %v670_v22  ;;  %v713_v60 = vmul.f32 %v980_v55, %v671_v23 }
 0x241   :  { %v697_v57 = vpop.xlane.xlu1 %696 }
 0x242   :  { %v701_v61 = vmul.f32 0.00390625, %v697_v57  ;;  %v732_v62 = vmul.f32 %v723_v53, %v712_v59  ;;  %v733_v63 = vmul.f32 %v727_v54, %v713_v60 }
 0x244   :  { %v705_v0 = vadd.f32 1e-05, %v701_v61  ;;  %v686_v1 = vpop.xlane.xlu0 %685  ;;  %v752_v3 = vadd.f32 %v743_v56, %v732_v62  ;;  %v753_v4 = vadd.f32 %v747_v58, %v733_v63 }
 0x245   :  { %v698_v2 = vmul.f32 0.00390625, %v686_v1 }
 0x246   :  { %981 = vrsqrt.f32 %v705_v0  ;;  %v867_v6 = vpack.c.bf16 %v753_v4, %v752_v3 }
 0x247   :  { %v702_v5 = vadd.f32 1e-05, %v698_v2 }
 0x248   :  { %v692_v7 = vpop.xlane.xlu0 %691  ;;  %783 = vst [vmem:[%s1305_s6 + $0x8] sm:$0xff] %v867_v6 }
 0x249   :  { %983 = vrsqrt.f32 %v702_v5  ;;  %v700_v8 = vmul.f32 0.00390625, %v692_v7 }
 0x24b   :  { %v704_v17 = vadd.f32 1e-05, %v700_v8 }
 0x24d   :  { %985 = vrsqrt.f32 %v704_v17 }
 0x253   :  { %v982_v21 = vpop.eup %981 }
 0x254   :  { %v716_v9 = vmul.f32 %v982_v21, %v674_v29  ;;  %v717_v10 = vmul.f32 %v982_v21, %v675_v30 }
 0x256   :  { %v984_v11 = vpop.eup %983  ;;  %v736_v12 = vmul.f32 %v723_v53, %v716_v9  ;;  %v737_v14 = vmul.f32 %v727_v54, %v717_v10 }
 0x257   :  { %v710_v15 = vmul.f32 %v984_v11, %v668_v37  ;;  %v711_v18 = vmul.f32 %v984_v11, %v669_v38 }
 0x258   :  { %v756_v19 = vadd.f32 %v743_v56, %v736_v12  ;;  %v757_v20 = vadd.f32 %v747_v58, %v737_v14 }
 0x259   :  { %v730_v22 = vmul.f32 %v723_v53, %v710_v15  ;;  %v731_v23 = vmul.f32 %v727_v54, %v711_v18 }
 0x25a   :  { %v986_v16 = vpop.eup %985  ;;  %v869_v24 = vpack.c.bf16 %v757_v20, %v756_v19 }
 0x25b   :  { %v750_v25 = vadd.f32 %v743_v56, %v730_v22  ;;  %v751_v13 = vadd.f32 %v747_v58, %v731_v23  ;;  %v714_v26 = vmul.f32 %v986_v16, %v1265_v35  ;;  %v715_v27 = vmul.f32 %v986_v16, %v1267_v36 }
 0x25c   :  { %785 = vst [vmem:[%s1305_s6 + $0x18] sm:$0x11] %v869_v24 }
 0x25d   :  { %v866_v28 = vpack.c.bf16 %v751_v13, %v750_v25  ;;  %v734_v29 = vmul.f32 %v723_v53, %v714_v26  ;;  %v735_v30 = vmul.f32 %v727_v54, %v715_v27 }
 0x25f   :  { %782 = vst [vmem:[%s1305_s6] sm:$0xff] %v866_v28  ;;  %v754_v31 = vadd.f32 %v743_v56, %v734_v29  ;;  %v755_v32 = vadd.f32 %v747_v58, %v735_v30 }
 0x261   :  { %v868_v33 = vpack.c.bf16 %v755_v32, %v754_v31 }
 0x263   :  { %784 = vst [vmem:[%s1305_s6 + $0x10] sm:$0xff] %v868_v33 }

// kernel: roberta_forward.17
= control target key start
LH: loop header
LB: loop body
LE: loop exit
PB: predicated region body
PF: predicated region fallthrough
CT: control target
= control target key end

     0   :  { %v1076_v1 = vmov 0.0   ;;  %s1464_s1 = inlined_call_operand.vmem [shape: bf16[256,512], index: 1, kind: input, shape index: {}]   ;;  %s1465_s0 = inlined_call_operand.vmem [shape: bf16[26,256], index: 0, kind: input, shape index: {}]   ;;  %s1466_s2 = inlined_call_operand.vmem [shape: f32[1,512], index: 2, kind: input, shape index: {}]   ;;  %s1467_s3 = inlined_call_operand.vmem [shape: bf16[26,512], index: 3, kind: output, shape index: {}]  }
   0x1   :  { %v942_v0 = vld [vmem:[%s1464_s1 + $0xe4] ss:$16 sps:$4 sm:$0xff]   ;;  %30 = vst [vmem:[#allocation2 + $0x60] sm:$0x3] %v1076_v1  ;;  %31 = vst [vmem:[#allocation2 + $0x70] sm:$0x3] %v1076_v1 }
   0x2   :  { %32 = vst [vmem:[#allocation2 + $0x78] sm:$0x3] %v1076_v1  ;;  %33 = vst [vmem:[#allocation2 + $0x28] sm:$0x3] %v1076_v1  ;;  %v944_v2 = vld [vmem:[%s1464_s1 + $0xec] ss:$16 sps:$4 sm:$0xff]   ;;  %458 = vmatprep.subr.bf16.mxu0 %v942_v0 }
   0x3   :  { %v946_v3 = vld [vmem:[%s1464_s1 + $0xe0] ss:$16 sps:$4 sm:$0xff]   ;;  %v947_v4 = vld [vmem:[%s1464_s1 + $0xe8] ss:$16 sps:$4 sm:$0xff]   ;;  %511 = vmatprep.subr.bf16.mxu1 %v944_v2  ;;  %v948_v5 = vld [vmem:[%s1464_s1 + $0xc4] ss:$16 sps:$4 sm:$0xff]  }
   0x4   :  { %459 = vmatpush1.bf16.msra.mxu0 %v946_v3  ;;  %512 = vmatpush1.bf16.msra.mxu1 %v947_v4  ;;  %v950_v6 = vld [vmem:[%s1464_s1 + $0xcc] ss:$16 sps:$4 sm:$0xff]   ;;  %v952_v7 = vld [vmem:[%s1464_s1 + $0xc0] ss:$16 sps:$4 sm:$0xff]   ;;  %v953_v8 = vld [vmem:[%s1464_s1 + $0xc8] ss:$16 sps:$4 sm:$0xff]  }
   0x5   :  { %460 = vmatprep.subr.bf16.mxu0 %v948_v5  ;;  %513 = vmatprep.subr.bf16.mxu1 %v950_v6  ;;  %v954_v9 = vld [vmem:[%s1464_s1 + $0xa4] ss:$16 sps:$4 sm:$0xff]   ;;  %v956_v10 = vld [vmem:[%s1464_s1 + $0xac] ss:$16 sps:$4 sm:$0xff]   ;;  %v958_v11 = vld [vmem:[%s1464_s1 + $0xa0] ss:$16 sps:$4 sm:$0xff]   ;;  %v617_v5 = vlaneseq }
   0x6   :  { %v959_v12 = vld [vmem:[%s1464_s1 + $0xa8] ss:$16 sps:$4 sm:$0xff]   ;;  %v960_v13 = vld [vmem:[%s1464_s1 + $0x84] ss:$16 sps:$4 sm:$0xff]   ;;  %v962_v14 = vld [vmem:[%s1464_s1 + $0x8c] ss:$16 sps:$4 sm:$0xff]  }
   0x7   :  { %v964_v15 = vld [vmem:[%s1464_s1 + $0x80] ss:$16 sps:$4 sm:$0xff]   ;;  %v965_v16 = vld [vmem:[%s1464_s1 + $0x88] ss:$16 sps:$4 sm:$0xff]   ;;  %v966_v17 = vld [vmem:[%s1464_s1 + $0x64] ss:$16 sps:$4 sm:$0xff]  }
   0x8   :  { %461 = vmatpush1.bf16.msra.mxu0 %v952_v7  ;;  %514 = vmatpush1.bf16.msra.mxu1 %v953_v8  ;;  %v968_v18 = vld [vmem:[%s1464_s1 + $0x6c] ss:$16 sps:$4 sm:$0xff]   ;;  %v970_v19 = vld [vmem:[%s1464_s1 + $0x60] ss:$16 sps:$4 sm:$0xff]   ;;  %v971_v20 = vld [vmem:[%s1464_s1 + $0x68] ss:$16 sps:$4 sm:$0xff]  }
   0x9   :  { %462 = vmatprep.subr.bf16.mxu0 %v954_v9  ;;  %515 = vmatprep.subr.bf16.mxu1 %v956_v10  ;;  %v972_v21 = vld [vmem:[%s1464_s1 + $0x44] ss:$16 sps:$4 sm:$0xff]   ;;  %v974_v22 = vld [vmem:[%s1464_s1 + $0x4c] ss:$16 sps:$4 sm:$0xff]   ;;  %v976_v23 = vld [vmem:[%s1464_s1 + $0x40] ss:$16 sps:$4 sm:$0xff]  }
   0xa   :  { %v977_v24 = vld [vmem:[%s1464_s1 + $0x48] ss:$16 sps:$4 sm:$0xff]   ;;  %v978_v25 = vld [vmem:[%s1464_s1 + $0x24] ss:$16 sps:$4 sm:$0xff]   ;;  %v980_v26 = vld [vmem:[%s1464_s1 + $0x2c] ss:$16 sps:$4 sm:$0xff]  }
   0xb   :  { %v982_v27 = vld [vmem:[%s1464_s1 + $0x20] ss:$16 sps:$4 sm:$0xff]   ;;  %v983_v28 = vld [vmem:[%s1464_s1 + $0x28] ss:$16 sps:$4 sm:$0xff]   ;;  %v984_v29 = vld [vmem:[%s1464_s1 + $0x4] ss:$16 sps:$4 sm:$0xff]  }
   0xc   :  { %463 = vmatpush1.bf16.msra.mxu0 %v958_v11  ;;  %516 = vmatpush1.bf16.msra.mxu1 %v959_v12  ;;  %v986_v30 = vld [vmem:[%s1464_s1 + $0xc] ss:$16 sps:$4 sm:$0xff]   ;;  %v988_v31 = vld [vmem:[%s1464_s1] ss:$16 sps:$4 sm:$0xff]   ;;  %v989_v32 = vld [vmem:[%s1464_s1 + $0x8] ss:$16 sps:$4 sm:$0xff]  }
   0xd   :  { %464 = vmatprep.subr.bf16.mxu0 %v960_v13  ;;  %517 = vmatprep.subr.bf16.mxu1 %v962_v14  ;;  %v990_v33 = vld [vmem:[%s1464_s1 + $0x1e4] ss:$16 sps:$4 sm:$0xff]   ;;  %v992_v34 = vld [vmem:[%s1464_s1 + $0x1ec] ss:$16 sps:$4 sm:$0xff]   ;;  %v994_v35 = vld [vmem:[%s1464_s1 + $0x1e0] ss:$16 sps:$4 sm:$0xff]  }
   0xe   :  { %v995_v36 = vld [vmem:[%s1464_s1 + $0x1e8] ss:$16 sps:$4 sm:$0xff]   ;;  %v996_v37 = vld [vmem:[%s1464_s1 + $0x1c4] ss:$16 sps:$4 sm:$0xff]   ;;  %v998_v38 = vld [vmem:[%s1464_s1 + $0x1cc] ss:$16 sps:$4 sm:$0xff]  }
   0xf   :  { %v1000_v39 = vld [vmem:[%s1464_s1 + $0x1c0] ss:$16 sps:$4 sm:$0xff]   ;;  %v1001_v40 = vld [vmem:[%s1464_s1 + $0x1c8] ss:$16 sps:$4 sm:$0xff]   ;;  %v1002_v41 = vld [vmem:[%s1464_s1 + $0x1a4] ss:$16 sps:$4 sm:$0xff]  }
  0x10   :  { %465 = vmatpush1.bf16.msra.mxu0 %v964_v15  ;;  %518 = vmatpush1.bf16.msra.mxu1 %v965_v16  ;;  %v1004_v42 = vld [vmem:[%s1464_s1 + $0x1ac] ss:$16 sps:$4 sm:$0xff]   ;;  %v1006_v43 = vld [vmem:[%s1464_s1 + $0x1a0] ss:$16 sps:$4 sm:$0xff]   ;;  %v1007_v44 = vld [vmem:[%s1464_s1 + $0x1a8] ss:$16 sps:$4 sm:$0xff]  }
  0x11   :  { %466 = vmatprep.subr.bf16.mxu0 %v966_v17  ;;  %519 = vmatprep.subr.bf16.mxu1 %v968_v18  ;;  %v1008_v45 = vld [vmem:[%s1464_s1 + $0x184] ss:$16 sps:$4 sm:$0xff]   ;;  %v1010_v46 = vld [vmem:[%s1464_s1 + $0x18c] ss:$16 sps:$4 sm:$0xff]   ;;  %v1012_v47 = vld [vmem:[%s1464_s1 + $0x180] ss:$16 sps:$4 sm:$0xff]  }
  0x12   :  { %v1040_v48 = vld [vmem:[%s1465_s0 + $0x4] ss:$8 sps:$4 sm:$0xff]   ;;  %v1013_v49 = vld [vmem:[%s1464_s1 + $0x188] ss:$16 sps:$4 sm:$0xff]   ;;  %v1018_v52 = vld [vmem:[%s1464_s1 + $0x160] ss:$16 sps:$4 sm:$0xff]  }
  0x13   :  { %v1014_v50 = vld [vmem:[%s1464_s1 + $0x164] ss:$16 sps:$4 sm:$0xff]   ;;  %v1016_v51 = vld [vmem:[%s1464_s1 + $0x16c] ss:$16 sps:$4 sm:$0xff]   ;;  %490 = vmatprep.mubr.bf16.mxu0 %v1040_v48  ;;  %543 = vmatprep.mubr.bf16.mxu1 %v1040_v48  ;;  %v1019_v53 = vld [vmem:[%s1464_s1 + $0x168] ss:$16 sps:$4 sm:$0xff]  }
  0x14   :  { %467 = vmatpush1.bf16.msra.mxu0 %v970_v19  ;;  %520 = vmatpush1.bf16.msra.mxu1 %v971_v20  ;;  %v1020_v54 = vld [vmem:[%s1464_s1 + $0x144] ss:$16 sps:$4 sm:$0xff]   ;;  %v1022_v55 = vld [vmem:[%s1464_s1 + $0x14c] ss:$16 sps:$4 sm:$0xff]   ;;  %v1024_v56 = vld [vmem:[%s1464_s1 + $0x140] ss:$16 sps:$4 sm:$0xff]  }
  0x15   :  { %468 = vmatprep.subr.bf16.mxu0 %v972_v21  ;;  %521 = vmatprep.subr.bf16.mxu1 %v974_v22  ;;  %v1025_v57 = vld [vmem:[%s1464_s1 + $0x148] ss:$16 sps:$4 sm:$0xff]   ;;  %v1026_v58 = vld [vmem:[%s1464_s1 + $0x124] ss:$16 sps:$4 sm:$0xff]   ;;  %v1028_v59 = vld [vmem:[%s1464_s1 + $0x12c] ss:$16 sps:$4 sm:$0xff]  }
  0x16   :  { %v1030_v60 = vld [vmem:[%s1464_s1 + $0x120] ss:$16 sps:$4 sm:$0xff]   ;;  %v1031_v61 = vld [vmem:[%s1464_s1 + $0x128] ss:$16 sps:$4 sm:$0xff]   ;;  %v1032_v62 = vld [vmem:[%s1464_s1 + $0x104] ss:$16 sps:$4 sm:$0xff]  }
  0x17   :  { %v1034_v63 = vld [vmem:[%s1464_s1 + $0x10c] ss:$16 sps:$4 sm:$0xff]   ;;  %v1036_v0 = vld [vmem:[%s1464_s1 + $0x100] ss:$16 sps:$4 sm:$0xff]   ;;  %v1037_v1 = vld [vmem:[%s1464_s1 + $0x108] ss:$16 sps:$4 sm:$0xff]  }
  0x18   :  { %469 = vmatpush1.bf16.msra.mxu0 %v976_v23  ;;  %522 = vmatpush1.bf16.msra.mxu1 %v977_v24  ;;  %v1038_v2 = vld [vmem:[%s1465_s0] ss:$8 sps:$4 sm:$0xff]   ;;  %v1041_v3 = vld [vmem:[%s1465_s0 + $0x14] ss:$8 sps:$4 sm:$0x1f]   ;;  %v618_v6 = vshrl.u32 %v617_v5, 7 }
  0x19   :  { %470 = vmatprep.subr.bf16.mxu0 %v978_v25  ;;  %523 = vmatprep.subr.bf16.mxu1 %v980_v26  ;;  %v1043_v4 = vld [vmem:[%s1465_s0 + $0x10] ss:$8 sps:$4 sm:$0x1f]   ;;  %v615_v9 = vld [vmem:[%s1466_s2] sm:$0xf] }
  0x1a   :  { %v619_v7 = vsub.s32 0, %v618_v6  ;;  %v627_v8 = vsub.s32 2, %v618_v6  ;;  %v623_v10 = vsub.s32 1, %v618_v6  ;;  %v631_v11 = vsub.s32 3, %v618_v6 }
  0x1c   :  { %471 = vmatpush1.bf16.msra.mxu0 %v982_v27  ;;  %524 = vmatpush1.bf16.msra.mxu1 %v983_v28  ;;  %v1304_v12 = vrot.slane %v615_v9, %v619_v7  ;;  %v1306_v13 = vrot.slane %v615_v9, %v627_v8  ;;  %v1308_v17 = vrot.slane %v615_v9, %v623_v10 }
  0x1d   :  { %472 = vmatprep.subr.bf16.mxu0 %v984_v29  ;;  %525 = vmatprep.subr.bf16.mxu1 %v986_v30  ;;  %v1310_v19 = vrot.slane %v615_v9, %v631_v11 }
  0x20   :  { %473 = vmatpush1.bf16.msra.mxu0 %v988_v31  ;;  %526 = vmatpush1.bf16.msra.mxu1 %v989_v32 }
  0x21   :  { %474 = vmatprep.subr.bf16.mxu0 %v990_v33  ;;  %527 = vmatprep.subr.bf16.mxu1 %v992_v34 }
  0x24   :  { %475 = vmatpush2.bf16.msra.mxu0 %v994_v35  ;;  %528 = vmatpush2.bf16.msra.mxu1 %v995_v36 }
  0x25   :  { %476 = vmatprep.subr.bf16.mxu0 %v996_v37  ;;  %529 = vmatprep.subr.bf16.mxu1 %v998_v38 }
  0x28   :  { %477 = vmatpush2.bf16.msra.mxu0 %v1000_v39  ;;  %530 = vmatpush2.bf16.msra.mxu1 %v1001_v40 }
  0x29   :  { %478 = vmatprep.subr.bf16.mxu0 %v1002_v41  ;;  %531 = vmatprep.subr.bf16.mxu1 %v1004_v42 }
  0x2c   :  { %479 = vmatpush2.bf16.msra.mxu0 %v1006_v43  ;;  %532 = vmatpush2.bf16.msra.mxu1 %v1007_v44 }
  0x2d   :  { %480 = vmatprep.subr.bf16.mxu0 %v1008_v45  ;;  %533 = vmatprep.subr.bf16.mxu1 %v1010_v46 }
  0x30   :  { %481 = vmatpush2.bf16.msra.mxu0 %v1012_v47  ;;  %534 = vmatpush2.bf16.msra.mxu1 %v1013_v49 }
  0x31   :  { %482 = vmatprep.subr.bf16.mxu0 %v1014_v50  ;;  %535 = vmatprep.subr.bf16.mxu1 %v1016_v51 }
  0x34   :  { %483 = vmatpush2.bf16.msra.mxu0 %v1018_v52  ;;  %536 = vmatpush2.bf16.msra.mxu1 %v1019_v53 }
  0x35   :  { %484 = vmatprep.subr.bf16.mxu0 %v1020_v54  ;;  %537 = vmatprep.subr.bf16.mxu1 %v1022_v55 }
  0x38   :  { %485 = vmatpush2.bf16.msra.mxu0 %v1024_v56  ;;  %538 = vmatpush2.bf16.msra.mxu1 %v1025_v57 }
  0x39   :  { %486 = vmatprep.subr.bf16.mxu0 %v1026_v58  ;;  %539 = vmatprep.subr.bf16.mxu1 %v1028_v59 }
  0x3c   :  { %487 = vmatpush2.bf16.msra.mxu0 %v1030_v60  ;;  %540 = vmatpush2.bf16.msra.mxu1 %v1031_v61 }
  0x3d   :  { %488 = vmatprep.subr.bf16.mxu0 %v1032_v62  ;;  %541 = vmatprep.subr.bf16.mxu1 %v1034_v63 }
  0x40   :  { %489 = vmatpush2.bf16.msra.mxu0 %v1036_v0  ;;  %542 = vmatpush2.bf16.msra.mxu1 %v1037_v1 }
  0x43   :  { %491 = vmatmul.mubr.bf16.vlgmr.msra.gmra.mxu0 %v1038_v2  ;;  %544 = vmatmul.mubr.bf16.vlgmr.msra.gmra.mxu1 %v1038_v2 }
  0x44   :  { %500 = vmatprep.mubr.bf16.mxu0 %v1041_v3  ;;  %553 = vmatprep.mubr.bf16.mxu1 %v1041_v3 }
  0x4b   :  { %501 = vmatmul.mubr.bf16.gmra.mxu0 %v1043_v4  ;;  %554 = vmatmul.mubr.bf16.gmra.mxu1 %v1043_v4 }
 0x103   :  { %v492_v14 = vpop.f32.mrf.mxu0  ;;  %v545_v15 = vpop.f32.mrf.mxu1 }
 0x104   :  { %v1313_v20 = vadd.f32 %v1304_v12, %v492_v14  ;;  %v1316_v21 = vadd.f32 %v1306_v13, %v545_v15 }
 0x105   :  { %v494_v16 = vpop.f32.mrf.mxu0  ;;  %v547_v18 = vpop.f32.mrf.mxu1 }
 0x106   :  { %v669_v24 = vmul.f32 0.044715, %v1313_v20  ;;  %v671_v25 = vmul.f32 0.044715, %v1316_v21  ;;  %v1321_v26 = vadd.f32 %v1308_v17, %v494_v16  ;;  %v1324_v27 = vadd.f32 %v1310_v19, %v547_v18  ;;  %v46_v18 = vld [vmem:[#allocation2 + $0x60] sm:$0x3] }
 0x107   :  { %v496_v22 = vpop.f32.mrf.mxu0  ;;  %v549_v23 = vpop.f32.mrf.mxu1 }
 0x108   :  { %v685_v30 = vmul.f32 %v669_v24, %v1313_v20  ;;  %v687_v31 = vmul.f32 %v671_v25, %v1316_v21  ;;  %v670_v32 = vmul.f32 0.044715, %v1321_v26  ;;  %v672_v33 = vmul.f32 0.044715, %v1324_v27 }
 0x109   :  { %v498_v28 = vpop.f32.mrf.mxu0  ;;  %v551_v29 = vpop.f32.mrf.mxu1  ;;  %v1333_v36 = vadd.f32 %v1304_v12, %v496_v22  ;;  %v1336_v37 = vadd.f32 %v1306_v13, %v549_v23  ;;  %v48_v23 = vld [vmem:[#allocation2 + $0x78] sm:$0x3] }
 0x10a   :  { %v701_v34 = vmul.f32 %v685_v30, %v1313_v20  ;;  %v703_v35 = vmul.f32 %v687_v31, %v1316_v21  ;;  %v686_v38 = vmul.f32 %v670_v32, %v1321_v26  ;;  %v688_v39 = vmul.f32 %v672_v33, %v1324_v27  ;;  %v47_v33 = vld [vmem:[#allocation2 + $0x70] sm:$0x3] }
 0x10b   :  { %v1341_v40 = vadd.f32 %v1308_v17, %v498_v28  ;;  %v673_v43 = vmul.f32 0.044715, %v1333_v36  ;;  %v1347_v44 = vadd.f32 %v1310_v19, %v551_v29  ;;  %v502_v45 = vpop.f32.mrf.mxu0  ;;  %v675_v48 = vmul.f32 0.044715, %v1336_v37  ;;  %v555_v49 = vpop.f32.mrf.mxu1 }
 0x10c   :  { %v717_v41 = vadd.f32 %v701_v34, %v1313_v20  ;;  %v719_v42 = vadd.f32 %v703_v35, %v1316_v21  ;;  %v702_v46 = vmul.f32 %v686_v38, %v1321_v26  ;;  %v704_v47 = vmul.f32 %v688_v39, %v1324_v27  ;;  %v49_v35 = vld [vmem:[#allocation2 + $0x28] sm:$0x3] }
 0x10d   :  { %v689_v52 = vmul.f32 %v673_v43, %v1333_v36  ;;  %v691_v55 = vmul.f32 %v675_v48, %v1336_v37  ;;  %v674_v56 = vmul.f32 0.044715, %v1341_v40  ;;  %v676_v58 = vmul.f32 0.044715, %v1347_v44  ;;  %v504_v59 = vpop.f32.mrf.mxu0  ;;  %v557_v63 = vpop.f32.mrf.mxu1 }
 0x10e   :  { %v733_v50 = vmul.f32 0.7978846, %v717_v41  ;;  %v735_v51 = vmul.f32 0.7978846, %v719_v42  ;;  %v718_v53 = vadd.f32 %v702_v46, %v1321_v26  ;;  %v720_v54 = vadd.f32 %v704_v47, %v1324_v27 }
 0x10f   :  { %v705_v57 = vmul.f32 %v689_v52, %v1333_v36  ;;  %v707_v62 = vmul.f32 %v691_v55, %v1336_v37  ;;  %v690_v1 = vmul.f32 %v674_v56, %v1341_v40  ;;  %v692_v2 = vmul.f32 %v676_v58, %v1347_v44  ;;  %v506_v11 = vpop.f32.mrf.mxu0  ;;  %v559_v14 = vpop.f32.mrf.mxu1 }
 0x110   :  { %1044 = vtanh.f32 %v733_v50  ;;  %v734_v60 = vmul.f32 0.7978846, %v718_v53  ;;  %v736_v61 = vmul.f32 0.7978846, %v720_v54  ;;  %v1367_v8 = vadd.f32 %v1304_v12, %v502_v45 }
 0x111   :  { %1046 = vtanh.f32 %v735_v51  ;;  %v721_v0 = vadd.f32 %v705_v57, %v1333_v36  ;;  %v723_v3 = vadd.f32 %v707_v62, %v1336_v37  ;;  %v706_v5 = vmul.f32 %v690_v1, %v1341_v40  ;;  %v508_v34 = vpop.f32.mrf.mxu0  ;;  %v561_v38 = vpop.f32.mrf.mxu1 }
 0x112   :  { %1048 = vtanh.f32 %v734_v60  ;;  %v708_v6 = vmul.f32 %v692_v2, %v1347_v44  ;;  %v1370_v9 = vadd.f32 %v1306_v13, %v555_v49  ;;  %v1373_v10 = vadd.f32 %v1308_v17, %v504_v59 }
 0x113   :  { %1050 = vtanh.f32 %v736_v61  ;;  %v737_v4 = vmul.f32 0.7978846, %v721_v0  ;;  %v739_v7 = vmul.f32 0.7978846, %v723_v3  ;;  %v722_v15 = vadd.f32 %v706_v5, %v1341_v40 }
 0x114   :  { %v724_v16 = vadd.f32 %v708_v6, %v1347_v44  ;;  %v677_v22 = vmul.f32 0.044715, %v1367_v8  ;;  %v679_v28 = vmul.f32 0.044715, %v1370_v9  ;;  %v1380_v29 = vadd.f32 %v1310_v19, %v557_v63 }
 0x115   :  { %1052 = vtanh.f32 %v737_v4  ;;  %v738_v24 = vmul.f32 0.7978846, %v722_v15  ;;  %v678_v31 = vmul.f32 0.044715, %v1373_v10  ;;  %v576_v32 = vadd.f32 %v506_v11, %v46_v18 }
 0x116   :  { %1054 = vtanh.f32 %v739_v7  ;;  %v740_v25 = vmul.f32 0.7978846, %v724_v16  ;;  %v693_v30 = vmul.f32 %v677_v22, %v1367_v8  ;;  %v695_v39 = vmul.f32 %v679_v28, %v1370_v9 }
 0x117   :  { %1056 = vtanh.f32 %v738_v24  ;;  %v680_v41 = vmul.f32 0.044715, %v1380_v29  ;;  %v694_v43 = vmul.f32 %v678_v31, %v1373_v10  ;;  %592 = vst [vmem:[#allocation2 + $0x60] sm:$0x3] %v576_v32  ;;  %v578_v45 = vadd.f32 %v559_v14, %v48_v23 }
 0x118   :  { %1058 = vtanh.f32 %v740_v25  ;;  %v709_v42 = vmul.f32 %v693_v30, %v1367_v8  ;;  %v711_v46 = vmul.f32 %v695_v39, %v1370_v9  ;;  %v577_v48 = vadd.f32 %v508_v34, %v47_v33 }
 0x119   :  { %v696_v47 = vmul.f32 %v680_v41, %v1380_v29  ;;  %v579_v49 = vadd.f32 %v561_v38, %v49_v35  ;;  %v710_v52 = vmul.f32 %v694_v43, %v1373_v10  ;;  %594 = vst [vmem:[#allocation2 + $0x78] sm:$0x3] %v578_v45  ;;  %v653_v56 = vmul.f32 0.5, %v1313_v20 }
 0x11a   :  { %v725_v51 = vadd.f32 %v709_v42, %v1367_v8  ;;  %v727_v54 = vadd.f32 %v711_v46, %v1370_v9  ;;  %593 = vst [vmem:[#allocation2 + $0x70] sm:$0x3] %v577_v48  ;;  %v655_v61 = vmul.f32 0.5, %v1316_v21  ;;  %v654_v2 = vmul.f32 0.5, %v1321_v26 }
 0x11b   :  { %v712_v55 = vmul.f32 %v696_v47, %v1380_v29  ;;  %595 = vst [vmem:[#allocation2 + $0x28] sm:$0x3] %v579_v49  ;;  %v726_v59 = vadd.f32 %v710_v52, %v1373_v10  ;;  %v656_v5 = vmul.f32 0.5, %v1324_v27  ;;  %v657_v33 = vmul.f32 0.5, %v1333_v36 }
 0x11c   :  { %v741_v58 = vmul.f32 0.7978846, %v725_v51  ;;  %v743_v63 = vmul.f32 0.7978846, %v727_v54  ;;  %v660_v36 = vmul.f32 0.5, %v1347_v44 }
 0x11d   :  { %v1045_v50 = vpop.eup %1044  ;;  %v728_v0 = vadd.f32 %v712_v55, %v1380_v29  ;;  %v742_v4 = vmul.f32 0.7978846, %v726_v59 }
 0x11e   :  { %v1047_v53 = vpop.eup %1046  ;;  %v765_v57 = vadd.f32 1.0, %v1045_v50  ;;  %1060 = vtanh.f32 %v741_v58  ;;  %v611_v7 = vld [vmem:[#allocation2 + $0x60] sm:$0x3] }
 0x11f   :  { %v1049_v60 = vpop.eup %1048  ;;  %v767_v62 = vadd.f32 1.0, %v1047_v53  ;;  %1062 = vtanh.f32 %v743_v63  ;;  %v744_v6 = vmul.f32 0.7978846, %v728_v0  ;;  %v1401_v21 = vadd.f32 %v1304_v12, %v611_v7 }
 0x120   :  { %v1051_v1 = vpop.eup %1050  ;;  %v766_v3 = vadd.f32 1.0, %v1049_v60  ;;  %v781_v14 = vmul.f32 %v765_v57, %v653_v56  ;;  %1064 = vtanh.f32 %v742_v4  ;;  %v613_v26 = vld [vmem:[#allocation2 + $0x78] sm:$0x3]  ;;  %v661_v0 = vmul.f32 0.5, %v1367_v8 }
 0x121   :  { %v768_v20 = vadd.f32 1.0, %v1051_v1  ;;  %v783_v18 = vmul.f32 %v767_v62, %v655_v61  ;;  %1066 = vtanh.f32 %v744_v6  ;;  %v681_v24 = vmul.f32 0.044715, %v1401_v21  ;;  %v612_v27 = vld [vmem:[#allocation2 + $0x70] sm:$0x3] }
 0x122   :  { %v1053_v11 = vpop.eup %1052  ;;  %v782_v15 = vmul.f32 %v766_v3, %v654_v2  ;;  %v1405_v30 = vadd.f32 %v1306_v13, %v613_v26  ;;  %v1408_v31 = vadd.f32 %v1308_v17, %v612_v27  ;;  %v614_v32 = vld [vmem:[#allocation2 + $0x28] sm:$0x3]  ;;  %v659_v13 = vmul.f32 0.5, %v1336_v37 }
 0x123   :  { %v1055_v16 = vpop.eup %1054  ;;  %v784_v22 = vmul.f32 %v768_v20, %v656_v5  ;;  %v769_v28 = vadd.f32 1.0, %v1053_v11  ;;  %v697_v35 = vmul.f32 %v681_v24, %v1401_v21  ;;  %v1416_v38 = vadd.f32 %v1310_v19, %v614_v32 }
 0x124   :  { %v933_v23 = vpack.c.bf16 %v782_v15, %v781_v14  ;;  %v1057_v12 = vpop.eup %1056  ;;  %v771_v34 = vadd.f32 1.0, %v1055_v16  ;;  %v658_v17 = vmul.f32 0.5, %v1341_v40  ;;  %v683_v42 = vmul.f32 0.044715, %v1405_v30 }
 0x125   :  { %v934_v25 = vpack.c.bf16 %v784_v22, %v783_v18  ;;  %v1059_v39 = vpop.eup %1058  ;;  %v770_v41 = vadd.f32 1.0, %v1057_v12  ;;  %v713_v45 = vmul.f32 %v697_v35, %v1401_v21  ;;  %v682_v19 = vmul.f32 0.044715, %v1408_v31 }
 0x126   :  { %845 = vst [vmem:[%s1467_s3] sm:$0xff] %v933_v23  ;;  %v772_v43 = vadd.f32 1.0, %v1059_v39  ;;  %v785_v46 = vmul.f32 %v769_v28, %v657_v33  ;;  %v699_v48 = vmul.f32 %v683_v42, %v1405_v30  ;;  %v684_v49 = vmul.f32 0.044715, %v1416_v38 }
 0x127   :  { %846 = vst [vmem:[%s1467_s3 + $0x8] sm:$0xff] %v934_v25  ;;  %v786_v47 = vmul.f32 %v770_v41, %v658_v17  ;;  %v787_v50 = vmul.f32 %v771_v34, %v659_v13  ;;  %v729_v40 = vadd.f32 %v713_v45, %v1401_v21  ;;  %v698_v51 = vmul.f32 %v682_v19, %v1408_v31 }
 0x128   :  { %v788_v37 = vmul.f32 %v772_v43, %v660_v36  ;;  %v715_v44 = vmul.f32 %v699_v48, %v1405_v30  ;;  %v700_v53 = vmul.f32 %v684_v49, %v1416_v38  ;;  %v663_v5 = vmul.f32 0.5, %v1370_v9 }
 0x129   :  { %v935_v52 = vpack.c.bf16 %v786_v47, %v785_v46  ;;  %v745_v55 = vmul.f32 0.7978846, %v729_v40  ;;  %v714_v56 = vmul.f32 %v698_v51, %v1408_v31  ;;  %v662_v20 = vmul.f32 0.5, %v1373_v10 }
 0x12a   :  { %v936_v54 = vpack.c.bf16 %v788_v37, %v787_v50  ;;  %v731_v58 = vadd.f32 %v715_v44, %v1405_v30  ;;  %v716_v59 = vmul.f32 %v700_v53, %v1416_v38  ;;  %v664_v11 = vmul.f32 0.5, %v1380_v29 }
 0x12b   :  { %v1061_v57 = vpop.eup %1060  ;;  %847 = vst [vmem:[%s1467_s3 + $0x10] sm:$0xff] %v935_v52  ;;  %1068 = vtanh.f32 %v745_v55  ;;  %v730_v62 = vadd.f32 %v714_v56, %v1408_v31  ;;  %v665_v28 = vmul.f32 0.5, %v1401_v21  ;;  %v666_v32 = vmul.f32 0.5, %v1408_v31 }
 0x12c   :  { %v1063_v60 = vpop.eup %1062  ;;  %848 = vst [vmem:[%s1467_s3 + $0x18] sm:$0xff] %v936_v54  ;;  %v773_v61 = vadd.f32 1.0, %v1061_v57  ;;  %v747_v2 = vmul.f32 0.7978846, %v731_v58  ;;  %v732_v3 = vadd.f32 %v716_v59, %v1416_v38  ;;  %v667_v33 = vmul.f32 0.5, %v1405_v30 }
 0x12d   :  { %v1065_v63 = vpop.eup %1064  ;;  %v775_v1 = vadd.f32 1.0, %v1063_v60  ;;  %v746_v7 = vmul.f32 0.7978846, %v730_v62  ;;  %v668_v34 = vmul.f32 0.5, %v1416_v38 }
 0x12e   :  { %v1067_v4 = vpop.eup %1066  ;;  %v774_v6 = vadd.f32 1.0, %v1065_v63  ;;  %1070 = vtanh.f32 %v747_v2  ;;  %v748_v15 = vmul.f32 0.7978846, %v732_v3  ;;  %v789_v16 = vmul.f32 %v773_v61, %v661_v0 }
 0x12f   :  { %v776_v14 = vadd.f32 1.0, %v1067_v4  ;;  %1072 = vtanh.f32 %v746_v7  ;;  %v791_v8 = vmul.f32 %v775_v1, %v663_v5 }
 0x130   :  { %v790_v18 = vmul.f32 %v774_v6, %v662_v20  ;;  %1074 = vtanh.f32 %v748_v15 }
 0x131   :  { %v792_v22 = vmul.f32 %v776_v14, %v664_v11 }
 0x132   :  { %v937_v26 = vpack.c.bf16 %v790_v18, %v789_v16 }
 0x133   :  { %v938_v23 = vpack.c.bf16 %v792_v22, %v791_v8 }
 0x134   :  { %849 = vst [vmem:[%s1467_s3 + $0x20] sm:$0xff] %v937_v26 }
 0x135   :  { %850 = vst [vmem:[%s1467_s3 + $0x28] sm:$0xff] %v938_v23 }
 0x138   :  { %v1069_v9 = vpop.eup %1068 }
 0x139   :  { %v777_v29 = vadd.f32 1.0, %v1069_v9 }
 0x13b   :  { %v1071_v10 = vpop.eup %1070  ;;  %v793_v39 = vmul.f32 %v777_v29, %v665_v28 }
 0x13c   :  { %v1073_v24 = vpop.eup %1072  ;;  %v779_v27 = vadd.f32 1.0, %v1071_v10 }
 0x13d   :  { %v1075_v25 = vpop.eup %1074  ;;  %v778_v12 = vadd.f32 1.0, %v1073_v24 }
 0x13e   :  { %v780_v35 = vadd.f32 1.0, %v1075_v25  ;;  %v795_v17 = vmul.f32 %v779_v27, %v667_v33 }
 0x13f   :  { %v794_v13 = vmul.f32 %v778_v12, %v666_v32 }
 0x140   :  { %v796_v41 = vmul.f32 %v780_v35, %v668_v34 }
 0x141   :  { %v939_v42 = vpack.c.bf16 %v794_v13, %v793_v39 }
 0x142   :  { %v940_v36 = vpack.c.bf16 %v796_v41, %v795_v17 }
 0x143   :  { %851 = vst [vmem:[%s1467_s3 + $0x30] sm:$0x11] %v939_v42 }
 0x144   :  { %852 = vst [vmem:[%s1467_s3 + $0x38] sm:$0x11] %v940_v36 }

// kernel: roberta_forward.24
= control target key start
LH: loop header
LB: loop body
LE: loop exit
PB: predicated region body
PF: predicated region fallthrough
CT: control target
= control target key end

     0   :  { %v442_v9 = vmov 1966171168   ;;  %v66_v11 = vlaneseq  ;;  %s577_s0 = inlined_call_operand.vmem [shape: bf16[2,256], index: 0, kind: input, shape index: {}]   ;;  %s578_s1 = inlined_call_operand.vmem [shape: bf16[256,256], index: 1, kind: input, shape index: {}]   ;;  %s579_s2 = inlined_call_operand.vmem [shape: f32[1,256], index: 2, kind: input, shape index: {}]   ;;  %s580_s3 = inlined_call_operand.hbm [shape: f32[2,256], index: 3, kind: output, shape index: {}]  }
   0x1   :  { %v370_v0 = vld [vmem:[%s578_s1 + $0x74] ss:$8 sps:$4 sm:$0xff]   ;;  %v372_v1 = vld [vmem:[%s578_s1 + $0x70] ss:$8 sps:$4 sm:$0xff]   ;;  %v373_v2 = vld [vmem:[%s578_s1 + $0x64] ss:$8 sps:$4 sm:$0xff]   ;;  %v64_v10 = vunpack.c.l.s4 %v442_v9 }
   0x2   :  { %239 = vmatprep.subr.bf16.mxu0 %v370_v0  ;;  %v375_v3 = vld [vmem:[%s578_s1 + $0x60] ss:$8 sps:$4 sm:$0xff]   ;;  %v376_v4 = vld [vmem:[%s578_s1 + $0x54] ss:$8 sps:$4 sm:$0xff]   ;;  %v378_v5 = vld [vmem:[%s578_s1 + $0x50] ss:$8 sps:$4 sm:$0xff]  }
   0x3   :  { %240 = vmatpush1.bf16.msra.mxu0 %v372_v1  ;;  %v379_v6 = vld [vmem:[%s578_s1 + $0x44] ss:$8 sps:$4 sm:$0xff]   ;;  %v381_v7 = vld [vmem:[%s578_s1 + $0x40] ss:$8 sps:$4 sm:$0xff]   ;;  %v382_v8 = vld [vmem:[%s578_s1 + $0x34] ss:$8 sps:$4 sm:$0xff]   ;;  %v65_v14 = vunpack.c.0.s8 %v64_v10 }
   0x4   :  { %241 = vmatprep.subr.bf16.mxu0 %v373_v2  ;;  %v384_v12 = vld [vmem:[%s578_s1 + $0x30] ss:$8 sps:$4 sm:$0xff]   ;;  %v385_v13 = vld [vmem:[%s578_s1 + $0x24] ss:$8 sps:$4 sm:$0xff]   ;;  %v499_v15 = vshrl.u32 %v66_v11, 7 }
   0x5   :  { %v387_v16 = vld [vmem:[%s578_s1 + $0x20] ss:$8 sps:$4 sm:$0xff]   ;;  %v388_v17 = vld [vmem:[%s578_s1 + $0x14] ss:$8 sps:$4 sm:$0xff]  }
   0x6   :  { %v68_v18 = vsub.s32 %v65_v14, %v499_v15  ;;  %v333_v19 = vld.sshfl [vmem:[%s577_s0] sm:$0x11 pattern:$0x75316420] }
   0x7   :  { %242 = vmatpush1.bf16.msra.mxu0 %v375_v3  ;;  %v62_v20 = vcombine.high %v333_v19, %v333_v19 }
   0x8   :  { %243 = vmatprep.subr.bf16.mxu0 %v376_v4 }
   0xb   :  { %244 = vmatpush1.bf16.msra.mxu0 %v378_v5 }
   0xc   :  { %245 = vmatprep.subr.bf16.mxu0 %v379_v6 }
   0xf   :  { %246 = vmatpush1.bf16.msra.mxu0 %v381_v7 }
  0x10   :  { %247 = vmatprep.subr.bf16.mxu0 %v382_v8 }
  0x13   :  { %248 = vmatpush1.bf16.msra.mxu0 %v384_v12 }
  0x14   :  { %249 = vmatprep.subr.bf16.mxu0 %v385_v13 }
  0x15   :  { %8 = vsyncpa [#allocation4], 0  ;;  %v390_v21 = vld [vmem:[%s578_s1 + $0x10] ss:$8 sps:$4 sm:$0xff]   ;;  %v391_v22 = vld [vmem:[%s578_s1 + $0x4] ss:$8 sps:$4 sm:$0xff]   ;;  %v76_v23 = vrot.slane %v62_v20, %v68_v18  ;;  %v69_v41 = vrot.slane %v333_v19, %v68_v18 }
  0x16   :  { %v393_v24 = vld [vmem:[%s578_s1] ss:$8 sps:$4 sm:$0xff]   ;;  %v394_v25 = vld [vmem:[%s578_s1 + $0xf4] ss:$8 sps:$4 sm:$0xff]   ;;  %v396_v26 = vld [vmem:[%s578_s1 + $0xf0] ss:$8 sps:$4 sm:$0xff]  }
  0x17   :  { %250 = vmatpush1.bf16.msra.mxu0 %v387_v16  ;;  %271 = vmatprep.mubr.bf16.mxu0 %v76_v23  ;;  %v397_v27 = vld [vmem:[%s578_s1 + $0xe4] ss:$8 sps:$4 sm:$0xff]   ;;  %v399_v28 = vld [vmem:[%s578_s1 + $0xe0] ss:$8 sps:$4 sm:$0xff]   ;;  %v400_v29 = vld [vmem:[%s578_s1 + $0xd4] ss:$8 sps:$4 sm:$0xff]  }
  0x18   :  { %251 = vmatprep.subr.bf16.mxu0 %v388_v17  ;;  %v402_v30 = vld [vmem:[%s578_s1 + $0xd0] ss:$8 sps:$4 sm:$0xff]   ;;  %v403_v31 = vld [vmem:[%s578_s1 + $0xc4] ss:$8 sps:$4 sm:$0xff]   ;;  %v405_v32 = vld [vmem:[%s578_s1 + $0xc0] ss:$8 sps:$4 sm:$0xff]  }
  0x19   :  { %v406_v33 = vld [vmem:[%s578_s1 + $0xb4] ss:$8 sps:$4 sm:$0xff]   ;;  %v408_v34 = vld [vmem:[%s578_s1 + $0xb0] ss:$8 sps:$4 sm:$0xff]   ;;  %v409_v35 = vld [vmem:[%s578_s1 + $0xa4] ss:$8 sps:$4 sm:$0xff]  }
  0x1a   :  { %v411_v36 = vld [vmem:[%s578_s1 + $0xa0] ss:$8 sps:$4 sm:$0xff]   ;;  %v412_v37 = vld [vmem:[%s578_s1 + $0x94] ss:$8 sps:$4 sm:$0xff]   ;;  %v414_v38 = vld [vmem:[%s578_s1 + $0x90] ss:$8 sps:$4 sm:$0xff]  }
  0x1b   :  { %252 = vmatpush1.bf16.msra.mxu0 %v390_v21  ;;  %v415_v39 = vld [vmem:[%s578_s1 + $0x84] ss:$8 sps:$4 sm:$0xff]   ;;  %v417_v40 = vld [vmem:[%s578_s1 + $0x80] ss:$8 sps:$4 sm:$0xff]   ;;  %v443_v42 = vmov 0.0   ;;  %v301_v48 = vsub.s32 0, %v499_v15 }
  0x1c   :  { %253 = vmatprep.subr.bf16.mxu0 %v391_v22  ;;  %19 = vst [vmem:[#allocation2] sm:$0xf] %v443_v42  ;;  %v444_v43 = vmov 1983009808   ;;  %v305_v49 = vsub.s32 1, %v499_v15  ;;  %s445_s1 = smov [#allocation3]  }
  0x1d   :  { %v284_v44 = vunpack.c.l.s4 %v444_v43  ;;  %v297_v51 = vld [vmem:[%s579_s2] sm:$0x3]  ;;  %s325_s24 = sshll.u32 %s445_s1, 4  ;;  %s326_s24 = int_to_ptr.vmem [resolvable:$true] %s325_s24 }
  0x1e   :  { %v302_v56 = vrot.slane %v297_v51, %v301_v48  ;;  %v306_v57 = vrot.slane %v297_v51, %v305_v49  ;;  %s420_s2 = scalar_lea.vmem %s326_s24, 64  ;;  %p425_p1 = scmp.lt.s32.totalorder %s326_s24, %s326_s24 }
  0x1f   :  { %254 = vmatpush1.bf16.msra.mxu0 %v393_v24  ;;  %v285_v45 = vunpack.c.0.s8 %v284_v44  ;;  %p421_p0 = scmp.ne.s32.totalorder %s326_s24, %s420_s2  ;;  %p426_p2 = scmp.lt.s32.totalorder %s420_s2, %s420_s2 }
  0x20   :  { %255 = vmatprep.subr.bf16.mxu0 %v394_v25  ;;  %v307_v60 = vcombine.low %v302_v56, %v306_v57 }
  0x21   :  { %v288_v47 = vsub.s32 %v285_v45, %v499_v15  ;;  %p427_p3 = por %p426_p2, %p425_p1 }
  0x23   :  { %256 = vmatpush2.bf16.msra.mxu0 %v396_v26  ;;  %v20_v53 = vld [vmem:[#allocation2] sm:$0xf]  ;;  %v314_v61 = vrot.slane %v307_v60, %v288_v47  ;;  %p428_p4 = pnand %p427_p3, %p421_p0 }
  0x24   :  { %257 = vmatprep.subr.bf16.mxu0 %v397_v27 }
  0x27   :  { %258 = vmatpush2.bf16.msra.mxu0 %v399_v28 }
  0x28   :  { %259 = vmatprep.subr.bf16.mxu0 %v400_v29 }
  0x2b   :  { %260 = vmatpush2.bf16.msra.mxu0 %v402_v30 }
  0x2c   :  { %261 = vmatprep.subr.bf16.mxu0 %v403_v31 }
  0x2f   :  { %262 = vmatpush2.bf16.msra.mxu0 %v405_v32 }
  0x30   :  { %263 = vmatprep.subr.bf16.mxu0 %v406_v33 }
  0x33   :  { %264 = vmatpush2.bf16.msra.mxu0 %v408_v34 }
  0x34   :  { %265 = vmatprep.subr.bf16.mxu0 %v409_v35 }
  0x37   :  { %266 = vmatpush2.bf16.msra.mxu0 %v411_v36 }
  0x38   :  { %267 = vmatprep.subr.bf16.mxu0 %v412_v37 }
  0x3b   :  { %268 = vmatpush2.bf16.msra.mxu0 %v414_v38 }
  0x3c   :  { %269 = vmatprep.subr.bf16.mxu0 %v415_v39 }
  0x3f   :  { %270 = vmatpush2.bf16.msra.mxu0 %v417_v40 }
  0x42   :  { %272 = vmatmul.mubr.bf16.vlgmr.msra.gmra.mxu0 %v69_v41 }
 0x102   :  { %v273_v46 = vpop.f32.mrf.mxu0 }
 0x104   :  { %v275_v50 = vpop.f32.mrf.mxu0 }
 0x105   :  { %v282_v52 = vcombine.low %v273_v46, %v275_v50 }
 0x106   :  { %v277_v54 = vpop.f32.mrf.mxu0 }
 0x107   :  { %v289_v55 = vrot.slane %v282_v52, %v288_v47 }
 0x108   :  { %v278_v58 = vpop.f32.mrf.mxu0 }
 0x109   :  { %v291_v59 = vadd.f32 %v289_v55, %v20_v53 }
 0x10b   :  { %292 = vst [vmem:[#allocation2] sm:$0xf] %v291_v59 }
 0x112   :  { %v296_v62 = vld [vmem:[#allocation2] sm:$0xf] }
 0x113   :  { %v316_v63 = vadd.f32 %v314_v61, %v296_v62 }
 0x115   :  { %418 = vtanh.f32 %v316_v63 }
 0x122   :  { %v419_v0 = vpop.eup %418 }
 0x123   :  { %318 = vst [vmem:[#allocation3] sm:$0xf] %v419_v0 }
 0x124   :  { %431 = shalt.err (!%p428_p4)
}
 0x125   :  { %328 = dma.vmem_to_hbm [thread:$0]  %s326_s24, 64, %s580_s3, [#allocation4]  }
 0x126   :  { %440 = dma.done.wait [#allocation4], 64  }
 0x127   :  { %441 = vsyncadd [#allocation4], 4294967232 }
 0x128   :  { %332 = vsyncpa [#allocation4], 1 }

</bundles_post_ra>
